<compile_context>
chip_gen: v7x
topology: tpu7x:2x2x1
jax: 0.10.0
libtpu: 0.0.40
codegen_flags: <defaults>
</compile_context>

<pallas_src>
import functools

import jax
import jax.numpy as jnp
from jax.experimental import pallas as pl
from jax.experimental.pallas import tpu as pltpu


# ---------------------------------------------------------------------------
# Device / tiling helpers
# ---------------------------------------------------------------------------

@functools.lru_cache(maxsize=None)
def _num_tensorcores():
    """2 on chips exposing two TensorCores to one program (v7x/v4/v5p), else 1."""
    try:
        kind = jax.devices()[0].device_kind.lower()
    except Exception:
        return 1
    return 2 if ("v7" in kind or "v4" in kind or "v5p" in kind) else 1


@functools.lru_cache(maxsize=None)
def _lane_grid(M):
    """Pick (grid, lane-tile) for the conv matmul's lane axis."""
    n_cores = _num_tensorcores()
    if M % 128:
        return 1, M                       # not lane aligned: single full block
    cap = 1024 if n_cores >= 2 else 2048  # v7x: 64 MiB VMEM -> smaller tiles
    g = 1
    while (M // g > cap) or (g < n_cores):
        g2 = g * 2
        if M % g2 or (M // g2) % 128:
            break
        g = g2
    return g, M // g


# ---------------------------------------------------------------------------
# Pallas kernels
# ---------------------------------------------------------------------------

def _sigmoid(v):
    # Exact sigmoid (review correctness note); exp goes to the EUP.
    return 1.0 / (1.0 + jnp.exp(-v))


def _apply_act(z, act):
    if act == "none":
        return z
    if act == "leaky0.1":
        return jnp.where(z >= 0, z, 0.1 * z)
    if act == "leaky0.2":
        return jnp.where(z >= 0, z, 0.2 * z)
    if act == "sigmoid":
        return _sigmoid(z)
    raise ValueError(act)


def _conv_kernel(x_ref, w_ref, b_ref, *refs, act, act2, mode, n_res,
                 act_split, clamp):
    """One lane-dense matmul (Cout, T) x (T, Mb) with a fused epilogue.

    Epilogue: bias -> act (optionally only rows < act_split) -> (+ residual)
    -> act2 -> optional special mode:
      * "couple":      z = x2 * exp(clamp*(2*sigmoid(h)-1)) + z
      * "sig_mul_add": z = mul * sigmoid(z) + add
    """
    o_ref = refs[-1]
    extras = refs[:-1]
    z = jnp.dot(w_ref[...], x_ref[...], preferred_element_type=jnp.float32)
    z = z + b_ref[...]                                 # (Cout, 1) bias, f32
    if act_split:
        rows = jax.lax.broadcasted_iota(jnp.int32, z.shape, 0)
        z = jnp.where(rows < act_split, _apply_act(z, act), z)
    else:
        z = _apply_act(z, act)
    if n_res:
        z = z + extras[0][...].astype(jnp.float32)
    z = _apply_act(z, act2)
    if mode == "couple":
        x2 = extras[n_res][...].astype(jnp.float32)
        h = extras[n_res + 1][...].astype(jnp.float32)
        s = clamp * (2.0 * _sigmoid(h) - 1.0)
        z = x2 * jnp.exp(s) + z
    elif mode == "sig_mul_add":
        mul = extras[n_res][...].astype(jnp.float32)
        add = extras[n_res + 1][...].astype(jnp.float32)
        z = mul * _sigmoid(z) + add
    o_ref[...] = z.astype(o_ref.dtype)


@functools.lru_cache(maxsize=None)
def _conv_call(T, M, Cout, act, act2, mode, n_res, n_extra, act_split, out_dtype):
    G, Mb = _lane_grid(M)
    kern = functools.partial(_conv_kernel, act=act, act2=act2, mode=mode,
                             n_res=n_res, act_split=act_split, clamp=0.8)
    in_specs = [pl.BlockSpec((T, Mb), lambda i: (0, i)),
                pl.BlockSpec((Cout, T), lambda i: (0, 0)),
                pl.BlockSpec((Cout, 1), lambda i: (0, 0))]
    in_specs += [pl.BlockSpec((Cout, Mb), lambda i: (0, i))] * (n_res + n_extra)
    return pl.pallas_call(
        kern,
        out_shape=jax.ShapeDtypeStruct((Cout, M), out_dtype),
        grid=(G,),
        in_specs=in_specs,
        out_specs=pl.BlockSpec((Cout, Mb), lambda i: (0, i)),
        compiler_params=pltpu.CompilerParams(
            dimension_semantics=("parallel",)),
    )


def conv2d(x, p, *, dilation=1, act="none", act2="none", res=None,
           mode="plain", extra=(), act_split=0, out_dtype=jnp.bfloat16):
    """Conv2d (+ fused epilogue).  x: (Cin, N, H, W) -> (Cout, N, H, W).

    p["w"]: (Cout, K*K*Cin) bf16 with (ky, kx, ci) contraction order,
    p["b"]: (Cout, 1) f32.
    """
    w, b = p["w"], p["b"]
    Cout, T = w.shape
    Cin, N, H, W = x.shape
    K = int(round((T // Cin) ** 0.5))
    M = N * H * W
    if K == 1:
        patches = x.reshape(Cin, M).astype(jnp.bfloat16)
    else:
        pad = dilation * (K // 2)
        xp = jnp.pad(x.astype(jnp.bfloat16),
                     ((0, 0), (0, 0), (pad, pad), (pad, pad)))
        slabs = [xp[:, :, ky * dilation:ky * dilation + H,
                    kx * dilation:kx * dilation + W]
                 for ky in range(K) for kx in range(K)]
        patches = jnp.concatenate(slabs, axis=0).reshape(K * K * Cin, M)

    args = [patches, w, b]
    n_res = 0
    if res is not None:
        args.append(res.reshape(Cout, M))
        n_res = 1
    for e in extra:
        args.append(e.reshape(Cout, M))
    fn = _conv_call(T, M, Cout, act, act2, mode, n_res, len(extra),
                    act_split, jnp.dtype(out_dtype))
    return fn(*args).reshape(Cout, N, H, W)


def _pair_kernel(x_ref, w1_ref, b1_ref, w2_ref, b2_ref, o_ref):
    """Fused 1x1 -> LeakyReLU(0.1) -> 1x1, intermediate kept in vregs."""
    z = jnp.dot(w1_ref[...], x_ref[...],
                preferred_element_type=jnp.float32) + b1_ref[...]
    z = jnp.where(z >= 0, z, 0.1 * z)
    z = jnp.dot(w2_ref[...], z.astype(jnp.bfloat16),
                preferred_element_type=jnp.float32) + b2_ref[...]
    o_ref[...] = z


@functools.lru_cache(maxsize=None)
def _pair_call(Cin, Cmid, Cout, Mp):
    # grid=(2,): amp path and pha path, each with its own weights.
    return pl.pallas_call(
        _pair_kernel,
        out_shape=jax.ShapeDtypeStruct((2, Cout, Mp), jnp.float32),
        grid=(2,),
        in_specs=[pl.BlockSpec((None, Cin, Mp), lambda i: (i, 0, 0)),
                  pl.BlockSpec((None, Cmid, Cin), lambda i: (i, 0, 0)),
                  pl.BlockSpec((None, Cmid, 1), lambda i: (i, 0, 0)),
                  pl.BlockSpec((None, Cout, Cmid), lambda i: (i, 0, 0)),
                  pl.BlockSpec((None, Cout, 1), lambda i: (i, 0, 0))],
        out_specs=pl.BlockSpec((None, Cout, Mp), lambda i: (i, 0, 0)),
        compiler_params=pltpu.CompilerParams(
            dimension_semantics=("parallel",)),
    )


def _chatt_kernel(x_ref, w1_ref, b1_ref, w2_ref, b2_ref, o_ref, *, inv_S):
    """Fused channel attention: single-pass (std+mean) stats -> 1x1 -> leaky
    -> 1x1 -> sigmoid -> broadcast multiply.  x: (2C, N, S), S=H*W on lanes."""
    x = x_ref[...].astype(jnp.float32)
    mean = jnp.sum(x, axis=-1) * inv_S                        # (2C, N)
    meansq = jnp.sum(x * x, axis=-1) * inv_S
    stats = jnp.sqrt(jnp.maximum(meansq - mean * mean, 0.0)) + mean
    z = jnp.dot(w1_ref[...].astype(jnp.float32), stats,
                preferred_element_type=jnp.float32) + b1_ref[...]
    z = jnp.where(z >= 0, z, 0.1 * z)
    z = jnp.dot(w2_ref[...].astype(jnp.float32), z,
                preferred_element_type=jnp.float32) + b2_ref[...]
    gate = _sigmoid(z)                                        # (2C, N)
    o_ref[...] = (gate[:, :, None] * x).astype(o_ref.dtype)


@functools.lru_cache(maxsize=None)
def _chatt_call(C2, N, S, Cmid, dtype):
    kern = functools.partial(_chatt_kernel, inv_S=1.0 / float(S))
    return pl.pallas_call(
        kern,
        out_shape=jax.ShapeDtypeStruct((C2, N, S), dtype),
        grid=(1,),
        in_specs=[pl.BlockSpec((C2, N, S), lambda i: (0, 0, 0)),
                  pl.BlockSpec((Cmid, C2), lambda i: (0, 0)),
                  pl.BlockSpec((Cmid, 1), lambda i: (0, 0)),
                  pl.BlockSpec((C2, Cmid), lambda i: (0, 0)),
                  pl.BlockSpec((C2, 1), lambda i: (0, 0))],
        out_specs=pl.BlockSpec((C2, N, S), lambda i: (0, 0, 0)),
    )


def channel_attention(cat_f, p1, p2):
    C2, N, H, W = cat_f.shape
    S = H * W
    Cmid = p1["w"].shape[0]
    out = _chatt_call(C2, N, S, Cmid, jnp.dtype(cat_f.dtype))(
        cat_f.reshape(C2, N, S), p1["w"], p1["b"], p2["w"], p2["b"])
    return out.reshape(C2, N, H, W)


# ---------------------------------------------------------------------------
# Module forward functions (Pallas kernels + XLA glue), channel-outermost
# ---------------------------------------------------------------------------

def unet_block_fwd(p, x, d=1, post_act="none"):
    # out = lrelu0.1(conv2(lrelu0.1(conv1(x)))) + identity(x)  [+ optional lrelu0.2]
    # conv1 and the 1x1 identity share one fused matmul (act only on conv1 rows).
    cout = p["c2"]["w"].shape[0]
    both = conv2d(x, p["c1id"], dilation=d, act="leaky0.1", act_split=cout)
    t, ident = both[:cout], both[cout:]
    return conv2d(t, p["c2"], dilation=d, act="leaky0.1", res=ident,
                  act2=post_act)


def dense_block_fwd(p, x, d=1, res=None, couple_with=None):
    x1 = unet_block_fwd(p["b1"], x, d, post_act="leaky0.2")
    x2 = unet_block_fwd(p["b2"], x1, d, post_act="leaky0.2")
    cat = jnp.concatenate([x, x1, x2], axis=0)
    if couple_with is not None:
        # g = lrelu0.2(conv3(cat));  out = x2*exp(0.8*(2*sigmoid(h)-1)) + g
        return conv2d(cat, p["c3"], dilation=d, act="leaky0.2",
                      mode="couple", extra=couple_with)
    # out = lrelu0.2(conv3(cat)) [+ res]
    return conv2d(cat, p["c3"], dilation=d, act="leaky0.2", res=res)


def inv_block_fwd(p, x, split1):
    x = conv2d(x, p["invconv"])            # invertible 1x1 conv (forward only)
    x1, x2 = x[:split1], x[split1:]
    y1 = dense_block_fwd(p["F"], x2, res=x1)                  # y1 = x1 + F(x2)
    h = dense_block_fwd(p["H"], y1)
    y2 = dense_block_fwd(p["G"], y1, couple_with=(x2, h))     # fused coupling
    return jnp.concatenate([y1, y2], axis=0)


def fre_process_fwd(p, msf, panf):
    C, N, H, W = msf.shape
    msp = conv2d(msf, p["pre1"], out_dtype=jnp.float32) + 1e-8
    pap = conv2d(panf, p["pre2"], out_dtype=jnp.float32) + 1e-8
    # FFT has no Pallas equivalent -> XLA FFT.
    msF = jnp.fft.rfft2(msp, axes=(2, 3))
    paF = jnp.fft.rfft2(pap, axes=(2, 3))
    Wf = W // 2 + 1
    Mf = N * H * Wf
    amp_in = jnp.concatenate([jnp.abs(msF), jnp.abs(paF)], axis=0).reshape(2 * C, Mf)
    pha_in = jnp.concatenate([jnp.angle(msF), jnp.angle(paF)], axis=0).reshape(2 * C, Mf)
    # Stack amp/pha on a grid axis and pad lanes to a 128 multiple so the fused
    # double-1x1 kernel keeps unmasked, lane-dense stores.
    Mp = pl.cdiv(Mf, 128) * 128
    pair = jnp.stack([amp_in, pha_in], axis=0).astype(jnp.bfloat16)
    if Mp != Mf:
        pair = jnp.pad(pair, ((0, 0), (0, 0), (0, Mp - Mf)))
    fused = _pair_call(2 * C, C, C, Mp)(pair, p["fuse_w1"], p["fuse_b1"],
                                        p["fuse_w2"], p["fuse_b2"])
    amp = fused[0, :, :Mf].reshape(C, N, H, Wf)
    pha = fused[1, :, :Mf].reshape(C, N, H, Wf)
    real = amp * jnp.cos(pha) + 1e-8
    imag = amp * jnp.sin(pha) + 1e-8
    # torch.complex(real, imag) + 1e-8 adds 1e-8 to the real part only.
    cplx = (real + 1e-8) + 1j * imag
    out = jnp.abs(jnp.fft.irfft2(cplx, s=(H, W), axes=(2, 3))).astype(jnp.float32)
    return conv2d(out, p["post"])


def spa_fre_fwd(p, msf, pan):
    C = msf.shape[0]
    panpre = conv2d(pan, p["panprocess"])
    panf = conv2d(panpre, p["panpre"])
    z = jnp.concatenate([msf, panf], axis=0)
    z = inv_block_fwd(p["inv"], z, C)
    spafuse = conv2d(z, p["spa_conv"])
    frefuse = fre_process_fwd(p["fre"], msf, panf)
    diff = spafuse - frefuse
    sa1 = conv2d(diff, p["sa1"], act="leaky0.1")
    # spa_res = frefuse * sigmoid(sa2(sa1)) + spafuse   (fused epilogue)
    spa_res = conv2d(sa1, p["sa2"], mode="sig_mul_add", extra=(frefuse, spafuse))
    cat_f = jnp.concatenate([spa_res, frefuse], axis=0)
    gated = channel_attention(cat_f, p["ca1"], p["ca2"])
    out = conv2d(gated, p["post"], res=msf)               # cha_res + msf fused
    return out, panpre


def feature_process_fwd(params, ms, pan):
    # NCHW -> channel-outermost (C, N, H, W)
    ms = jnp.transpose(ms, (1, 0, 2, 3)).astype(jnp.float32)
    pan = jnp.transpose(pan, (1, 0, 2, 3)).astype(jnp.float32)
    msf = conv2d(ms, params["conv_p"])
    panf = conv2d(pan, params["conv_p1"])

    def body(carry, blk):
        m, p = carry
        m, p = spa_fre_fwd(blk, m, p)
        return (m, p), m

    (_, _), outs = jax.lax.scan(body, (msf, panf), params["blocks"])
    C, N, H, W = msf.shape
    cat = outs.reshape(5 * C, N, H, W)            # block-major channel order
    msout = conv2d(cat, params["fuse"], out_dtype=jnp.float32)
    return jnp.transpose(msout, (1, 0, 2, 3))     # back to NCHW


# ---------------------------------------------------------------------------
# Deterministic parameter initialization (synthetic, mirrors __init__ shapes)
# ---------------------------------------------------------------------------

class KeyGen:
    def __init__(self, seed):
        self._key = jax.random.PRNGKey(seed)

    def __call__(self):
        self._key, k = jax.random.split(self._key)
        return k


def make_conv(key, cin, cout, k, scale=0.1):
    fan_in = float(cin * k * k)
    w = jax.random.normal(key, (k, k, cin, cout), jnp.float32) * (scale / fan_in ** 0.5)
    # kernel-ready layout: (Cout, K*K*Cin) with (ky, kx, ci) order, stored bf16
    wr = jnp.transpose(w, (3, 0, 1, 2)).reshape(cout, k * k * cin).astype(jnp.bfloat16)
    return {"w": wr, "b": jnp.zeros((cout, 1), jnp.float32)}


def init_unet(kg, cin, cout):
    idp = make_conv(kg(), cin, cout, 1)
    c1 = make_conv(kg(), cin, cout, 3)
    c2 = make_conv(kg(), cout, cout, 3)
    # Fuse the 1x1 identity conv into conv_1: zero-embed it at the centre tap
    # (ky=kx=1) of a (cout, 9*cin) weight and stack along Cout.
    ide = jnp.zeros((cout, 9 * cin), c1["w"].dtype)
    ide = ide.at[:, 4 * cin:5 * cin].set(idp["w"])
    return {"c1id": {"w": jnp.concatenate([c1["w"], ide], axis=0),
                     "b": jnp.concatenate([c1["b"], idp["b"]], axis=0)},
            "c2": c2}


def init_dense(kg, cin, cout, gc=8):
    return {"b1": init_unet(kg, cin, gc),
            "b2": init_unet(kg, gc, gc),
            "c3": make_conv(kg(), cin + 2 * gc, cout, 3)}


def init_invblock(kg, channel_num, channel_split):
    c2 = channel_num - channel_split
    wm = (jnp.eye(channel_num, dtype=jnp.float32)
          + 0.05 * jax.random.normal(kg(), (channel_num, channel_num), jnp.float32))
    return {"invconv": {"w": wm.astype(jnp.bfloat16),
                        "b": jnp.zeros((channel_num, 1), jnp.float32)},
            "F": init_dense(kg, c2, channel_split),
            "G": init_dense(kg, channel_split, c2),
            "H": init_dense(kg, channel_split, c2)}


def init_fre(kg, C):
    af1 = make_conv(kg(), 2 * C, C, 1)
    af2 = make_conv(kg(), C, C, 1)
    pf1 = make_conv(kg(), 2 * C, C, 1)
    pf2 = make_conv(kg(), C, C, 1)
    return {"pre1": make_conv(kg(), C, C, 1), "pre2": make_conv(kg(), C, C, 1),
            # amp / pha double-1x1 chains, pre-stacked for the grid=(2,) kernel
            "fuse_w1": jnp.stack([af1["w"], pf1["w"]], axis=0),
            "fuse_b1": jnp.stack([af1["b"], pf1["b"]], axis=0),
            "fuse_w2": jnp.stack([af2["w"], pf2["w"]], axis=0),
            "fuse_b2": jnp.stack([af2["b"], pf2["b"]], axis=0),
            "post": make_conv(kg(), C, C, 1)}


def init_spafre(kg, C):
    return {"panprocess": make_conv(kg(), C, C, 3),
            "panpre": make_conv(kg(), C, C, 1),
            "inv": init_invblock(kg, 2 * C, C),
            "spa_conv": make_conv(kg(), 2 * C, C, 1),
            "fre": init_fre(kg, C),
            "sa1": make_conv(kg(), C, C // 2, 3),
            "sa2": make_conv(kg(), C // 2, C, 3),
            "ca1": make_conv(kg(), 2 * C, C // 2, 1),
            "ca2": make_conv(kg(), C // 2, 2 * C, 1),
            "post": make_conv(kg(), 2 * C, C, 3)}


def init_feature_process(kg, C):
    blocks = [init_spafre(kg, C) for _ in range(5)]
    stacked = jax.tree_util.tree_map(lambda *xs: jnp.stack(xs, axis=0), *blocks)
    return {"conv_p": make_conv(kg(), 4, C, 3),
            "conv_p1": make_conv(kg(), 1, C, 3),
            "blocks": stacked,
            "fuse": make_conv(kg(), 5 * C, C, 1)}


# ---------------------------------------------------------------------------

if __name__ == "__main__":
    C = 8          # channels
    N, H, W = 2, 16, 16

    key = jax.random.PRNGKey(0)
    k_ms, k_pan = jax.random.split(key)
    ms = jax.random.normal(k_ms, (N, 4, H, W), jnp.float32)    # NCHW, 4-band MS
    pan = jax.random.normal(k_pan, (N, 1, H, W), jnp.float32)  # NCHW, panchromatic

    params = init_feature_process(KeyGen(0), C)

    fwd = jax.jit(feature_process_fwd)
    out = jax.block_until_ready(fwd(params, ms, pan))
    assert out.shape == (N, C, H, W), out.shape
    assert bool(jnp.all(jnp.isfinite(out)))
    print("KERNEL_OK")
</pallas_src>

<mosaic_0001>
module attributes {stable_mosaic.version = 11 : i64} {
  func.func @_conv_kernel(%arg0: i32, %arg1: memref<9x512xbf16, #tpu.memory_space<vmem>>, %arg2: memref<8x9xbf16, #tpu.memory_space<vmem>>, %arg3: memref<8x1xf32, #tpu.memory_space<vmem>>, %arg4: memref<8x512xbf16, #tpu.memory_space<vmem>>) attributes {dimension_semantics = [#tpu.dimension_semantics<parallel>], iteration_bounds = array<i64: 1>, scalar_prefetch = 0 : i64, scratch_operands = 0 : i64, tpu.core_type = #tpu.core_type<tc>, window_params = [{transform_indices = @transform_0, window_bounds = array<i64: 9, 512>}, {pipeline_mode = #tpu.pipeline_mode<synchronous>, transform_indices = @transform_1, window_bounds = array<i64: 8, 9>}, {pipeline_mode = #tpu.pipeline_mode<synchronous>, transform_indices = @transform_2, window_bounds = array<i64: 8, 1>}, {transform_indices = @transform_3, window_bounds = array<i64: 8, 512>}]} {
    %c0 = arith.constant 0 : index
    %c0_0 = arith.constant 0 : index
    %0 = vector.load %arg2[%c0, %c0_0] : memref<8x9xbf16, #tpu.memory_space<vmem>>, vector<8x9xbf16>
    %c0_1 = arith.constant 0 : index
    %c0_2 = arith.constant 0 : index
    %1 = vector.load %arg1[%c0_1, %c0_2] : memref<9x512xbf16, #tpu.memory_space<vmem>>, vector<9x512xbf16>
    %cst = arith.constant dense<0.000000e+00> : vector<8x512xf32>
    %2 = tpu.matmul %0, %1, %cst {dimension_numbers = #tpu.dot_dimension_numbers<[1], [0], [0], [1], [0, 0, 1, 1], [], []>} : vector<8x9xbf16>, vector<9x512xbf16>, vector<8x512xf32> -> vector<8x512xf32>
    %c0_3 = arith.constant 0 : index
    %c0_4 = arith.constant 0 : index
    %3 = vector.load %arg3[%c0_3, %c0_4] : memref<8x1xf32, #tpu.memory_space<vmem>>, vector<8x1xf32>
    %4 = vector.broadcast %3 : vector<8x1xf32> to vector<8x512xf32>
    %5 = arith.addf %2, %4 : vector<8x512xf32>
    %6 = arith.truncf %5 : vector<8x512xf32> to vector<8x512xbf16>
    %c0_5 = arith.constant 0 : index
    %c0_6 = arith.constant 0 : index
    %7 = vector.load %arg4[%c0_5, %c0_6] : memref<8x512xbf16, #tpu.memory_space<vmem>>, vector<8x512xbf16>
    tpu.vector_store %arg4[%c0_5, %c0_6], %6 {strides = array<i32>} : memref<8x512xbf16, #tpu.memory_space<vmem>>, vector<8x512xbf16>,
    return
  }
  func.func @transform_0(%arg0: i32) -> (i32, i32) {
    %c0_i32 = arith.constant 0 : i32
    %c0_i32_0 = arith.constant 0 : i32
    return %c0_i32, %arg0 : i32, i32
  }
  func.func @transform_1(%arg0: i32) -> (i32, i32) {
    %c0_i32 = arith.constant 0 : i32
    %c0_i32_0 = arith.constant 0 : i32
    %c0_i32_1 = arith.constant 0 : i32
    return %c0_i32, %c0_i32_0 : i32, i32
  }
  func.func @transform_2(%arg0: i32) -> (i32, i32) {
    %c0_i32 = arith.constant 0 : i32
    %c0_i32_0 = arith.constant 0 : i32
    %c0_i32_1 = arith.constant 0 : i32
    return %c0_i32, %c0_i32_0 : i32, i32
  }
  func.func @transform_3(%arg0: i32) -> (i32, i32) {
    %c0_i32 = arith.constant 0 : i32
    %c0_i32_0 = arith.constant 0 : i32
    return %c0_i32, %arg0 : i32, i32
  }
}

module attributes {stable_mosaic.version = 11 : i64} {
  func.func @_conv_kernel(%arg0: i32, %arg1: memref<36x512xbf16, #tpu.memory_space<vmem>>, %arg2: memref<8x36xbf16, #tpu.memory_space<vmem>>, %arg3: memref<8x1xf32, #tpu.memory_space<vmem>>, %arg4: memref<8x512xbf16, #tpu.memory_space<vmem>>) attributes {dimension_semantics = [#tpu.dimension_semantics<parallel>], iteration_bounds = array<i64: 1>, scalar_prefetch = 0 : i64, scratch_operands = 0 : i64, tpu.core_type = #tpu.core_type<tc>, window_params = [{transform_indices = @transform_0, window_bounds = array<i64: 36, 512>}, {pipeline_mode = #tpu.pipeline_mode<synchronous>, transform_indices = @transform_1, window_bounds = array<i64: 8, 36>}, {pipeline_mode = #tpu.pipeline_mode<synchronous>, transform_indices = @transform_2, window_bounds = array<i64: 8, 1>}, {transform_indices = @transform_3, window_bounds = array<i64: 8, 512>}]} {
    %c0 = arith.constant 0 : index
    %c0_0 = arith.constant 0 : index
    %0 = vector.load %arg2[%c0, %c0_0] : memref<8x36xbf16, #tpu.memory_space<vmem>>, vector<8x36xbf16>
    %c0_1 = arith.constant 0 : index
    %c0_2 = arith.constant 0 : index
    %1 = vector.load %arg1[%c0_1, %c0_2] : memref<36x512xbf16, #tpu.memory_space<vmem>>, vector<36x512xbf16>
    %cst = arith.constant dense<0.000000e+00> : vector<8x512xf32>
    %2 = tpu.matmul %0, %1, %cst {dimension_numbers = #tpu.dot_dimension_numbers<[1], [0], [0], [1], [0, 0, 1, 1], [], []>} : vector<8x36xbf16>, vector<36x512xbf16>, vector<8x512xf32> -> vector<8x512xf32>
    %c0_3 = arith.constant 0 : index
    %c0_4 = arith.constant 0 : index
    %3 = vector.load %arg3[%c0_3, %c0_4] : memref<8x1xf32, #tpu.memory_space<vmem>>, vector<8x1xf32>
    %4 = vector.broadcast %3 : vector<8x1xf32> to vector<8x512xf32>
    %5 = arith.addf %2, %4 : vector<8x512xf32>
    %6 = arith.truncf %5 : vector<8x512xf32> to vector<8x512xbf16>
    %c0_5 = arith.constant 0 : index
    %c0_6 = arith.constant 0 : index
    %7 = vector.load %arg4[%c0_5, %c0_6] : memref<8x512xbf16, #tpu.memory_space<vmem>>, vector<8x512xbf16>
    tpu.vector_store %arg4[%c0_5, %c0_6], %6 {strides = array<i32>} : memref<8x512xbf16, #tpu.memory_space<vmem>>, vector<8x512xbf16>,
    return
  }
  func.func @transform_0(%arg0: i32) -> (i32, i32) {
    %c0_i32 = arith.constant 0 : i32
    %c0_i32_0 = arith.constant 0 : i32
    return %c0_i32, %arg0 : i32, i32
  }
  func.func @transform_1(%arg0: i32) -> (i32, i32) {
    %c0_i32 = arith.constant 0 : i32
    %c0_i32_0 = arith.constant 0 : i32
    %c0_i32_1 = arith.constant 0 : i32
    return %c0_i32, %c0_i32_0 : i32, i32
  }
  func.func @transform_2(%arg0: i32) -> (i32, i32) {
    %c0_i32 = arith.constant 0 : i32
    %c0_i32_0 = arith.constant 0 : i32
    %c0_i32_1 = arith.constant 0 : i32
    return %c0_i32, %c0_i32_0 : i32, i32
  }
  func.func @transform_3(%arg0: i32) -> (i32, i32) {
    %c0_i32 = arith.constant 0 : i32
    %c0_i32_0 = arith.constant 0 : i32
    return %c0_i32, %arg0 : i32, i32
  }
}

module attributes {stable_mosaic.version = 11 : i64} {
  func.func @_conv_kernel(%arg0: i32, %arg1: memref<8x512xbf16, #tpu.memory_space<vmem>>, %arg2: memref<8x8xbf16, #tpu.memory_space<vmem>>, %arg3: memref<8x1xf32, #tpu.memory_space<vmem>>, %arg4: memref<8x512xf32, #tpu.memory_space<vmem>>) attributes {dimension_semantics = [#tpu.dimension_semantics<parallel>], iteration_bounds = array<i64: 1>, scalar_prefetch = 0 : i64, scratch_operands = 0 : i64, tpu.core_type = #tpu.core_type<tc>, window_params = [{transform_indices = @transform_0, window_bounds = array<i64: 8, 512>}, {pipeline_mode = #tpu.pipeline_mode<synchronous>, transform_indices = @transform_1, window_bounds = array<i64: 8, 8>}, {pipeline_mode = #tpu.pipeline_mode<synchronous>, transform_indices = @transform_2, window_bounds = array<i64: 8, 1>}, {transform_indices = @transform_3, window_bounds = array<i64: 8, 512>}]} {
    %c0 = arith.constant 0 : index
    %c0_0 = arith.constant 0 : index
    %0 = vector.load %arg2[%c0, %c0_0] : memref<8x8xbf16, #tpu.memory_space<vmem>>, vector<8x8xbf16>
    %c0_1 = arith.constant 0 : index
    %c0_2 = arith.constant 0 : index
    %1 = vector.load %arg1[%c0_1, %c0_2] : memref<8x512xbf16, #tpu.memory_space<vmem>>, vector<8x512xbf16>
    %cst = arith.constant dense<0.000000e+00> : vector<8x512xf32>
    %2 = tpu.matmul %0, %1, %cst {dimension_numbers = #tpu.dot_dimension_numbers<[1], [0], [0], [1], [0, 0, 1, 1], [], []>} : vector<8x8xbf16>, vector<8x512xbf16>, vector<8x512xf32> -> vector<8x512xf32>
    %c0_3 = arith.constant 0 : index
    %c0_4 = arith.constant 0 : index
    %3 = vector.load %arg3[%c0_3, %c0_4] : memref<8x1xf32, #tpu.memory_space<vmem>>, vector<8x1xf32>
    %4 = vector.broadcast %3 : vector<8x1xf32> to vector<8x512xf32>
    %5 = arith.addf %2, %4 : vector<8x512xf32>
    %c0_5 = arith.constant 0 : index
    %c0_6 = arith.constant 0 : index
    %6 = vector.load %arg4[%c0_5, %c0_6] : memref<8x512xf32, #tpu.memory_space<vmem>>, vector<8x512xf32>
    tpu.vector_store %arg4[%c0_5, %c0_6], %5 {strides = array<i32>} : memref<8x512xf32, #tpu.memory_space<vmem>>, vector<8x512xf32>,
    return
  }
  func.func @transform_0(%arg0: i32) -> (i32, i32) {
    %c0_i32 = arith.constant 0 : i32
    %c0_i32_0 = arith.constant 0 : i32
    return %c0_i32, %arg0 : i32, i32
  }
  func.func @transform_1(%arg0: i32) -> (i32, i32) {
    %c0_i32 = arith.constant 0 : i32
    %c0_i32_0 = arith.constant 0 : i32
    %c0_i32_1 = arith.constant 0 : i32
    return %c0_i32, %c0_i32_0 : i32, i32
  }
  func.func @transform_2(%arg0: i32) -> (i32, i32) {
    %c0_i32 = arith.constant 0 : i32
    %c0_i32_0 = arith.constant 0 : i32
    %c0_i32_1 = arith.constant 0 : i32
    return %c0_i32, %c0_i32_0 : i32, i32
  }
  func.func @transform_3(%arg0: i32) -> (i32, i32) {
    %c0_i32 = arith.constant 0 : i32
    %c0_i32_0 = arith.constant 0 : i32
    return %c0_i32, %arg0 : i32, i32
  }
}

module attributes {stable_mosaic.version = 11 : i64} {
  func.func @_conv_kernel(%arg0: i32, %arg1: memref<72x512xbf16, #tpu.memory_space<vmem>>, %arg2: memref<8x72xbf16, #tpu.memory_space<vmem>>, %arg3: memref<8x1xf32, #tpu.memory_space<vmem>>, %arg4: memref<8x512xbf16, #tpu.memory_space<vmem>>) attributes {dimension_semantics = [#tpu.dimension_semantics<parallel>], iteration_bounds = array<i64: 1>, scalar_prefetch = 0 : i64, scratch_operands = 0 : i64, tpu.core_type = #tpu.core_type<tc>, window_params = [{transform_indices = @transform_0, window_bounds = array<i64: 72, 512>}, {pipeline_mode = #tpu.pipeline_mode<synchronous>, transform_indices = @transform_1, window_bounds = array<i64: 8, 72>}, {pipeline_mode = #tpu.pipeline_mode<synchronous>, transform_indices = @transform_2, window_bounds = array<i64: 8, 1>}, {transform_indices = @transform_3, window_bounds = array<i64: 8, 512>}]} {
    %c0 = arith.constant 0 : index
    %c0_0 = arith.constant 0 : index
    %0 = vector.load %arg2[%c0, %c0_0] : memref<8x72xbf16, #tpu.memory_space<vmem>>, vector<8x72xbf16>
    %c0_1 = arith.constant 0 : index
    %c0_2 = arith.constant 0 : index
    %1 = vector.load %arg1[%c0_1, %c0_2] : memref<72x512xbf16, #tpu.memory_space<vmem>>, vector<72x512xbf16>
    %cst = arith.constant dense<0.000000e+00> : vector<8x512xf32>
    %2 = tpu.matmul %0, %1, %cst {dimension_numbers = #tpu.dot_dimension_numbers<[1], [0], [0], [1], [0, 0, 1, 1], [], []>} : vector<8x72xbf16>, vector<72x512xbf16>, vector<8x512xf32> -> vector<8x512xf32>
    %c0_3 = arith.constant 0 : index
    %c0_4 = arith.constant 0 : index
    %3 = vector.load %arg3[%c0_3, %c0_4] : memref<8x1xf32, #tpu.memory_space<vmem>>, vector<8x1xf32>
    %4 = vector.broadcast %3 : vector<8x1xf32> to vector<8x512xf32>
    %5 = arith.addf %2, %4 : vector<8x512xf32>
    %6 = arith.truncf %5 : vector<8x512xf32> to vector<8x512xbf16>
    %c0_5 = arith.constant 0 : index
    %c0_6 = arith.constant 0 : index
    %7 = vector.load %arg4[%c0_5, %c0_6] : memref<8x512xbf16, #tpu.memory_space<vmem>>, vector<8x512xbf16>
    tpu.vector_store %arg4[%c0_5, %c0_6], %6 {strides = array<i32>} : memref<8x512xbf16, #tpu.memory_space<vmem>>, vector<8x512xbf16>,
    return
  }
  func.func @transform_0(%arg0: i32) -> (i32, i32) {
    %c0_i32 = arith.constant 0 : i32
    %c0_i32_0 = arith.constant 0 : i32
    return %c0_i32, %arg0 : i32, i32
  }
  func.func @transform_1(%arg0: i32) -> (i32, i32) {
    %c0_i32 = arith.constant 0 : i32
    %c0_i32_0 = arith.constant 0 : i32
    %c0_i32_1 = arith.constant 0 : i32
    return %c0_i32, %c0_i32_0 : i32, i32
  }
  func.func @transform_2(%arg0: i32) -> (i32, i32) {
    %c0_i32 = arith.constant 0 : i32
    %c0_i32_0 = arith.constant 0 : i32
    %c0_i32_1 = arith.constant 0 : i32
    return %c0_i32, %c0_i32_0 : i32, i32
  }
  func.func @transform_3(%arg0: i32) -> (i32, i32) {
    %c0_i32 = arith.constant 0 : i32
    %c0_i32_0 = arith.constant 0 : i32
    return %c0_i32, %arg0 : i32, i32
  }
}

module attributes {stable_mosaic.version = 11 : i64} {
  func.func @_conv_kernel(%arg0: i32, %arg1: memref<8x512xbf16, #tpu.memory_space<vmem>>, %arg2: memref<8x8xbf16, #tpu.memory_space<vmem>>, %arg3: memref<8x1xf32, #tpu.memory_space<vmem>>, %arg4: memref<8x512xbf16, #tpu.memory_space<vmem>>) attributes {dimension_semantics = [#tpu.dimension_semantics<parallel>], iteration_bounds = array<i64: 1>, scalar_prefetch = 0 : i64, scratch_operands = 0 : i64, tpu.core_type = #tpu.core_type<tc>, window_params = [{transform_indices = @transform_0, window_bounds = array<i64: 8, 512>}, {pipeline_mode = #tpu.pipeline_mode<synchronous>, transform_indices = @transform_1, window_bounds = array<i64: 8, 8>}, {pipeline_mode = #tpu.pipeline_mode<synchronous>, transform_indices = @transform_2, window_bounds = array<i64: 8, 1>}, {transform_indices = @transform_3, window_bounds = array<i64: 8, 512>}]} {
    %c0 = arith.constant 0 : index
    %c0_0 = arith.constant 0 : index
    %0 = vector.load %arg2[%c0, %c0_0] : memref<8x8xbf16, #tpu.memory_space<vmem>>, vector<8x8xbf16>
    %c0_1 = arith.constant 0 : index
    %c0_2 = arith.constant 0 : index
    %1 = vector.load %arg1[%c0_1, %c0_2] : memref<8x512xbf16, #tpu.memory_space<vmem>>, vector<8x512xbf16>
    %cst = arith.constant dense<0.000000e+00> : vector<8x512xf32>
    %2 = tpu.matmul %0, %1, %cst {dimension_numbers = #tpu.dot_dimension_numbers<[1], [0], [0], [1], [0, 0, 1, 1], [], []>} : vector<8x8xbf16>, vector<8x512xbf16>, vector<8x512xf32> -> vector<8x512xf32>
    %c0_3 = arith.constant 0 : index
    %c0_4 = arith.constant 0 : index
    %3 = vector.load %arg3[%c0_3, %c0_4] : memref<8x1xf32, #tpu.memory_space<vmem>>, vector<8x1xf32>
    %4 = vector.broadcast %3 : vector<8x1xf32> to vector<8x512xf32>
    %5 = arith.addf %2, %4 : vector<8x512xf32>
    %6 = arith.truncf %5 : vector<8x512xf32> to vector<8x512xbf16>
    %c0_5 = arith.constant 0 : index
    %c0_6 = arith.constant 0 : index
    %7 = vector.load %arg4[%c0_5, %c0_6] : memref<8x512xbf16, #tpu.memory_space<vmem>>, vector<8x512xbf16>
    tpu.vector_store %arg4[%c0_5, %c0_6], %6 {strides = array<i32>} : memref<8x512xbf16, #tpu.memory_space<vmem>>, vector<8x512xbf16>,
    return
  }
  func.func @transform_0(%arg0: i32) -> (i32, i32) {
    %c0_i32 = arith.constant 0 : i32
    %c0_i32_0 = arith.constant 0 : i32
    return %c0_i32, %arg0 : i32, i32
  }
  func.func @transform_1(%arg0: i32) -> (i32, i32) {
    %c0_i32 = arith.constant 0 : i32
    %c0_i32_0 = arith.constant 0 : i32
    %c0_i32_1 = arith.constant 0 : i32
    return %c0_i32, %c0_i32_0 : i32, i32
  }
  func.func @transform_2(%arg0: i32) -> (i32, i32) {
    %c0_i32 = arith.constant 0 : i32
    %c0_i32_0 = arith.constant 0 : i32
    %c0_i32_1 = arith.constant 0 : i32
    return %c0_i32, %c0_i32_0 : i32, i32
  }
  func.func @transform_3(%arg0: i32) -> (i32, i32) {
    %c0_i32 = arith.constant 0 : i32
    %c0_i32_0 = arith.constant 0 : i32
    return %c0_i32, %arg0 : i32, i32
  }
}

module attributes {stable_mosaic.version = 11 : i64} {
  func.func @_conv_kernel(%arg0: i32, %arg1: memref<16x512xbf16, #tpu.memory_space<vmem>>, %arg2: memref<16x16xbf16, #tpu.memory_space<vmem>>, %arg3: memref<16x1xf32, #tpu.memory_space<vmem>>, %arg4: memref<16x512xbf16, #tpu.memory_space<vmem>>) attributes {dimension_semantics = [#tpu.dimension_semantics<parallel>], iteration_bounds = array<i64: 1>, scalar_prefetch = 0 : i64, scratch_operands = 0 : i64, tpu.core_type = #tpu.core_type<tc>, window_params = [{transform_indices = @transform_0, window_bounds = array<i64: 16, 512>}, {pipeline_mode = #tpu.pipeline_mode<synchronous>, transform_indices = @transform_1, window_bounds = array<i64: 16, 16>}, {pipeline_mode = #tpu.pipeline_mode<synchronous>, transform_indices = @transform_2, window_bounds = array<i64: 16, 1>}, {transform_indices = @transform_3, window_bounds = array<i64: 16, 512>}]} {
    %c0 = arith.constant 0 : index
    %c0_0 = arith.constant 0 : index
    %0 = vector.load %arg2[%c0, %c0_0] : memref<16x16xbf16, #tpu.memory_space<vmem>>, vector<16x16xbf16>
    %c0_1 = arith.constant 0 : index
    %c0_2 = arith.constant 0 : index
    %1 = vector.load %arg1[%c0_1, %c0_2] : memref<16x512xbf16, #tpu.memory_space<vmem>>, vector<16x512xbf16>
    %cst = arith.constant dense<0.000000e+00> : vector<16x512xf32>
    %2 = tpu.matmul %0, %1, %cst {dimension_numbers = #tpu.dot_dimension_numbers<[1], [0], [0], [1], [0, 0, 1, 1], [], []>} : vector<16x16xbf16>, vector<16x512xbf16>, vector<16x512xf32> -> vector<16x512xf32>
    %c0_3 = arith.constant 0 : index
    %c0_4 = arith.constant 0 : index
    %3 = vector.load %arg3[%c0_3, %c0_4] : memref<16x1xf32, #tpu.memory_space<vmem>>, vector<16x1xf32>
    %4 = vector.broadcast %3 : vector<16x1xf32> to vector<16x512xf32>
    %5 = arith.addf %2, %4 : vector<16x512xf32>
    %6 = arith.truncf %5 : vector<16x512xf32> to vector<16x512xbf16>
    %c0_5 = arith.constant 0 : index
    %c0_6 = arith.constant 0 : index
    %7 = vector.load %arg4[%c0_5, %c0_6] : memref<16x512xbf16, #tpu.memory_space<vmem>>, vector<16x512xbf16>
    tpu.vector_store %arg4[%c0_5, %c0_6], %6 {strides = array<i32>} : memref<16x512xbf16, #tpu.memory_space<vmem>>, vector<16x512xbf16>,
    return
  }
  func.func @transform_0(%arg0: i32) -> (i32, i32) {
    %c0_i32 = arith.constant 0 : i32
    %c0_i32_0 = arith.constant 0 : i32
    return %c0_i32, %arg0 : i32, i32
  }
  func.func @transform_1(%arg0: i32) -> (i32, i32) {
    %c0_i32 = arith.constant 0 : i32
    %c0_i32_0 = arith.constant 0 : i32
    %c0_i32_1 = arith.constant 0 : i32
    return %c0_i32, %c0_i32_0 : i32, i32
  }
  func.func @transform_2(%arg0: i32) -> (i32, i32) {
    %c0_i32 = arith.constant 0 : i32
    %c0_i32_0 = arith.constant 0 : i32
    %c0_i32_1 = arith.constant 0 : i32
    return %c0_i32, %c0_i32_0 : i32, i32
  }
  func.func @transform_3(%arg0: i32) -> (i32, i32) {
    %c0_i32 = arith.constant 0 : i32
    %c0_i32_0 = arith.constant 0 : i32
    return %c0_i32, %arg0 : i32, i32
  }
}

module attributes {stable_mosaic.version = 11 : i64} {
  func.func @_pair_kernel(%arg0: i32, %arg1: memref<1x16x384xbf16, #tpu.memory_space<vmem>>, %arg2: memref<1x8x16xbf16, #tpu.memory_space<vmem>>, %arg3: memref<1x8x1xf32, #tpu.memory_space<vmem>>, %arg4: memref<1x8x8xbf16, #tpu.memory_space<vmem>>, %arg5: memref<1x8x1xf32, #tpu.memory_space<vmem>>, %arg6: memref<1x8x384xf32, #tpu.memory_space<vmem>>) attributes {dimension_semantics = [#tpu.dimension_semantics<parallel>], iteration_bounds = array<i64: 2>, scalar_prefetch = 0 : i64, scratch_operands = 0 : i64, tpu.core_type = #tpu.core_type<tc>, window_params = [{transform_indices = @transform_0, window_bounds = array<i64: 1, 16, 384>}, {transform_indices = @transform_1, window_bounds = array<i64: 1, 8, 16>}, {transform_indices = @transform_2, window_bounds = array<i64: 1, 8, 1>}, {transform_indices = @transform_3, window_bounds = array<i64: 1, 8, 8>}, {transform_indices = @transform_4, window_bounds = array<i64: 1, 8, 1>}, {transform_indices = @transform_5, window_bounds = array<i64: 1, 8, 384>}]} {
    %c0 = arith.constant 0 : index
    %c0_0 = arith.constant 0 : index
    %c0_1 = arith.constant 0 : index
    %0 = vector.load %arg2[%c0, %c0_0, %c0_1] : memref<1x8x16xbf16, #tpu.memory_space<vmem>>, vector<1x8x16xbf16>
    %1 = vector.shape_cast %0 : vector<1x8x16xbf16> to vector<8x16xbf16>
    %c0_2 = arith.constant 0 : index
    %c0_3 = arith.constant 0 : index
    %c0_4 = arith.constant 0 : index
    %2 = vector.load %arg1[%c0_2, %c0_3, %c0_4] : memref<1x16x384xbf16, #tpu.memory_space<vmem>>, vector<1x16x384xbf16>
    %3 = vector.shape_cast %2 : vector<1x16x384xbf16> to vector<16x384xbf16>
    %cst = arith.constant dense<0.000000e+00> : vector<8x384xf32>
    %4 = tpu.matmul %1, %3, %cst {dimension_numbers = #tpu.dot_dimension_numbers<[1], [0], [0], [1], [0, 0, 1, 1], [], []>} : vector<8x16xbf16>, vector<16x384xbf16>, vector<8x384xf32> -> vector<8x384xf32>
    %c0_5 = arith.constant 0 : index
    %c0_6 = arith.constant 0 : index
    %c0_7 = arith.constant 0 : index
    %5 = vector.load %arg3[%c0_5, %c0_6, %c0_7] : memref<1x8x1xf32, #tpu.memory_space<vmem>>, vector<1x8x1xf32>
    %6 = vector.shape_cast %5 : vector<1x8x1xf32> to vector<8x1xf32>
    %7 = vector.broadcast %6 : vector<8x1xf32> to vector<8x384xf32>
    %8 = arith.addf %4, %7 : vector<8x384xf32>
    %cst_8 = arith.constant 0.000000e+00 : f32
    %9 = vector.broadcast %cst_8 : f32 to vector<8x384xf32>
    %10 = arith.cmpf oge, %8, %9 : vector<8x384xf32>
    %cst_9 = arith.constant 1.000000e-01 : f32
    %11 = vector.broadcast %cst_9 : f32 to vector<8x384xf32>
    %12 = arith.mulf %11, %8 : vector<8x384xf32>
    %13 = arith.select %10, %8, %12 : vector<8x384xi1>, vector<8x384xf32>
    %c0_10 = arith.constant 0 : index
    %c0_11 = arith.constant 0 : index
    %c0_12 = arith.constant 0 : index
    %14 = vector.load %arg4[%c0_10, %c0_11, %c0_12] : memref<1x8x8xbf16, #tpu.memory_space<vmem>>, vector<1x8x8xbf16>
    %15 = vector.shape_cast %14 : vector<1x8x8xbf16> to vector<8x8xbf16>
    %16 = arith.truncf %13 : vector<8x384xf32> to vector<8x384xbf16>
    %cst_13 = arith.constant dense<0.000000e+00> : vector<8x384xf32>
    %17 = tpu.matmul %15, %16, %cst_13 {dimension_numbers = #tpu.dot_dimension_numbers<[1], [0], [0], [1], [0, 0, 1, 1], [], []>} : vector<8x8xbf16>, vector<8x384xbf16>, vector<8x384xf32> -> vector<8x384xf32>
    %c0_14 = arith.constant 0 : index
    %c0_15 = arith.constant 0 : index
    %c0_16 = arith.constant 0 : index
    %18 = vector.load %arg5[%c0_14, %c0_15, %c0_16] : memref<1x8x1xf32, #tpu.memory_space<vmem>>, vector<1x8x1xf32>
    %19 = vector.shape_cast %18 : vector<1x8x1xf32> to vector<8x1xf32>
    %20 = vector.broadcast %19 : vector<8x1xf32> to vector<8x384xf32>
    %21 = arith.addf %17, %20 : vector<8x384xf32>
    %c0_17 = arith.constant 0 : index
    %c0_18 = arith.constant 0 : index
    %c0_19 = arith.constant 0 : index
    %22 = vector.load %arg6[%c0_17, %c0_18, %c0_19] : memref<1x8x384xf32, #tpu.memory_space<vmem>>, vector<1x8x384xf32>
    %23 = vector.shape_cast %22 : vector<1x8x384xf32> to vector<8x384xf32>
    %24 = vector.shape_cast %21 : vector<8x384xf32> to vector<1x8x384xf32>
    tpu.vector_store %arg6[%c0_17, %c0_18, %c0_19], %24 {strides = array<i32>} : memref<1x8x384xf32, #tpu.memory_space<vmem>>, vector<1x8x384xf32>,
    return
  }
  func.func @transform_0(%arg0: i32) -> (i32, i32, i32) {
    %c0_i32 = arith.constant 0 : i32
    %c0_i32_0 = arith.constant 0 : i32
    %c0_i32_1 = arith.constant 0 : i32
    return %arg0, %c0_i32, %c0_i32_0 : i32, i32, i32
  }
  func.func @transform_1(%arg0: i32) -> (i32, i32, i32) {
    %c0_i32 = arith.constant 0 : i32
    %c0_i32_0 = arith.constant 0 : i32
    %c0_i32_1 = arith.constant 0 : i32
    return %arg0, %c0_i32, %c0_i32_0 : i32, i32, i32
  }
  func.func @transform_2(%arg0: i32) -> (i32, i32, i32) {
    %c0_i32 = arith.constant 0 : i32
    %c0_i32_0 = arith.constant 0 : i32
    %c0_i32_1 = arith.constant 0 : i32
    return %arg0, %c0_i32, %c0_i32_0 : i32, i32, i32
  }
  func.func @transform_3(%arg0: i32) -> (i32, i32, i32) {
    %c0_i32 = arith.constant 0 : i32
    %c0_i32_0 = arith.constant 0 : i32
    %c0_i32_1 = arith.constant 0 : i32
    return %arg0, %c0_i32, %c0_i32_0 : i32, i32, i32
  }
  func.func @transform_4(%arg0: i32) -> (i32, i32, i32) {
    %c0_i32 = arith.constant 0 : i32
    %c0_i32_0 = arith.constant 0 : i32
    %c0_i32_1 = arith.constant 0 : i32
    return %arg0, %c0_i32, %c0_i32_0 : i32, i32, i32
  }
  func.func @transform_5(%arg0: i32) -> (i32, i32, i32) {
    %c0_i32 = arith.constant 0 : i32
    %c0_i32_0 = arith.constant 0 : i32
    %c0_i32_1 = arith.constant 0 : i32
    return %arg0, %c0_i32, %c0_i32_0 : i32, i32, i32
  }
}

module attributes {stable_mosaic.version = 11 : i64} {
  func.func @_conv_kernel(%arg0: i32, %arg1: memref<72x512xbf16, #tpu.memory_space<vmem>>, %arg2: memref<16x72xbf16, #tpu.memory_space<vmem>>, %arg3: memref<16x1xf32, #tpu.memory_space<vmem>>, %arg4: memref<16x512xbf16, #tpu.memory_space<vmem>>) attributes {dimension_semantics = [#tpu.dimension_semantics<parallel>], iteration_bounds = array<i64: 1>, scalar_prefetch = 0 : i64, scratch_operands = 0 : i64, tpu.core_type = #tpu.core_type<tc>, window_params = [{transform_indices = @transform_0, window_bounds = array<i64: 72, 512>}, {pipeline_mode = #tpu.pipeline_mode<synchronous>, transform_indices = @transform_1, window_bounds = array<i64: 16, 72>}, {pipeline_mode = #tpu.pipeline_mode<synchronous>, transform_indices = @transform_2, window_bounds = array<i64: 16, 1>}, {transform_indices = @transform_3, window_bounds = array<i64: 16, 512>}]} {
    %c0 = arith.constant 0 : index
    %c0_0 = arith.constant 0 : index
    %0 = vector.load %arg2[%c0, %c0_0] : memref<16x72xbf16, #tpu.memory_space<vmem>>, vector<16x72xbf16>
    %c0_1 = arith.constant 0 : index
    %c0_2 = arith.constant 0 : index
    %1 = vector.load %arg1[%c0_1, %c0_2] : memref<72x512xbf16, #tpu.memory_space<vmem>>, vector<72x512xbf16>
    %cst = arith.constant dense<0.000000e+00> : vector<16x512xf32>
    %2 = tpu.matmul %0, %1, %cst {dimension_numbers = #tpu.dot_dimension_numbers<[1], [0], [0], [1], [0, 0, 1, 1], [], []>} : vector<16x72xbf16>, vector<72x512xbf16>, vector<16x512xf32> -> vector<16x512xf32>
    %c0_3 = arith.constant 0 : index
    %c0_4 = arith.constant 0 : index
    %3 = vector.load %arg3[%c0_3, %c0_4] : memref<16x1xf32, #tpu.memory_space<vmem>>, vector<16x1xf32>
    %4 = vector.broadcast %3 : vector<16x1xf32> to vector<16x512xf32>
    %5 = arith.addf %2, %4 : vector<16x512xf32>
    %6 = tpu.iota {dimensions = array<i32: 0>} : vector<16x512xi32>
    %c8_i32 = arith.constant 8 : i32
    %7 = vector.broadcast %c8_i32 : i32 to vector<16x512xi32>
    %8 = arith.cmpi slt, %6, %7 : vector<16x512xi32>
    %cst_5 = arith.constant 0.000000e+00 : f32
    %9 = vector.broadcast %cst_5 : f32 to vector<16x512xf32>
    %10 = arith.cmpf oge, %5, %9 : vector<16x512xf32>
    %cst_6 = arith.constant 1.000000e-01 : f32
    %11 = vector.broadcast %cst_6 : f32 to vector<16x512xf32>
    %12 = arith.mulf %11, %5 : vector<16x512xf32>
    %13 = arith.select %10, %5, %12 : vector<16x512xi1>, vector<16x512xf32>
    %14 = arith.select %8, %13, %5 : vector<16x512xi1>, vector<16x512xf32>
    %15 = arith.truncf %14 : vector<16x512xf32> to vector<16x512xbf16>
    %c0_7 = arith.constant 0 : index
    %c0_8 = arith.constant 0 : index
    %16 = vector.load %arg4[%c0_7, %c0_8] : memref<16x512xbf16, #tpu.memory_space<vmem>>, vector<16x512xbf16>
    tpu.vector_store %arg4[%c0_7, %c0_8], %15 {strides = array<i32>} : memref<16x512xbf16, #tpu.memory_space<vmem>>, vector<16x512xbf16>,
    return
  }
  func.func @transform_0(%arg0: i32) -> (i32, i32) {
    %c0_i32 = arith.constant 0 : i32
    %c0_i32_0 = arith.constant 0 : i32
    return %c0_i32, %arg0 : i32, i32
  }
  func.func @transform_1(%arg0: i32) -> (i32, i32) {
    %c0_i32 = arith.constant 0 : i32
    %c0_i32_0 = arith.constant 0 : i32
    %c0_i32_1 = arith.constant 0 : i32
    return %c0_i32, %c0_i32_0 : i32, i32
  }
  func.func @transform_2(%arg0: i32) -> (i32, i32) {
    %c0_i32 = arith.constant 0 : i32
    %c0_i32_0 = arith.constant 0 : i32
    %c0_i32_1 = arith.constant 0 : i32
    return %c0_i32, %c0_i32_0 : i32, i32
  }
  func.func @transform_3(%arg0: i32) -> (i32, i32) {
    %c0_i32 = arith.constant 0 : i32
    %c0_i32_0 = arith.constant 0 : i32
    return %c0_i32, %arg0 : i32, i32
  }
}

module attributes {stable_mosaic.version = 11 : i64} {
  func.func @_conv_kernel(%arg0: i32, %arg1: memref<72x512xbf16, #tpu.memory_space<vmem>>, %arg2: memref<8x72xbf16, #tpu.memory_space<vmem>>, %arg3: memref<8x1xf32, #tpu.memory_space<vmem>>, %arg4: memref<8x512xbf16, #tpu.memory_space<vmem>>, %arg5: memref<8x512xbf16, #tpu.memory_space<vmem>>) attributes {dimension_semantics = [#tpu.dimension_semantics<parallel>], iteration_bounds = array<i64: 1>, scalar_prefetch = 0 : i64, scratch_operands = 0 : i64, tpu.core_type = #tpu.core_type<tc>, window_params = [{transform_indices = @transform_0, window_bounds = array<i64: 72, 512>}, {pipeline_mode = #tpu.pipeline_mode<synchronous>, transform_indices = @transform_1, window_bounds = array<i64: 8, 72>}, {pipeline_mode = #tpu.pipeline_mode<synchronous>, transform_indices = @transform_2, window_bounds = array<i64: 8, 1>}, {transform_indices = @transform_3, window_bounds = array<i64: 8, 512>}, {transform_indices = @transform_4, window_bounds = array<i64: 8, 512>}]} {
    %c0 = arith.constant 0 : index
    %c0_0 = arith.constant 0 : index
    %0 = vector.load %arg2[%c0, %c0_0] : memref<8x72xbf16, #tpu.memory_space<vmem>>, vector<8x72xbf16>
    %c0_1 = arith.constant 0 : index
    %c0_2 = arith.constant 0 : index
    %1 = vector.load %arg1[%c0_1, %c0_2] : memref<72x512xbf16, #tpu.memory_space<vmem>>, vector<72x512xbf16>
    %cst = arith.constant dense<0.000000e+00> : vector<8x512xf32>
    %2 = tpu.matmul %0, %1, %cst {dimension_numbers = #tpu.dot_dimension_numbers<[1], [0], [0], [1], [0, 0, 1, 1], [], []>} : vector<8x72xbf16>, vector<72x512xbf16>, vector<8x512xf32> -> vector<8x512xf32>
    %c0_3 = arith.constant 0 : index
    %c0_4 = arith.constant 0 : index
    %3 = vector.load %arg3[%c0_3, %c0_4] : memref<8x1xf32, #tpu.memory_space<vmem>>, vector<8x1xf32>
    %4 = vector.broadcast %3 : vector<8x1xf32> to vector<8x512xf32>
    %5 = arith.addf %2, %4 : vector<8x512xf32>
    %cst_5 = arith.constant 0.000000e+00 : f32
    %6 = vector.broadcast %cst_5 : f32 to vector<8x512xf32>
    %7 = arith.cmpf oge, %5, %6 : vector<8x512xf32>
    %cst_6 = arith.constant 1.000000e-01 : f32
    %8 = vector.broadcast %cst_6 : f32 to vector<8x512xf32>
    %9 = arith.mulf %8, %5 : vector<8x512xf32>
    %10 = arith.select %7, %5, %9 : vector<8x512xi1>, vector<8x512xf32>
    %c0_7 = arith.constant 0 : index
    %c0_8 = arith.constant 0 : index
    %11 = vector.load %arg4[%c0_7, %c0_8] : memref<8x512xbf16, #tpu.memory_space<vmem>>, vector<8x512xbf16>
    %12 = arith.extf %11 : vector<8x512xbf16> to vector<8x512xf32>
    %13 = arith.addf %10, %12 : vector<8x512xf32>
    %cst_9 = arith.constant 0.000000e+00 : f32
    %14 = vector.broadcast %cst_9 : f32 to vector<8x512xf32>
    %15 = arith.cmpf oge, %13, %14 : vector<8x512xf32>
    %cst_10 = arith.constant 2.000000e-01 : f32
    %16 = vector.broadcast %cst_10 : f32 to vector<8x512xf32>
    %17 = arith.mulf %16, %13 : vector<8x512xf32>
    %18 = arith.select %15, %13, %17 : vector<8x512xi1>, vector<8x512xf32>
    %19 = arith.truncf %18 : vector<8x512xf32> to vector<8x512xbf16>
    %c0_11 = arith.constant 0 : index
    %c0_12 = arith.constant 0 : index
    %20 = vector.load %arg5[%c0_11, %c0_12] : memref<8x512xbf16, #tpu.memory_space<vmem>>, vector<8x512xbf16>
    tpu.vector_store %arg5[%c0_11, %c0_12], %19 {strides = array<i32>} : memref<8x512xbf16, #tpu.memory_space<vmem>>, vector<8x512xbf16>,
    return
  }
  func.func @transform_0(%arg0: i32) -> (i32, i32) {
    %c0_i32 = arith.constant 0 : i32
    %c0_i32_0 = arith.constant 0 : i32
    return %c0_i32, %arg0 : i32, i32
  }
  func.func @transform_1(%arg0: i32) -> (i32, i32) {
    %c0_i32 = arith.constant 0 : i32
    %c0_i32_0 = arith.constant 0 : i32
    %c0_i32_1 = arith.constant 0 : i32
    return %c0_i32, %c0_i32_0 : i32, i32
  }
  func.func @transform_2(%arg0: i32) -> (i32, i32) {
    %c0_i32 = arith.constant 0 : i32
    %c0_i32_0 = arith.constant 0 : i32
    %c0_i32_1 = arith.constant 0 : i32
    return %c0_i32, %c0_i32_0 : i32, i32
  }
  func.func @transform_3(%arg0: i32) -> (i32, i32) {
    %c0_i32 = arith.constant 0 : i32
    %c0_i32_0 = arith.constant 0 : i32
    return %c0_i32, %arg0 : i32, i32
  }
  func.func @transform_4(%arg0: i32) -> (i32, i32) {
    %c0_i32 = arith.constant 0 : i32
    %c0_i32_0 = arith.constant 0 : i32
    return %c0_i32, %arg0 : i32, i32
  }
}

module attributes {stable_mosaic.version = 11 : i64} {
  func.func @_conv_kernel(%arg0: i32, %arg1: memref<216x512xbf16, #tpu.memory_space<vmem>>, %arg2: memref<8x216xbf16, #tpu.memory_space<vmem>>, %arg3: memref<8x1xf32, #tpu.memory_space<vmem>>, %arg4: memref<8x512xbf16, #tpu.memory_space<vmem>>, %arg5: memref<8x512xbf16, #tpu.memory_space<vmem>>) attributes {dimension_semantics = [#tpu.dimension_semantics<parallel>], iteration_bounds = array<i64: 1>, scalar_prefetch = 0 : i64, scratch_operands = 0 : i64, tpu.core_type = #tpu.core_type<tc>, window_params = [{transform_indices = @transform_0, window_bounds = array<i64: 216, 512>}, {pipeline_mode = #tpu.pipeline_mode<synchronous>, transform_indices = @transform_1, window_bounds = array<i64: 8, 216>}, {pipeline_mode = #tpu.pipeline_mode<synchronous>, transform_indices = @transform_2, window_bounds = array<i64: 8, 1>}, {transform_indices = @transform_3, window_bounds = array<i64: 8, 512>}, {transform_indices = @transform_4, window_bounds = array<i64: 8, 512>}]} {
    %c0 = arith.constant 0 : index
    %c0_0 = arith.constant 0 : index
    %0 = vector.load %arg2[%c0, %c0_0] : memref<8x216xbf16, #tpu.memory_space<vmem>>, vector<8x216xbf16>
    %c0_1 = arith.constant 0 : index
    %c0_2 = arith.constant 0 : index
    %1 = vector.load %arg1[%c0_1, %c0_2] : memref<216x512xbf16, #tpu.memory_space<vmem>>, vector<216x512xbf16>
    %cst = arith.constant dense<0.000000e+00> : vector<8x512xf32>
    %2 = tpu.matmul %0, %1, %cst {dimension_numbers = #tpu.dot_dimension_numbers<[1], [0], [0], [1], [0, 0, 1, 1], [], []>} : vector<8x216xbf16>, vector<216x512xbf16>, vector<8x512xf32> -> vector<8x512xf32>
    %c0_3 = arith.constant 0 : index
    %c0_4 = arith.constant 0 : index
    %3 = vector.load %arg3[%c0_3, %c0_4] : memref<8x1xf32, #tpu.memory_space<vmem>>, vector<8x1xf32>
    %4 = vector.broadcast %3 : vector<8x1xf32> to vector<8x512xf32>
    %5 = arith.addf %2, %4 : vector<8x512xf32>
    %cst_5 = arith.constant 0.000000e+00 : f32
    %6 = vector.broadcast %cst_5 : f32 to vector<8x512xf32>
    %7 = arith.cmpf oge, %5, %6 : vector<8x512xf32>
    %cst_6 = arith.constant 2.000000e-01 : f32
    %8 = vector.broadcast %cst_6 : f32 to vector<8x512xf32>
    %9 = arith.mulf %8, %5 : vector<8x512xf32>
    %10 = arith.select %7, %5, %9 : vector<8x512xi1>, vector<8x512xf32>
    %c0_7 = arith.constant 0 : index
    %c0_8 = arith.constant 0 : index
    %11 = vector.load %arg4[%c0_7, %c0_8] : memref<8x512xbf16, #tpu.memory_space<vmem>>, vector<8x512xbf16>
    %12 = arith.extf %11 : vector<8x512xbf16> to vector<8x512xf32>
    %13 = arith.addf %10, %12 : vector<8x512xf32>
    %14 = arith.truncf %13 : vector<8x512xf32> to vector<8x512xbf16>
    %c0_9 = arith.constant 0 : index
    %c0_10 = arith.constant 0 : index
    %15 = vector.load %arg5[%c0_9, %c0_10] : memref<8x512xbf16, #tpu.memory_space<vmem>>, vector<8x512xbf16>
    tpu.vector_store %arg5[%c0_9, %c0_10], %14 {strides = array<i32>} : memref<8x512xbf16, #tpu.memory_space<vmem>>, vector<8x512xbf16>,
    return
  }
  func.func @transform_0(%arg0: i32) -> (i32, i32) {
    %c0_i32 = arith.constant 0 : i32
    %c0_i32_0 = arith.constant 0 : i32
    return %c0_i32, %arg0 : i32, i32
  }
  func.func @transform_1(%arg0: i32) -> (i32, i32) {
    %c0_i32 = arith.constant 0 : i32
    %c0_i32_0 = arith.constant 0 : i32
    %c0_i32_1 = arith.constant 0 : i32
    return %c0_i32, %c0_i32_0 : i32, i32
  }
  func.func @transform_2(%arg0: i32) -> (i32, i32) {
    %c0_i32 = arith.constant 0 : i32
    %c0_i32_0 = arith.constant 0 : i32
    %c0_i32_1 = arith.constant 0 : i32
    return %c0_i32, %c0_i32_0 : i32, i32
  }
  func.func @transform_3(%arg0: i32) -> (i32, i32) {
    %c0_i32 = arith.constant 0 : i32
    %c0_i32_0 = arith.constant 0 : i32
    return %c0_i32, %arg0 : i32, i32
  }
  func.func @transform_4(%arg0: i32) -> (i32, i32) {
    %c0_i32 = arith.constant 0 : i32
    %c0_i32_0 = arith.constant 0 : i32
    return %c0_i32, %arg0 : i32, i32
  }
}

module attributes {stable_mosaic.version = 11 : i64} {
  func.func @_conv_kernel(%arg0: i32, %arg1: memref<216x512xbf16, #tpu.memory_space<vmem>>, %arg2: memref<8x216xbf16, #tpu.memory_space<vmem>>, %arg3: memref<8x1xf32, #tpu.memory_space<vmem>>, %arg4: memref<8x512xbf16, #tpu.memory_space<vmem>>) attributes {dimension_semantics = [#tpu.dimension_semantics<parallel>], iteration_bounds = array<i64: 1>, scalar_prefetch = 0 : i64, scratch_operands = 0 : i64, tpu.core_type = #tpu.core_type<tc>, window_params = [{transform_indices = @transform_0, window_bounds = array<i64: 216, 512>}, {pipeline_mode = #tpu.pipeline_mode<synchronous>, transform_indices = @transform_1, window_bounds = array<i64: 8, 216>}, {pipeline_mode = #tpu.pipeline_mode<synchronous>, transform_indices = @transform_2, window_bounds = array<i64: 8, 1>}, {transform_indices = @transform_3, window_bounds = array<i64: 8, 512>}]} {
    %c0 = arith.constant 0 : index
    %c0_0 = arith.constant 0 : index
    %0 = vector.load %arg2[%c0, %c0_0] : memref<8x216xbf16, #tpu.memory_space<vmem>>, vector<8x216xbf16>
    %c0_1 = arith.constant 0 : index
    %c0_2 = arith.constant 0 : index
    %1 = vector.load %arg1[%c0_1, %c0_2] : memref<216x512xbf16, #tpu.memory_space<vmem>>, vector<216x512xbf16>
    %cst = arith.constant dense<0.000000e+00> : vector<8x512xf32>
    %2 = tpu.matmul %0, %1, %cst {dimension_numbers = #tpu.dot_dimension_numbers<[1], [0], [0], [1], [0, 0, 1, 1], [], []>} : vector<8x216xbf16>, vector<216x512xbf16>, vector<8x512xf32> -> vector<8x512xf32>
    %c0_3 = arith.constant 0 : index
    %c0_4 = arith.constant 0 : index
    %3 = vector.load %arg3[%c0_3, %c0_4] : memref<8x1xf32, #tpu.memory_space<vmem>>, vector<8x1xf32>
    %4 = vector.broadcast %3 : vector<8x1xf32> to vector<8x512xf32>
    %5 = arith.addf %2, %4 : vector<8x512xf32>
    %cst_5 = arith.constant 0.000000e+00 : f32
    %6 = vector.broadcast %cst_5 : f32 to vector<8x512xf32>
    %7 = arith.cmpf oge, %5, %6 : vector<8x512xf32>
    %cst_6 = arith.constant 2.000000e-01 : f32
    %8 = vector.broadcast %cst_6 : f32 to vector<8x512xf32>
    %9 = arith.mulf %8, %5 : vector<8x512xf32>
    %10 = arith.select %7, %5, %9 : vector<8x512xi1>, vector<8x512xf32>
    %11 = arith.truncf %10 : vector<8x512xf32> to vector<8x512xbf16>
    %c0_7 = arith.constant 0 : index
    %c0_8 = arith.constant 0 : index
    %12 = vector.load %arg4[%c0_7, %c0_8] : memref<8x512xbf16, #tpu.memory_space<vmem>>, vector<8x512xbf16>
    tpu.vector_store %arg4[%c0_7, %c0_8], %11 {strides = array<i32>} : memref<8x512xbf16, #tpu.memory_space<vmem>>, vector<8x512xbf16>,
    return
  }
  func.func @transform_0(%arg0: i32) -> (i32, i32) {
    %c0_i32 = arith.constant 0 : i32
    %c0_i32_0 = arith.constant 0 : i32
    return %c0_i32, %arg0 : i32, i32
  }
  func.func @transform_1(%arg0: i32) -> (i32, i32) {
    %c0_i32 = arith.constant 0 : i32
    %c0_i32_0 = arith.constant 0 : i32
    %c0_i32_1 = arith.constant 0 : i32
    return %c0_i32, %c0_i32_0 : i32, i32
  }
  func.func @transform_2(%arg0: i32) -> (i32, i32) {
    %c0_i32 = arith.constant 0 : i32
    %c0_i32_0 = arith.constant 0 : i32
    %c0_i32_1 = arith.constant 0 : i32
    return %c0_i32, %c0_i32_0 : i32, i32
  }
  func.func @transform_3(%arg0: i32) -> (i32, i32) {
    %c0_i32 = arith.constant 0 : i32
    %c0_i32_0 = arith.constant 0 : i32
    return %c0_i32, %arg0 : i32, i32
  }
}

module attributes {stable_mosaic.version = 11 : i64} {
  func.func @_conv_kernel(%arg0: i32, %arg1: memref<216x512xbf16, #tpu.memory_space<vmem>>, %arg2: memref<8x216xbf16, #tpu.memory_space<vmem>>, %arg3: memref<8x1xf32, #tpu.memory_space<vmem>>, %arg4: memref<8x512xbf16, #tpu.memory_space<vmem>>, %arg5: memref<8x512xbf16, #tpu.memory_space<vmem>>, %arg6: memref<8x512xbf16, #tpu.memory_space<vmem>>) attributes {dimension_semantics = [#tpu.dimension_semantics<parallel>], iteration_bounds = array<i64: 1>, scalar_prefetch = 0 : i64, scratch_operands = 0 : i64, tpu.core_type = #tpu.core_type<tc>, window_params = [{transform_indices = @transform_0, window_bounds = array<i64: 216, 512>}, {pipeline_mode = #tpu.pipeline_mode<synchronous>, transform_indices = @transform_1, window_bounds = array<i64: 8, 216>}, {pipeline_mode = #tpu.pipeline_mode<synchronous>, transform_indices = @transform_2, window_bounds = array<i64: 8, 1>}, {transform_indices = @transform_3, window_bounds = array<i64: 8, 512>}, {transform_indices = @transform_4, window_bounds = array<i64: 8, 512>}, {transform_indices = @transform_5, window_bounds = array<i64: 8, 512>}]} {
    %c0 = arith.constant 0 : index
    %c0_0 = arith.constant 0 : index
    %0 = vector.load %arg2[%c0, %c0_0] : memref<8x216xbf16, #tpu.memory_space<vmem>>, vector<8x216xbf16>
    %c0_1 = arith.constant 0 : index
    %c0_2 = arith.constant 0 : index
    %1 = vector.load %arg1[%c0_1, %c0_2] : memref<216x512xbf16, #tpu.memory_space<vmem>>, vector<216x512xbf16>
    %cst = arith.constant dense<0.000000e+00> : vector<8x512xf32>
    %2 = tpu.matmul %0, %1, %cst {dimension_numbers = #tpu.dot_dimension_numbers<[1], [0], [0], [1], [0, 0, 1, 1], [], []>} : vector<8x216xbf16>, vector<216x512xbf16>, vector<8x512xf32> -> vector<8x512xf32>
    %c0_3 = arith.constant 0 : index
    %c0_4 = arith.constant 0 : index
    %3 = vector.load %arg3[%c0_3, %c0_4] : memref<8x1xf32, #tpu.memory_space<vmem>>, vector<8x1xf32>
    %4 = vector.broadcast %3 : vector<8x1xf32> to vector<8x512xf32>
    %5 = arith.addf %2, %4 : vector<8x512xf32>
    %cst_5 = arith.constant 0.000000e+00 : f32
    %6 = vector.broadcast %cst_5 : f32 to vector<8x512xf32>
    %7 = arith.cmpf oge, %5, %6 : vector<8x512xf32>
    %cst_6 = arith.constant 2.000000e-01 : f32
    %8 = vector.broadcast %cst_6 : f32 to vector<8x512xf32>
    %9 = arith.mulf %8, %5 : vector<8x512xf32>
    %10 = arith.select %7, %5, %9 : vector<8x512xi1>, vector<8x512xf32>
    %c0_7 = arith.constant 0 : index
    %c0_8 = arith.constant 0 : index
    %11 = vector.load %arg4[%c0_7, %c0_8] : memref<8x512xbf16, #tpu.memory_space<vmem>>, vector<8x512xbf16>
    %12 = arith.extf %11 : vector<8x512xbf16> to vector<8x512xf32>
    %c0_9 = arith.constant 0 : index
    %c0_10 = arith.constant 0 : index
    %13 = vector.load %arg5[%c0_9, %c0_10] : memref<8x512xbf16, #tpu.memory_space<vmem>>, vector<8x512xbf16>
    %14 = arith.extf %13 : vector<8x512xbf16> to vector<8x512xf32>
    %cst_11 = arith.constant 0.000000e+00 : f32
    %15 = vector.broadcast %cst_11 : f32 to vector<8x512xf32>
    %16 = arith.subf %15, %14 : vector<8x512xf32>
    %17 = math.exp %16 : vector<8x512xf32>
    %cst_12 = arith.constant 1.000000e+00 : f32
    %18 = vector.broadcast %cst_12 : f32 to vector<8x512xf32>
    %19 = arith.addf %18, %17 : vector<8x512xf32>
    %cst_13 = arith.constant 1.000000e+00 : f32
    %20 = vector.broadcast %cst_13 : f32 to vector<8x512xf32>
    %21 = arith.divf %20, %19 : vector<8x512xf32>
    %cst_14 = arith.constant 2.000000e+00 : f32
    %22 = vector.broadcast %cst_14 : f32 to vector<8x512xf32>
    %23 = arith.mulf %22, %21 : vector<8x512xf32>
    %cst_15 = arith.constant 1.000000e+00 : f32
    %24 = vector.broadcast %cst_15 : f32 to vector<8x512xf32>
    %25 = arith.subf %23, %24 : vector<8x512xf32>
    %cst_16 = arith.constant 8.000000e-01 : f32
    %26 = vector.broadcast %cst_16 : f32 to vector<8x512xf32>
    %27 = arith.mulf %26, %25 : vector<8x512xf32>
    %28 = math.exp %27 : vector<8x512xf32>
    %29 = arith.mulf %12, %28 : vector<8x512xf32>
    %30 = arith.addf %29, %10 : vector<8x512xf32>
    %31 = arith.truncf %30 : vector<8x512xf32> to vector<8x512xbf16>
    %c0_17 = arith.constant 0 : index
    %c0_18 = arith.constant 0 : index
    %32 = vector.load %arg6[%c0_17, %c0_18] : memref<8x512xbf16, #tpu.memory_space<vmem>>, vector<8x512xbf16>
    tpu.vector_store %arg6[%c0_17, %c0_18], %31 {strides = array<i32>} : memref<8x512xbf16, #tpu.memory_space<vmem>>, vector<8x512xbf16>,
    return
  }
  func.func @transform_0(%arg0: i32) -> (i32, i32) {
    %c0_i32 = arith.constant 0 : i32
    %c0_i32_0 = arith.constant 0 : i32
    return %c0_i32, %arg0 : i32, i32
  }
  func.func @transform_1(%arg0: i32) -> (i32, i32) {
    %c0_i32 = arith.constant 0 : i32
    %c0_i32_0 = arith.constant 0 : i32
    %c0_i32_1 = arith.constant 0 : i32
    return %c0_i32, %c0_i32_0 : i32, i32
  }
  func.func @transform_2(%arg0: i32) -> (i32, i32) {
    %c0_i32 = arith.constant 0 : i32
    %c0_i32_0 = arith.constant 0 : i32
    %c0_i32_1 = arith.constant 0 : i32
    return %c0_i32, %c0_i32_0 : i32, i32
  }
  func.func @transform_3(%arg0: i32) -> (i32, i32) {
    %c0_i32 = arith.constant 0 : i32
    %c0_i32_0 = arith.constant 0 : i32
    return %c0_i32, %arg0 : i32, i32
  }
  func.func @transform_4(%arg0: i32) -> (i32, i32) {
    %c0_i32 = arith.constant 0 : i32
    %c0_i32_0 = arith.constant 0 : i32
    return %c0_i32, %arg0 : i32, i32
  }
  func.func @transform_5(%arg0: i32) -> (i32, i32) {
    %c0_i32 = arith.constant 0 : i32
    %c0_i32_0 = arith.constant 0 : i32
    return %c0_i32, %arg0 : i32, i32
  }
}

module attributes {stable_mosaic.version = 11 : i64} {
  func.func @_conv_kernel(%arg0: i32, %arg1: memref<16x512xbf16, #tpu.memory_space<vmem>>, %arg2: memref<8x16xbf16, #tpu.memory_space<vmem>>, %arg3: memref<8x1xf32, #tpu.memory_space<vmem>>, %arg4: memref<8x512xbf16, #tpu.memory_space<vmem>>) attributes {dimension_semantics = [#tpu.dimension_semantics<parallel>], iteration_bounds = array<i64: 1>, scalar_prefetch = 0 : i64, scratch_operands = 0 : i64, tpu.core_type = #tpu.core_type<tc>, window_params = [{transform_indices = @transform_0, window_bounds = array<i64: 16, 512>}, {pipeline_mode = #tpu.pipeline_mode<synchronous>, transform_indices = @transform_1, window_bounds = array<i64: 8, 16>}, {pipeline_mode = #tpu.pipeline_mode<synchronous>, transform_indices = @transform_2, window_bounds = array<i64: 8, 1>}, {transform_indices = @transform_3, window_bounds = array<i64: 8, 512>}]} {
    %c0 = arith.constant 0 : index
    %c0_0 = arith.constant 0 : index
    %0 = vector.load %arg2[%c0, %c0_0] : memref<8x16xbf16, #tpu.memory_space<vmem>>, vector<8x16xbf16>
    %c0_1 = arith.constant 0 : index
    %c0_2 = arith.constant 0 : index
    %1 = vector.load %arg1[%c0_1, %c0_2] : memref<16x512xbf16, #tpu.memory_space<vmem>>, vector<16x512xbf16>
    %cst = arith.constant dense<0.000000e+00> : vector<8x512xf32>
    %2 = tpu.matmul %0, %1, %cst {dimension_numbers = #tpu.dot_dimension_numbers<[1], [0], [0], [1], [0, 0, 1, 1], [], []>} : vector<8x16xbf16>, vector<16x512xbf16>, vector<8x512xf32> -> vector<8x512xf32>
    %c0_3 = arith.constant 0 : index
    %c0_4 = arith.constant 0 : index
    %3 = vector.load %arg3[%c0_3, %c0_4] : memref<8x1xf32, #tpu.memory_space<vmem>>, vector<8x1xf32>
    %4 = vector.broadcast %3 : vector<8x1xf32> to vector<8x512xf32>
    %5 = arith.addf %2, %4 : vector<8x512xf32>
    %6 = arith.truncf %5 : vector<8x512xf32> to vector<8x512xbf16>
    %c0_5 = arith.constant 0 : index
    %c0_6 = arith.constant 0 : index
    %7 = vector.load %arg4[%c0_5, %c0_6] : memref<8x512xbf16, #tpu.memory_space<vmem>>, vector<8x512xbf16>
    tpu.vector_store %arg4[%c0_5, %c0_6], %6 {strides = array<i32>} : memref<8x512xbf16, #tpu.memory_space<vmem>>, vector<8x512xbf16>,
    return
  }
  func.func @transform_0(%arg0: i32) -> (i32, i32) {
    %c0_i32 = arith.constant 0 : i32
    %c0_i32_0 = arith.constant 0 : i32
    return %c0_i32, %arg0 : i32, i32
  }
  func.func @transform_1(%arg0: i32) -> (i32, i32) {
    %c0_i32 = arith.constant 0 : i32
    %c0_i32_0 = arith.constant 0 : i32
    %c0_i32_1 = arith.constant 0 : i32
    return %c0_i32, %c0_i32_0 : i32, i32
  }
  func.func @transform_2(%arg0: i32) -> (i32, i32) {
    %c0_i32 = arith.constant 0 : i32
    %c0_i32_0 = arith.constant 0 : i32
    %c0_i32_1 = arith.constant 0 : i32
    return %c0_i32, %c0_i32_0 : i32, i32
  }
  func.func @transform_3(%arg0: i32) -> (i32, i32) {
    %c0_i32 = arith.constant 0 : i32
    %c0_i32_0 = arith.constant 0 : i32
    return %c0_i32, %arg0 : i32, i32
  }
}

module attributes {stable_mosaic.version = 11 : i64} {
  func.func @_conv_kernel(%arg0: i32, %arg1: memref<72x512xbf16, #tpu.memory_space<vmem>>, %arg2: memref<4x72xbf16, #tpu.memory_space<vmem>>, %arg3: memref<4x1xf32, #tpu.memory_space<vmem>>, %arg4: memref<4x512xbf16, #tpu.memory_space<vmem>>) attributes {dimension_semantics = [#tpu.dimension_semantics<parallel>], iteration_bounds = array<i64: 1>, scalar_prefetch = 0 : i64, scratch_operands = 0 : i64, tpu.core_type = #tpu.core_type<tc>, window_params = [{transform_indices = @transform_0, window_bounds = array<i64: 72, 512>}, {pipeline_mode = #tpu.pipeline_mode<synchronous>, transform_indices = @transform_1, window_bounds = array<i64: 4, 72>}, {pipeline_mode = #tpu.pipeline_mode<synchronous>, transform_indices = @transform_2, window_bounds = array<i64: 4, 1>}, {transform_indices = @transform_3, window_bounds = array<i64: 4, 512>}]} {
    %c0 = arith.constant 0 : index
    %c0_0 = arith.constant 0 : index
    %0 = vector.load %arg2[%c0, %c0_0] : memref<4x72xbf16, #tpu.memory_space<vmem>>, vector<4x72xbf16>
    %c0_1 = arith.constant 0 : index
    %c0_2 = arith.constant 0 : index
    %1 = vector.load %arg1[%c0_1, %c0_2] : memref<72x512xbf16, #tpu.memory_space<vmem>>, vector<72x512xbf16>
    %cst = arith.constant dense<0.000000e+00> : vector<4x512xf32>
    %2 = tpu.matmul %0, %1, %cst {dimension_numbers = #tpu.dot_dimension_numbers<[1], [0], [0], [1], [0, 0, 1, 1], [], []>} : vector<4x72xbf16>, vector<72x512xbf16>, vector<4x512xf32> -> vector<4x512xf32>
    %c0_3 = arith.constant 0 : index
    %c0_4 = arith.constant 0 : index
    %3 = vector.load %arg3[%c0_3, %c0_4] : memref<4x1xf32, #tpu.memory_space<vmem>>, vector<4x1xf32>
    %4 = vector.broadcast %3 : vector<4x1xf32> to vector<4x512xf32>
    %5 = arith.addf %2, %4 : vector<4x512xf32>
    %cst_5 = arith.constant 0.000000e+00 : f32
    %6 = vector.broadcast %cst_5 : f32 to vector<4x512xf32>
    %7 = arith.cmpf oge, %5, %6 : vector<4x512xf32>
    %cst_6 = arith.constant 1.000000e-01 : f32
    %8 = vector.broadcast %cst_6 : f32 to vector<4x512xf32>
    %9 = arith.mulf %8, %5 : vector<4x512xf32>
    %10 = arith.select %7, %5, %9 : vector<4x512xi1>, vector<4x512xf32>
    %11 = arith.truncf %10 : vector<4x512xf32> to vector<4x512xbf16>
    %c0_7 = arith.constant 0 : index
    %c0_8 = arith.constant 0 : index
    %12 = vector.load %arg4[%c0_7, %c0_8] : memref<4x512xbf16, #tpu.memory_space<vmem>>, vector<4x512xbf16>
    tpu.vector_store %arg4[%c0_7, %c0_8], %11 {strides = array<i32>} : memref<4x512xbf16, #tpu.memory_space<vmem>>, vector<4x512xbf16>,
    return
  }
  func.func @transform_0(%arg0: i32) -> (i32, i32) {
    %c0_i32 = arith.constant 0 : i32
    %c0_i32_0 = arith.constant 0 : i32
    return %c0_i32, %arg0 : i32, i32
  }
  func.func @transform_1(%arg0: i32) -> (i32, i32) {
    %c0_i32 = arith.constant 0 : i32
    %c0_i32_0 = arith.constant 0 : i32
    %c0_i32_1 = arith.constant 0 : i32
    return %c0_i32, %c0_i32_0 : i32, i32
  }
  func.func @transform_2(%arg0: i32) -> (i32, i32) {
    %c0_i32 = arith.constant 0 : i32
    %c0_i32_0 = arith.constant 0 : i32
    %c0_i32_1 = arith.constant 0 : i32
    return %c0_i32, %c0_i32_0 : i32, i32
  }
  func.func @transform_3(%arg0: i32) -> (i32, i32) {
    %c0_i32 = arith.constant 0 : i32
    %c0_i32_0 = arith.constant 0 : i32
    return %c0_i32, %arg0 : i32, i32
  }
}

module attributes {stable_mosaic.version = 11 : i64} {
  func.func @_conv_kernel(%arg0: i32, %arg1: memref<36x512xbf16, #tpu.memory_space<vmem>>, %arg2: memref<8x36xbf16, #tpu.memory_space<vmem>>, %arg3: memref<8x1xf32, #tpu.memory_space<vmem>>, %arg4: memref<8x512xbf16, #tpu.memory_space<vmem>>, %arg5: memref<8x512xbf16, #tpu.memory_space<vmem>>, %arg6: memref<8x512xbf16, #tpu.memory_space<vmem>>) attributes {dimension_semantics = [#tpu.dimension_semantics<parallel>], iteration_bounds = array<i64: 1>, scalar_prefetch = 0 : i64, scratch_operands = 0 : i64, tpu.core_type = #tpu.core_type<tc>, window_params = [{transform_indices = @transform_0, window_bounds = array<i64: 36, 512>}, {pipeline_mode = #tpu.pipeline_mode<synchronous>, transform_indices = @transform_1, window_bounds = array<i64: 8, 36>}, {pipeline_mode = #tpu.pipeline_mode<synchronous>, transform_indices = @transform_2, window_bounds = array<i64: 8, 1>}, {transform_indices = @transform_3, window_bounds = array<i64: 8, 512>}, {transform_indices = @transform_4, window_bounds = array<i64: 8, 512>}, {transform_indices = @transform_5, window_bounds = array<i64: 8, 512>}]} {
    %c0 = arith.constant 0 : index
    %c0_0 = arith.constant 0 : index
    %0 = vector.load %arg2[%c0, %c0_0] : memref<8x36xbf16, #tpu.memory_space<vmem>>, vector<8x36xbf16>
    %c0_1 = arith.constant 0 : index
    %c0_2 = arith.constant 0 : index
    %1 = vector.load %arg1[%c0_1, %c0_2] : memref<36x512xbf16, #tpu.memory_space<vmem>>, vector<36x512xbf16>
    %cst = arith.constant dense<0.000000e+00> : vector<8x512xf32>
    %2 = tpu.matmul %0, %1, %cst {dimension_numbers = #tpu.dot_dimension_numbers<[1], [0], [0], [1], [0, 0, 1, 1], [], []>} : vector<8x36xbf16>, vector<36x512xbf16>, vector<8x512xf32> -> vector<8x512xf32>
    %c0_3 = arith.constant 0 : index
    %c0_4 = arith.constant 0 : index
    %3 = vector.load %arg3[%c0_3, %c0_4] : memref<8x1xf32, #tpu.memory_space<vmem>>, vector<8x1xf32>
    %4 = vector.broadcast %3 : vector<8x1xf32> to vector<8x512xf32>
    %5 = arith.addf %2, %4 : vector<8x512xf32>
    %c0_5 = arith.constant 0 : index
    %c0_6 = arith.constant 0 : index
    %6 = vector.load %arg4[%c0_5, %c0_6] : memref<8x512xbf16, #tpu.memory_space<vmem>>, vector<8x512xbf16>
    %7 = arith.extf %6 : vector<8x512xbf16> to vector<8x512xf32>
    %c0_7 = arith.constant 0 : index
    %c0_8 = arith.constant 0 : index
    %8 = vector.load %arg5[%c0_7, %c0_8] : memref<8x512xbf16, #tpu.memory_space<vmem>>, vector<8x512xbf16>
    %9 = arith.extf %8 : vector<8x512xbf16> to vector<8x512xf32>
    %cst_9 = arith.constant 0.000000e+00 : f32
    %10 = vector.broadcast %cst_9 : f32 to vector<8x512xf32>
    %11 = arith.subf %10, %5 : vector<8x512xf32>
    %12 = math.exp %11 : vector<8x512xf32>
    %cst_10 = arith.constant 1.000000e+00 : f32
    %13 = vector.broadcast %cst_10 : f32 to vector<8x512xf32>
    %14 = arith.addf %13, %12 : vector<8x512xf32>
    %cst_11 = arith.constant 1.000000e+00 : f32
    %15 = vector.broadcast %cst_11 : f32 to vector<8x512xf32>
    %16 = arith.divf %15, %14 : vector<8x512xf32>
    %17 = arith.mulf %7, %16 : vector<8x512xf32>
    %18 = arith.addf %17, %9 : vector<8x512xf32>
    %19 = arith.truncf %18 : vector<8x512xf32> to vector<8x512xbf16>
    %c0_12 = arith.constant 0 : index
    %c0_13 = arith.constant 0 : index
    %20 = vector.load %arg6[%c0_12, %c0_13] : memref<8x512xbf16, #tpu.memory_space<vmem>>, vector<8x512xbf16>
    tpu.vector_store %arg6[%c0_12, %c0_13], %19 {strides = array<i32>} : memref<8x512xbf16, #tpu.memory_space<vmem>>, vector<8x512xbf16>,
    return
  }
  func.func @transform_0(%arg0: i32) -> (i32, i32) {
    %c0_i32 = arith.constant 0 : i32
    %c0_i32_0 = arith.constant 0 : i32
    return %c0_i32, %arg0 : i32, i32
  }
  func.func @transform_1(%arg0: i32) -> (i32, i32) {
    %c0_i32 = arith.constant 0 : i32
    %c0_i32_0 = arith.constant 0 : i32
    %c0_i32_1 = arith.constant 0 : i32
    return %c0_i32, %c0_i32_0 : i32, i32
  }
  func.func @transform_2(%arg0: i32) -> (i32, i32) {
    %c0_i32 = arith.constant 0 : i32
    %c0_i32_0 = arith.constant 0 : i32
    %c0_i32_1 = arith.constant 0 : i32
    return %c0_i32, %c0_i32_0 : i32, i32
  }
  func.func @transform_3(%arg0: i32) -> (i32, i32) {
    %c0_i32 = arith.constant 0 : i32
    %c0_i32_0 = arith.constant 0 : i32
    return %c0_i32, %arg0 : i32, i32
  }
  func.func @transform_4(%arg0: i32) -> (i32, i32) {
    %c0_i32 = arith.constant 0 : i32
    %c0_i32_0 = arith.constant 0 : i32
    return %c0_i32, %arg0 : i32, i32
  }
  func.func @transform_5(%arg0: i32) -> (i32, i32) {
    %c0_i32 = arith.constant 0 : i32
    %c0_i32_0 = arith.constant 0 : i32
    return %c0_i32, %arg0 : i32, i32
  }
}

module attributes {stable_mosaic.version = 11 : i64} {
  func.func @_chatt_kernel(%arg0: i32, %arg1: memref<16x2x256xbf16, #tpu.memory_space<vmem>>, %arg2: memref<4x16xbf16, #tpu.memory_space<vmem>>, %arg3: memref<4x1xf32, #tpu.memory_space<vmem>>, %arg4: memref<16x4xbf16, #tpu.memory_space<vmem>>, %arg5: memref<16x1xf32, #tpu.memory_space<vmem>>, %arg6: memref<16x2x256xbf16, #tpu.memory_space<vmem>>) attributes {dimension_semantics = [#tpu.dimension_semantics<arbitrary>], iteration_bounds = array<i64: 1>, scalar_prefetch = 0 : i64, scratch_operands = 0 : i64, tpu.core_type = #tpu.core_type<tc>, window_params = [{pipeline_mode = #tpu.pipeline_mode<synchronous>, transform_indices = @transform_0, window_bounds = array<i64: 16, 2, 256>}, {pipeline_mode = #tpu.pipeline_mode<synchronous>, transform_indices = @transform_1, window_bounds = array<i64: 4, 16>}, {pipeline_mode = #tpu.pipeline_mode<synchronous>, transform_indices = @transform_2, window_bounds = array<i64: 4, 1>}, {pipeline_mode = #tpu.pipeline_mode<synchronous>, transform_indices = @transform_3, window_bounds = array<i64: 16, 4>}, {pipeline_mode = #tpu.pipeline_mode<synchronous>, transform_indices = @transform_4, window_bounds = array<i64: 16, 1>}, {pipeline_mode = #tpu.pipeline_mode<synchronous>, transform_indices = @transform_5, window_bounds = array<i64: 16, 2, 256>}]} {
    %c0 = arith.constant 0 : index
    %c0_0 = arith.constant 0 : index
    %c0_1 = arith.constant 0 : index
    %0 = vector.load %arg1[%c0, %c0_0, %c0_1] : memref<16x2x256xbf16, #tpu.memory_space<vmem>>, vector<16x2x256xbf16>
    %1 = arith.extf %0 : vector<16x2x256xbf16> to vector<16x2x256xf32>
    %cst = arith.constant dense<0.000000e+00> : vector<16x2xf32>
    %2 = vector.multi_reduction <add>, %1, %cst [2] : vector<16x2x256xf32> to vector<16x2xf32>
    %cst_2 = arith.constant 3.906250e-03 : f32
    %3 = vector.broadcast %cst_2 : f32 to vector<16x2xf32>
    %4 = arith.mulf %2, %3 : vector<16x2xf32>
    %5 = arith.mulf %1, %1 : vector<16x2x256xf32>
    %cst_3 = arith.constant dense<0.000000e+00> : vector<16x2xf32>
    %6 = vector.multi_reduction <add>, %5, %cst_3 [2] : vector<16x2x256xf32> to vector<16x2xf32>
    %cst_4 = arith.constant 3.906250e-03 : f32
    %7 = vector.broadcast %cst_4 : f32 to vector<16x2xf32>
    %8 = arith.mulf %6, %7 : vector<16x2xf32>
    %9 = arith.mulf %4, %4 : vector<16x2xf32>
    %10 = arith.subf %8, %9 : vector<16x2xf32>
    %cst_5 = arith.constant 0.000000e+00 : f32
    %11 = vector.broadcast %cst_5 : f32 to vector<16x2xf32>
    %12 = arith.maximumf %10, %11 : vector<16x2xf32>
    %13 = math.sqrt %12 : vector<16x2xf32>
    %14 = arith.addf %13, %4 : vector<16x2xf32>
    %c0_6 = arith.constant 0 : index
    %c0_7 = arith.constant 0 : index
    %15 = vector.load %arg2[%c0_6, %c0_7] : memref<4x16xbf16, #tpu.memory_space<vmem>>, vector<4x16xbf16>
    %16 = arith.extf %15 : vector<4x16xbf16> to vector<4x16xf32>
    %cst_8 = arith.constant dense<0.000000e+00> : vector<4x2xf32>
    %17 = tpu.matmul %16, %14, %cst_8 {dimension_numbers = #tpu.dot_dimension_numbers<[1], [0], [0], [1], [0, 0, 1, 1], [], []>} : vector<4x16xf32>, vector<16x2xf32>, vector<4x2xf32> -> vector<4x2xf32>
    %c0_9 = arith.constant 0 : index
    %c0_10 = arith.constant 0 : index
    %18 = vector.load %arg3[%c0_9, %c0_10] : memref<4x1xf32, #tpu.memory_space<vmem>>, vector<4x1xf32>
    %19 = vector.broadcast %18 : vector<4x1xf32> to vector<4x2xf32>
    %20 = arith.addf %17, %19 : vector<4x2xf32>
    %cst_11 = arith.constant 0.000000e+00 : f32
    %21 = vector.broadcast %cst_11 : f32 to vector<4x2xf32>
    %22 = arith.cmpf oge, %20, %21 : vector<4x2xf32>
    %cst_12 = arith.constant 1.000000e-01 : f32
    %23 = vector.broadcast %cst_12 : f32 to vector<4x2xf32>
    %24 = arith.mulf %23, %20 : vector<4x2xf32>
    %25 = arith.select %22, %20, %24 : vector<4x2xi1>, vector<4x2xf32>
    %c0_13 = arith.constant 0 : index
    %c0_14 = arith.constant 0 : index
    %26 = vector.load %arg4[%c0_13, %c0_14] : memref<16x4xbf16, #tpu.memory_space<vmem>>, vector<16x4xbf16>
    %27 = arith.extf %26 : vector<16x4xbf16> to vector<16x4xf32>
    %cst_15 = arith.constant dense<0.000000e+00> : vector<16x2xf32>
    %28 = tpu.matmul %27, %25, %cst_15 {dimension_numbers = #tpu.dot_dimension_numbers<[1], [0], [0], [1], [0, 0, 1, 1], [], []>} : vector<16x4xf32>, vector<4x2xf32>, vector<16x2xf32> -> vector<16x2xf32>
    %c0_16 = arith.constant 0 : index
    %c0_17 = arith.constant 0 : index
    %29 = vector.load %arg5[%c0_16, %c0_17] : memref<16x1xf32, #tpu.memory_space<vmem>>, vector<16x1xf32>
    %30 = vector.broadcast %29 : vector<16x1xf32> to vector<16x2xf32>
    %31 = arith.addf %28, %30 : vector<16x2xf32>
    %cst_18 = arith.constant 0.000000e+00 : f32
    %32 = vector.broadcast %cst_18 : f32 to vector<16x2xf32>
    %33 = arith.subf %32, %31 : vector<16x2xf32>
    %34 = math.exp %33 : vector<16x2xf32>
    %cst_19 = arith.constant 1.000000e+00 : f32
    %35 = vector.broadcast %cst_19 : f32 to vector<16x2xf32>
    %36 = arith.addf %35, %34 : vector<16x2xf32>
    %cst_20 = arith.constant 1.000000e+00 : f32
    %37 = vector.broadcast %cst_20 : f32 to vector<16x2xf32>
    %38 = arith.divf %37, %36 : vector<16x2xf32>
    %39 = vector.shape_cast %38 : vector<16x2xf32> to vector<16x2x1xf32>
    %40 = vector.broadcast %39 : vector<16x2x1xf32> to vector<16x2x256xf32>
    %41 = arith.mulf %40, %1 : vector<16x2x256xf32>
    %42 = arith.truncf %41 : vector<16x2x256xf32> to vector<16x2x256xbf16>
    %c0_21 = arith.constant 0 : index
    %c0_22 = arith.constant 0 : index
    %c0_23 = arith.constant 0 : index
    %43 = vector.load %arg6[%c0_21, %c0_22, %c0_23] : memref<16x2x256xbf16, #tpu.memory_space<vmem>>, vector<16x2x256xbf16>
    tpu.vector_store %arg6[%c0_21, %c0_22, %c0_23], %42 {strides = array<i32>} : memref<16x2x256xbf16, #tpu.memory_space<vmem>>, vector<16x2x256xbf16>,
    return
  }
  func.func @transform_0(%arg0: i32) -> (i32, i32, i32) {
    %c0_i32 = arith.constant 0 : i32
    %c0_i32_0 = arith.constant 0 : i32
    %c0_i32_1 = arith.constant 0 : i32
    %c0_i32_2 = arith.constant 0 : i32
    return %c0_i32, %c0_i32_0, %c0_i32_1 : i32, i32, i32
  }
  func.func @transform_1(%arg0: i32) -> (i32, i32) {
    %c0_i32 = arith.constant 0 : i32
    %c0_i32_0 = arith.constant 0 : i32
    %c0_i32_1 = arith.constant 0 : i32
    return %c0_i32, %c0_i32_0 : i32, i32
  }
  func.func @transform_2(%arg0: i32) -> (i32, i32) {
    %c0_i32 = arith.constant 0 : i32
    %c0_i32_0 = arith.constant 0 : i32
    %c0_i32_1 = arith.constant 0 : i32
    return %c0_i32, %c0_i32_0 : i32, i32
  }
  func.func @transform_3(%arg0: i32) -> (i32, i32) {
    %c0_i32 = arith.constant 0 : i32
    %c0_i32_0 = arith.constant 0 : i32
    %c0_i32_1 = arith.constant 0 : i32
    return %c0_i32, %c0_i32_0 : i32, i32
  }
  func.func @transform_4(%arg0: i32) -> (i32, i32) {
    %c0_i32 = arith.constant 0 : i32
    %c0_i32_0 = arith.constant 0 : i32
    %c0_i32_1 = arith.constant 0 : i32
    return %c0_i32, %c0_i32_0 : i32, i32
  }
  func.func @transform_5(%arg0: i32) -> (i32, i32, i32) {
    %c0_i32 = arith.constant 0 : i32
    %c0_i32_0 = arith.constant 0 : i32
    %c0_i32_1 = arith.constant 0 : i32
    %c0_i32_2 = arith.constant 0 : i32
    return %c0_i32, %c0_i32_0, %c0_i32_1 : i32, i32, i32
  }
}

module attributes {stable_mosaic.version = 11 : i64} {
  func.func @_conv_kernel(%arg0: i32, %arg1: memref<144x512xbf16, #tpu.memory_space<vmem>>, %arg2: memref<8x144xbf16, #tpu.memory_space<vmem>>, %arg3: memref<8x1xf32, #tpu.memory_space<vmem>>, %arg4: memref<8x512xbf16, #tpu.memory_space<vmem>>, %arg5: memref<8x512xbf16, #tpu.memory_space<vmem>>) attributes {dimension_semantics = [#tpu.dimension_semantics<parallel>], iteration_bounds = array<i64: 1>, scalar_prefetch = 0 : i64, scratch_operands = 0 : i64, tpu.core_type = #tpu.core_type<tc>, window_params = [{transform_indices = @transform_0, window_bounds = array<i64: 144, 512>}, {pipeline_mode = #tpu.pipeline_mode<synchronous>, transform_indices = @transform_1, window_bounds = array<i64: 8, 144>}, {pipeline_mode = #tpu.pipeline_mode<synchronous>, transform_indices = @transform_2, window_bounds = array<i64: 8, 1>}, {transform_indices = @transform_3, window_bounds = array<i64: 8, 512>}, {transform_indices = @transform_4, window_bounds = array<i64: 8, 512>}]} {
    %c0 = arith.constant 0 : index
    %c0_0 = arith.constant 0 : index
    %0 = vector.load %arg2[%c0, %c0_0] : memref<8x144xbf16, #tpu.memory_space<vmem>>, vector<8x144xbf16>
    %c0_1 = arith.constant 0 : index
    %c0_2 = arith.constant 0 : index
    %1 = vector.load %arg1[%c0_1, %c0_2] : memref<144x512xbf16, #tpu.memory_space<vmem>>, vector<144x512xbf16>
    %cst = arith.constant dense<0.000000e+00> : vector<8x512xf32>
    %2 = tpu.matmul %0, %1, %cst {dimension_numbers = #tpu.dot_dimension_numbers<[1], [0], [0], [1], [0, 0, 1, 1], [], []>} : vector<8x144xbf16>, vector<144x512xbf16>, vector<8x512xf32> -> vector<8x512xf32>
    %c0_3 = arith.constant 0 : index
    %c0_4 = arith.constant 0 : index
    %3 = vector.load %arg3[%c0_3, %c0_4] : memref<8x1xf32, #tpu.memory_space<vmem>>, vector<8x1xf32>
    %4 = vector.broadcast %3 : vector<8x1xf32> to vector<8x512xf32>
    %5 = arith.addf %2, %4 : vector<8x512xf32>
    %c0_5 = arith.constant 0 : index
    %c0_6 = arith.constant 0 : index
    %6 = vector.load %arg4[%c0_5, %c0_6] : memref<8x512xbf16, #tpu.memory_space<vmem>>, vector<8x512xbf16>
    %7 = arith.extf %6 : vector<8x512xbf16> to vector<8x512xf32>
    %8 = arith.addf %5, %7 : vector<8x512xf32>
    %9 = arith.truncf %8 : vector<8x512xf32> to vector<8x512xbf16>
    %c0_7 = arith.constant 0 : index
    %c0_8 = arith.constant 0 : index
    %10 = vector.load %arg5[%c0_7, %c0_8] : memref<8x512xbf16, #tpu.memory_space<vmem>>, vector<8x512xbf16>
    tpu.vector_store %arg5[%c0_7, %c0_8], %9 {strides = array<i32>} : memref<8x512xbf16, #tpu.memory_space<vmem>>, vector<8x512xbf16>,
    return
  }
  func.func @transform_0(%arg0: i32) -> (i32, i32) {
    %c0_i32 = arith.constant 0 : i32
    %c0_i32_0 = arith.constant 0 : i32
    return %c0_i32, %arg0 : i32, i32
  }
  func.func @transform_1(%arg0: i32) -> (i32, i32) {
    %c0_i32 = arith.constant 0 : i32
    %c0_i32_0 = arith.constant 0 : i32
    %c0_i32_1 = arith.constant 0 : i32
    return %c0_i32, %c0_i32_0 : i32, i32
  }
  func.func @transform_2(%arg0: i32) -> (i32, i32) {
    %c0_i32 = arith.constant 0 : i32
    %c0_i32_0 = arith.constant 0 : i32
    %c0_i32_1 = arith.constant 0 : i32
    return %c0_i32, %c0_i32_0 : i32, i32
  }
  func.func @transform_3(%arg0: i32) -> (i32, i32) {
    %c0_i32 = arith.constant 0 : i32
    %c0_i32_0 = arith.constant 0 : i32
    return %c0_i32, %arg0 : i32, i32
  }
  func.func @transform_4(%arg0: i32) -> (i32, i32) {
    %c0_i32 = arith.constant 0 : i32
    %c0_i32_0 = arith.constant 0 : i32
    return %c0_i32, %arg0 : i32, i32
  }
}

module attributes {stable_mosaic.version = 11 : i64} {
  func.func @_conv_kernel(%arg0: i32, %arg1: memref<40x512xbf16, #tpu.memory_space<vmem>>, %arg2: memref<8x40xbf16, #tpu.memory_space<vmem>>, %arg3: memref<8x1xf32, #tpu.memory_space<vmem>>, %arg4: memref<8x512xf32, #tpu.memory_space<vmem>>) attributes {dimension_semantics = [#tpu.dimension_semantics<parallel>], iteration_bounds = array<i64: 1>, scalar_prefetch = 0 : i64, scratch_operands = 0 : i64, tpu.core_type = #tpu.core_type<tc>, window_params = [{transform_indices = @transform_0, window_bounds = array<i64: 40, 512>}, {pipeline_mode = #tpu.pipeline_mode<synchronous>, transform_indices = @transform_1, window_bounds = array<i64: 8, 40>}, {pipeline_mode = #tpu.pipeline_mode<synchronous>, transform_indices = @transform_2, window_bounds = array<i64: 8, 1>}, {transform_indices = @transform_3, window_bounds = array<i64: 8, 512>}]} {
    %c0 = arith.constant 0 : index
    %c0_0 = arith.constant 0 : index
    %0 = vector.load %arg2[%c0, %c0_0] : memref<8x40xbf16, #tpu.memory_space<vmem>>, vector<8x40xbf16>
    %c0_1 = arith.constant 0 : index
    %c0_2 = arith.constant 0 : index
    %1 = vector.load %arg1[%c0_1, %c0_2] : memref<40x512xbf16, #tpu.memory_space<vmem>>, vector<40x512xbf16>
    %cst = arith.constant dense<0.000000e+00> : vector<8x512xf32>
    %2 = tpu.matmul %0, %1, %cst {dimension_numbers = #tpu.dot_dimension_numbers<[1], [0], [0], [1], [0, 0, 1, 1], [], []>} : vector<8x40xbf16>, vector<40x512xbf16>, vector<8x512xf32> -> vector<8x512xf32>
    %c0_3 = arith.constant 0 : index
    %c0_4 = arith.constant 0 : index
    %3 = vector.load %arg3[%c0_3, %c0_4] : memref<8x1xf32, #tpu.memory_space<vmem>>, vector<8x1xf32>
    %4 = vector.broadcast %3 : vector<8x1xf32> to vector<8x512xf32>
    %5 = arith.addf %2, %4 : vector<8x512xf32>
    %c0_5 = arith.constant 0 : index
    %c0_6 = arith.constant 0 : index
    %6 = vector.load %arg4[%c0_5, %c0_6] : memref<8x512xf32, #tpu.memory_space<vmem>>, vector<8x512xf32>
    tpu.vector_store %arg4[%c0_5, %c0_6], %5 {strides = array<i32>} : memref<8x512xf32, #tpu.memory_space<vmem>>, vector<8x512xf32>,
    return
  }
  func.func @transform_0(%arg0: i32) -> (i32, i32) {
    %c0_i32 = arith.constant 0 : i32
    %c0_i32_0 = arith.constant 0 : i32
    return %c0_i32, %arg0 : i32, i32
  }
  func.func @transform_1(%arg0: i32) -> (i32, i32) {
    %c0_i32 = arith.constant 0 : i32
    %c0_i32_0 = arith.constant 0 : i32
    %c0_i32_1 = arith.constant 0 : i32
    return %c0_i32, %c0_i32_0 : i32, i32
  }
  func.func @transform_2(%arg0: i32) -> (i32, i32) {
    %c0_i32 = arith.constant 0 : i32
    %c0_i32_0 = arith.constant 0 : i32
    %c0_i32_1 = arith.constant 0 : i32
    return %c0_i32, %c0_i32_0 : i32, i32
  }
  func.func @transform_3(%arg0: i32) -> (i32, i32) {
    %c0_i32 = arith.constant 0 : i32
    %c0_i32_0 = arith.constant 0 : i32
    return %c0_i32, %arg0 : i32, i32
  }
}

</mosaic_0001>

<bundles_post_ra>
// kernel: feature_process_fwd.4
= control target key start
LH: loop header
LB: loop body
LE: loop exit
PB: predicated region body
PF: predicated region fallthrough
CT: control target
= control target key end

     0   :  { %vm46_vm0 = vcmask 1043456   ;;  %vm47_vm1 = vcmask 1044480   ;;  %v185_v1 = vmov 0   ;;  %v186_v2 = vmov 65535   ;;  %s231_s0 = inlined_call_operand.vmem [shape: bf16[9,512], index: 0, kind: input, shape index: {}]   ;;  %s232_s2 = inlined_call_operand.vmem [shape: f32[8,1], index: 2, kind: input, shape index: {}]   ;;  %s233_s1 = inlined_call_operand.vmem [shape: bf16[8,9], index: 1, kind: input, shape index: {}]   ;;  %s234_s3 = inlined_call_operand.vmem [shape: bf16[8,512], index: 3, kind: output, shape index: {}]  }
   0x1   :  { %v179_v0 = vld [vmem:[%s231_s0 + $0x4] ss:$16 sps:$4 sm:$0x1f]   ;;  %94 = vmatprep.mubr.bf16.mxu0 %v185_v1  ;;  %135 = vmatprep.mubr.bf16.mxu1 %v185_v1  ;;  %v48_v3 = vsel %vm46_vm0, 4294967295, %v186_v2  ;;  %v15_v13 = vld [vmem:[%s233_s1] sm:$0xf] }
   0x2   :  { %178 = vset.pattern.permute.xlu0 %v185_v1  ;;  %v49_v4 = vsel %vm47_vm1, %v48_v3, 0  ;;  %v181_v5 = vld [vmem:[%s231_s0 + $0xc] ss:$16 sps:$4 sm:$0x1f]   ;;  %v20_v6 = vld [vmem:[%s232_s2] sm:$0xff]  ;;  %vm42_vm2 = vcmask 72704  }
   0x3   :  { %v54_v7 = vand.u32 %v179_v0, %v49_v4  ;;  %v183_v8 = vld [vmem:[%s231_s0] ss:$16 sps:$4 sm:$0x1f]   ;;  %v184_v9 = vld [vmem:[%s231_s0 + $0x8] ss:$16 sps:$4 sm:$0x1f]   ;;  %23 = vperm.xlu0 %178, %v20_v6   ;;  %v60_v10 = vand.u32 %v181_v5, %v49_v4 }
   0x4   :  { %v51_v11 = vand.u32 %v183_v8, %v49_v4  ;;  %v57_v12 = vand.u32 %v184_v9, %v49_v4 }
   0x5   :  { %62 = vmatprep.subr.bf16.mxu0 %v54_v7  ;;  %103 = vmatprep.subr.bf16.mxu1 %v60_v10 }
   0x6   :  { %63 = vmatpush1.bf16.msra.mxu0 %v51_v11  ;;  %104 = vmatpush1.bf16.msra.mxu1 %v57_v12 }
   0x9   :  { %170 = vmatmul.mubr.msk.bf16.vlgmr.msra.gmra.mrb[0].mxu0 %vm42_vm2, %v15_v13  ;;  %171 = vmatmul.mubr.msk.bf16.vlgmr.msra.gmra.mrb[0].mxu1 %vm42_vm2, %v15_v13 }
  0x82   :  { %v24_v14 = vpop.permute.xlu0 %23 }
  0xdc   :  { %v96_v15 = vpop.f32.mrb[0].mxu0  ;;  %v137_v16 = vpop.f32.mrb[0].mxu1 }
  0xdd   :  { %v97_v17 = vadd.f32 %v96_v15, %v24_v14  ;;  %v138_v18 = vadd.f32 %v137_v16, %v24_v14  ;;  %v98_v19 = vpop.f32.mrb[1].mxu0  ;;  %v139_v20 = vpop.f32.mrb[1].mxu1 }
  0xde   :  { %v99_v21 = vadd.f32 %v98_v19, %v24_v14  ;;  %v140_v22 = vadd.f32 %v139_v20, %v24_v14  ;;  %v100_v23 = vpop.f32.mrb[2].mxu0  ;;  %v141_v24 = vpop.f32.mrb[2].mxu1 }
  0xdf   :  { %v101_v25 = vpop.f32.mrb[3].mxu0  ;;  %v142_v26 = vpop.f32.mrb[3].mxu1 }
  0xe0   :  { %v174_v27 = vpack.c.bf16 %v99_v21, %v97_v17  ;;  %v175_v28 = vpack.c.bf16 %v140_v22, %v138_v18 }
  0xe2   :  { %160 = vst [vmem:[%s234_s3] sm:$0xff] %v174_v27  ;;  %161 = vst [vmem:[%s234_s3 + $0x8] sm:$0xff] %v175_v28 }

// kernel: feature_process_fwd.3
= control target key start
LH: loop header
LB: loop body
LE: loop exit
PB: predicated region body
PF: predicated region fallthrough
CT: control target
= control target key end

     0   :  { %v241_v1 = vmov 0   ;;  %vm86_vm0 = vcmask 1041408   ;;  %vm82_vm1 = vcmask 293888   ;;  %s308_s0 = inlined_call_operand.vmem [shape: bf16[36,512], index: 0, kind: input, shape index: {}]   ;;  %s309_s2 = inlined_call_operand.vmem [shape: f32[8,1], index: 2, kind: input, shape index: {}]   ;;  %s310_s1 = inlined_call_operand.vmem [shape: bf16[8,36], index: 1, kind: input, shape index: {}]   ;;  %s311_s3 = inlined_call_operand.vmem [shape: bf16[8,512], index: 3, kind: output, shape index: {}]  }
   0x1   :  { %v225_v0 = vld [vmem:[%s308_s0 + $0x4] ss:$16 sps:$4 sm:$0xff]   ;;  %131 = vmatprep.mubr.bf16.mxu0 %v241_v1  ;;  %172 = vmatprep.mubr.bf16.mxu1 %v241_v1  ;;  %v227_v2 = vld [vmem:[%s308_s0 + $0xc] ss:$16 sps:$4 sm:$0xff]   ;;  %v229_v3 = vld [vmem:[%s308_s0] ss:$16 sps:$4 sm:$0xff]  }
   0x2   :  { %224 = vset.pattern.permute.xlu0 %v241_v1  ;;  %99 = vmatprep.subr.bf16.mxu0 %v225_v0  ;;  %v230_v4 = vld [vmem:[%s308_s0 + $0x8] ss:$16 sps:$4 sm:$0xff]   ;;  %v231_v5 = vld [vmem:[%s308_s0 + $0x24] ss:$16 sps:$4 sm:$0xff]   ;;  %v233_v6 = vld [vmem:[%s308_s0 + $0x2c] ss:$16 sps:$4 sm:$0xff]  }
   0x3   :  { %140 = vmatprep.subr.bf16.mxu1 %v227_v2  ;;  %100 = vmatpush1.bf16.msra.mxu0 %v229_v3  ;;  %v235_v7 = vld [vmem:[%s308_s0 + $0x20] ss:$16 sps:$4 sm:$0xff]   ;;  %v236_v8 = vld [vmem:[%s308_s0 + $0x28] ss:$16 sps:$4 sm:$0xff]  }
   0x4   :  { %141 = vmatpush1.bf16.msra.mxu1 %v230_v4  ;;  %101 = vmatprep.subr.bf16.mxu0 %v231_v5  ;;  %v24_v9 = vld [vmem:[%s308_s0 + $0x40] sm:$0x33]  ;;  %v25_v10 = vld [vmem:[%s308_s0 + $0x48] sm:$0x33] }
   0x5   :  { %142 = vmatprep.subr.bf16.mxu1 %v233_v6  ;;  %v212_v11 = vcombine.high %v24_v9, %v24_v9  ;;  %v214_v12 = vcombine.high %v25_v10, %v25_v10  ;;  %v211_v13 = vcombine.low %v24_v9, %v24_v9  ;;  %v213_v14 = vcombine.low %v25_v10, %v25_v10  ;;  %v26_v15 = vld [vmem:[%s309_s2] sm:$0xff] }
   0x6   :  { %29 = vperm.xlu0 %224, %v26_v15   ;;  %v15_v18 = vld [vmem:[%s310_s1] sm:$0xf] }
   0x7   :  { %102 = vmatpush1.bf16.msra.mxu0 %v235_v7  ;;  %v88_v16 = vsel %vm86_vm0, %v211_v13, 0  ;;  %v94_v17 = vsel %vm86_vm0, %v213_v14, 0 }
   0x8   :  { %143 = vmatpush1.bf16.msra.mxu1 %v236_v8  ;;  %215 = vmatprep.subr.msk.bf16.mxu0 %vm86_vm0, %v212_v11 }
   0x9   :  { %217 = vmatprep.subr.msk.bf16.mxu1 %vm86_vm0, %v214_v12 }
   0xb   :  { %104 = vmatpush1.bf16.msra.mxu0 %v88_v16 }
   0xc   :  { %145 = vmatpush1.bf16.msra.mxu1 %v94_v17 }
   0xe   :  { %216 = vmatmul.mubr.msk.bf16.vlgmr.msra.gmra.mrb[0].mxu0 %vm82_vm1, %v15_v18 }
   0xf   :  { %218 = vmatmul.mubr.msk.bf16.vlgmr.msra.gmra.mrb[0].mxu1 %vm82_vm1, %v15_v18 }
  0x85   :  { %v30_v19 = vpop.permute.xlu0 %29 }
  0xe1   :  { %v133_v20 = vpop.f32.mrb[0].mxu0 }
  0xe2   :  { %v174_v21 = vpop.f32.mrb[0].mxu1  ;;  %v134_v22 = vadd.f32 %v133_v20, %v30_v19  ;;  %v135_v24 = vpop.f32.mrb[1].mxu0 }
  0xe3   :  { %v175_v23 = vadd.f32 %v174_v21, %v30_v19  ;;  %v176_v25 = vpop.f32.mrb[1].mxu1  ;;  %v136_v26 = vadd.f32 %v135_v24, %v30_v19  ;;  %v137_v28 = vpop.f32.mrb[2].mxu0 }
  0xe4   :  { %v177_v27 = vadd.f32 %v176_v25, %v30_v19  ;;  %v178_v29 = vpop.f32.mrb[2].mxu1  ;;  %v138_v30 = vpop.f32.mrb[3].mxu0 }
  0xe5   :  { %v179_v31 = vpop.f32.mrb[3].mxu1  ;;  %v221_v32 = vpack.c.bf16 %v136_v26, %v134_v22 }
  0xe6   :  { %v222_v33 = vpack.c.bf16 %v177_v27, %v175_v23 }
  0xe7   :  { %197 = vst [vmem:[%s311_s3] sm:$0xff] %v221_v32 }
  0xe8   :  { %198 = vst [vmem:[%s311_s3 + $0x8] sm:$0xff] %v222_v33 }

// kernel: custom-call.14
= control target key start
LH: loop header
LB: loop body
LE: loop exit
PB: predicated region body
PF: predicated region fallthrough
CT: control target
= control target key end

     0   :  { %s6_s0 = inlined_call_operand.vmem [shape: bf16[5,8,2,16,16], index: 0, kind: output, shape index: {}]  }

// kernel: closed_call.195
= control target key start
LH: loop header
LB: loop body
LE: loop exit
PB: predicated region body
PF: predicated region fallthrough
CT: control target
= control target key end

     0   :  { %vm38_vm0 = vcmask 1043456   ;;  %v155_v2 = vmov 0   ;;  %vm34_vm1 = vcmask 64512   ;;  %s204_s0 = inlined_call_operand.vmem [shape: bf16[8,512], index: 0, kind: input, shape index: {}]   ;;  %s205_s2 = inlined_call_operand.vmem [shape: f32[8,1], index: 2, kind: input, shape index: {}]   ;;  %s206_s1 = inlined_call_operand.vmem [shape: bf16[8,8], index: 1, kind: input, shape index: {}]   ;;  %s207_s3 = inlined_call_operand.vmem [shape: f32[8,512], index: 3, kind: output, shape index: {}]  }
   0x1   :  { %v16_v0 = vld [vmem:[%s204_s0] sm:$0xff]  ;;  %v17_v1 = vld [vmem:[%s204_s0 + $0x8] sm:$0xff]  ;;  %83 = vmatprep.mubr.bf16.mxu0 %v155_v2  ;;  %124 = vmatprep.mubr.bf16.mxu1 %v155_v2 }
   0x2   :  { %v142_v3 = vcombine.high %v16_v0, %v16_v0  ;;  %v144_v4 = vcombine.high %v17_v1, %v17_v1  ;;  %v141_v5 = vcombine.low %v16_v0, %v16_v0  ;;  %v143_v6 = vcombine.low %v17_v1, %v17_v1  ;;  %150 = vset.pattern.permute.xlu0 %v155_v2  ;;  %v18_v7 = vld [vmem:[%s205_s2] sm:$0xff] }
   0x3   :  { %21 = vperm.xlu0 %150, %v18_v7   ;;  %v15_v10 = vld [vmem:[%s206_s1] sm:$0xf] }
   0x4   :  { %145 = vmatprep.subr.msk.bf16.mxu0 %vm38_vm0, %v142_v3  ;;  %147 = vmatprep.subr.msk.bf16.mxu1 %vm38_vm0, %v144_v4  ;;  %v40_v8 = vsel %vm38_vm0, %v141_v5, 0  ;;  %v46_v9 = vsel %vm38_vm0, %v143_v6, 0 }
   0x5   :  { %52 = vmatpush1.bf16.msra.mxu0 %v40_v8  ;;  %93 = vmatpush1.bf16.msra.mxu1 %v46_v9 }
   0x8   :  { %146 = vmatmul.mubr.msk.bf16.vlgmr.msra.gmra.mrb[0].mxu0 %vm34_vm1, %v15_v10  ;;  %148 = vmatmul.mubr.msk.bf16.vlgmr.msra.gmra.mrb[0].mxu1 %vm34_vm1, %v15_v10 }
  0x82   :  { %v22_v11 = vpop.permute.xlu0 %21 }
  0xdb   :  { %v85_v12 = vpop.f32.mrb[0].mxu0  ;;  %v126_v13 = vpop.f32.mrb[0].mxu1 }
  0xdc   :  { %v86_v14 = vadd.f32 %v85_v12, %v22_v11  ;;  %v127_v15 = vadd.f32 %v126_v13, %v22_v11  ;;  %v87_v16 = vpop.f32.mrb[1].mxu0  ;;  %v128_v17 = vpop.f32.mrb[1].mxu1 }
  0xdd   :  { %v88_v18 = vadd.f32 %v87_v16, %v22_v11  ;;  %v129_v19 = vadd.f32 %v128_v17, %v22_v11  ;;  %v89_v20 = vpop.f32.mrb[2].mxu0  ;;  %v130_v21 = vpop.f32.mrb[2].mxu1 }
  0xde   :  { %133 = vst [vmem:[%s207_s3] sm:$0xff] %v86_v14  ;;  %135 = vst [vmem:[%s207_s3 + $0x10] sm:$0xff] %v127_v15  ;;  %v90_v22 = vpop.f32.mrb[3].mxu0  ;;  %v131_v23 = vpop.f32.mrb[3].mxu1 }
  0xdf   :  { %134 = vst [vmem:[%s207_s3 + $0x8] sm:$0xff] %v88_v18  ;;  %136 = vst [vmem:[%s207_s3 + $0x18] sm:$0xff] %v129_v19 }

// kernel: closed_call.192
= control target key start
LH: loop header
LB: loop body
LE: loop exit
PB: predicated region body
PF: predicated region fallthrough
CT: control target
= control target key end

     0   :  { %v309_v1 = vmov 0   ;;  %vm134_vm0 = vcmask 1043456   ;;  %vm130_vm1 = vcmask 588800   ;;  %s396_s0 = inlined_call_operand.vmem [shape: bf16[72,512], index: 0, kind: input, shape index: {}]   ;;  %s397_s2 = inlined_call_operand.vmem [shape: f32[8,1], index: 2, kind: input, shape index: {}]   ;;  %s398_s1 = inlined_call_operand.vmem [shape: bf16[8,72], index: 1, kind: input, shape index: {}]   ;;  %s399_s3 = inlined_call_operand.vmem [shape: bf16[8,512], index: 3, kind: output, shape index: {}]  }
   0x1   :  { %v281_v0 = vld [vmem:[%s396_s0 + $0x4] ss:$16 sps:$4 sm:$0xff]   ;;  %179 = vmatprep.mubr.bf16.mxu0 %v309_v1  ;;  %220 = vmatprep.mubr.bf16.mxu1 %v309_v1  ;;  %v283_v2 = vld [vmem:[%s396_s0 + $0xc] ss:$16 sps:$4 sm:$0xff]   ;;  %v285_v3 = vld [vmem:[%s396_s0] ss:$16 sps:$4 sm:$0xff]  }
   0x2   :  { %280 = vset.pattern.permute.xlu0 %v309_v1  ;;  %147 = vmatprep.subr.bf16.mxu0 %v281_v0  ;;  %v286_v4 = vld [vmem:[%s396_s0 + $0x8] ss:$16 sps:$4 sm:$0xff]   ;;  %v287_v5 = vld [vmem:[%s396_s0 + $0x24] ss:$16 sps:$4 sm:$0xff]   ;;  %v289_v6 = vld [vmem:[%s396_s0 + $0x2c] ss:$16 sps:$4 sm:$0xff]  }
   0x3   :  { %188 = vmatprep.subr.bf16.mxu1 %v283_v2  ;;  %148 = vmatpush1.bf16.msra.mxu0 %v285_v3  ;;  %v291_v7 = vld [vmem:[%s396_s0 + $0x20] ss:$16 sps:$4 sm:$0xff]   ;;  %v292_v8 = vld [vmem:[%s396_s0 + $0x28] ss:$16 sps:$4 sm:$0xff]   ;;  %v293_v9 = vld [vmem:[%s396_s0 + $0x44] ss:$16 sps:$4 sm:$0xff]  }
   0x4   :  { %189 = vmatpush1.bf16.msra.mxu1 %v286_v4  ;;  %149 = vmatprep.subr.bf16.mxu0 %v287_v5  ;;  %v295_v10 = vld [vmem:[%s396_s0 + $0x4c] ss:$16 sps:$4 sm:$0xff]   ;;  %v297_v11 = vld [vmem:[%s396_s0 + $0x40] ss:$16 sps:$4 sm:$0xff]   ;;  %v298_v12 = vld [vmem:[%s396_s0 + $0x48] ss:$16 sps:$4 sm:$0xff]  }
   0x5   :  { %190 = vmatprep.subr.bf16.mxu1 %v289_v6  ;;  %v299_v13 = vld [vmem:[%s396_s0 + $0x64] ss:$16 sps:$4 sm:$0xff]   ;;  %v301_v14 = vld [vmem:[%s396_s0 + $0x6c] ss:$16 sps:$4 sm:$0xff]   ;;  %v303_v18 = vld [vmem:[%s396_s0 + $0x60] ss:$16 sps:$4 sm:$0xff]  }
   0x6   :  { %v32_v15 = vld [vmem:[%s396_s0 + $0x80] sm:$0xff]  ;;  %v33_v16 = vld [vmem:[%s396_s0 + $0x88] sm:$0xff] }
   0x7   :  { %150 = vmatpush1.bf16.msra.mxu0 %v291_v7  ;;  %v34_v17 = vld [vmem:[%s397_s2] sm:$0xff]  ;;  %v304_v19 = vld [vmem:[%s396_s0 + $0x68] ss:$16 sps:$4 sm:$0xff]   ;;  %v268_v20 = vcombine.high %v32_v15, %v32_v15  ;;  %v270_v21 = vcombine.high %v33_v16, %v33_v16  ;;  %v267_v22 = vcombine.low %v32_v15, %v32_v15  ;;  %v269_v23 = vcombine.low %v33_v16, %v33_v16 }
   0x8   :  { %191 = vmatpush1.bf16.msra.mxu1 %v292_v8  ;;  %151 = vmatprep.subr.bf16.mxu0 %v293_v9  ;;  %v15_v26 = vld [vmem:[%s398_s1] sm:$0xf] }
   0x9   :  { %192 = vmatprep.subr.bf16.mxu1 %v295_v10  ;;  %37 = vperm.xlu0 %280, %v34_v17   ;;  %v136_v24 = vsel %vm134_vm0, %v267_v22, 0  ;;  %v142_v25 = vsel %vm134_vm0, %v269_v23, 0 }
   0xb   :  { %152 = vmatpush1.bf16.msra.mxu0 %v297_v11 }
   0xc   :  { %193 = vmatpush1.bf16.msra.mxu1 %v298_v12  ;;  %153 = vmatprep.subr.bf16.mxu0 %v299_v13 }
   0xd   :  { %194 = vmatprep.subr.bf16.mxu1 %v301_v14 }
   0xf   :  { %154 = vmatpush1.bf16.msra.mxu0 %v303_v18 }
  0x10   :  { %195 = vmatpush1.bf16.msra.mxu1 %v304_v19  ;;  %271 = vmatprep.subr.msk.bf16.mxu0 %vm134_vm0, %v268_v20 }
  0x11   :  { %273 = vmatprep.subr.msk.bf16.mxu1 %vm134_vm0, %v270_v21 }
  0x13   :  { %156 = vmatpush1.bf16.msra.mxu0 %v136_v24 }
  0x14   :  { %197 = vmatpush1.bf16.msra.mxu1 %v142_v25 }
  0x16   :  { %272 = vmatmul.mubr.msk.bf16.vlgmr.msra.gmra.mrb[0].mxu0 %vm130_vm1, %v15_v26 }
  0x17   :  { %274 = vmatmul.mubr.msk.bf16.vlgmr.msra.gmra.mrb[0].mxu1 %vm130_vm1, %v15_v26 }
  0x88   :  { %v38_v27 = vpop.permute.xlu0 %37 }
  0xe9   :  { %v181_v28 = vpop.f32.mrb[0].mxu0 }
  0xea   :  { %v222_v29 = vpop.f32.mrb[0].mxu1  ;;  %v182_v30 = vadd.f32 %v181_v28, %v38_v27  ;;  %v183_v32 = vpop.f32.mrb[1].mxu0 }
  0xeb   :  { %v223_v31 = vadd.f32 %v222_v29, %v38_v27  ;;  %v224_v33 = vpop.f32.mrb[1].mxu1  ;;  %v184_v34 = vadd.f32 %v183_v32, %v38_v27  ;;  %v185_v36 = vpop.f32.mrb[2].mxu0 }
  0xec   :  { %v225_v35 = vadd.f32 %v224_v33, %v38_v27  ;;  %v226_v37 = vpop.f32.mrb[2].mxu1  ;;  %v186_v38 = vpop.f32.mrb[3].mxu0 }
  0xed   :  { %v227_v39 = vpop.f32.mrb[3].mxu1  ;;  %v277_v40 = vpack.c.bf16 %v184_v34, %v182_v30 }
  0xee   :  { %v278_v41 = vpack.c.bf16 %v225_v35, %v223_v31 }
  0xef   :  { %245 = vst [vmem:[%s399_s3] sm:$0xff] %v277_v40 }
  0xf0   :  { %246 = vst [vmem:[%s399_s3 + $0x8] sm:$0xff] %v278_v41 }

// kernel: closed_call.193
= control target key start
LH: loop header
LB: loop body
LE: loop exit
PB: predicated region body
PF: predicated region fallthrough
CT: control target
= control target key end

     0   :  { %vm38_vm0 = vcmask 1043456   ;;  %v173_v2 = vmov 0   ;;  %vm34_vm1 = vcmask 64512   ;;  %s216_s0 = inlined_call_operand.vmem [shape: bf16[8,512], index: 0, kind: input, shape index: {}]   ;;  %s217_s2 = inlined_call_operand.vmem [shape: f32[8,1], index: 2, kind: input, shape index: {}]   ;;  %s218_s1 = inlined_call_operand.vmem [shape: bf16[8,8], index: 1, kind: input, shape index: {}]   ;;  %s219_s3 = inlined_call_operand.vmem [shape: bf16[8,512], index: 3, kind: output, shape index: {}]  }
   0x1   :  { %v16_v0 = vld [vmem:[%s216_s0] sm:$0xff]  ;;  %v17_v1 = vld [vmem:[%s216_s0 + $0x8] sm:$0xff]  ;;  %83 = vmatprep.mubr.bf16.mxu0 %v173_v2  ;;  %124 = vmatprep.mubr.bf16.mxu1 %v173_v2 }
   0x2   :  { %v156_v3 = vcombine.high %v16_v0, %v16_v0  ;;  %v158_v4 = vcombine.high %v17_v1, %v17_v1  ;;  %v155_v5 = vcombine.low %v16_v0, %v16_v0  ;;  %v157_v6 = vcombine.low %v17_v1, %v17_v1  ;;  %168 = vset.pattern.permute.xlu0 %v173_v2  ;;  %v18_v7 = vld [vmem:[%s217_s2] sm:$0xff] }
   0x3   :  { %21 = vperm.xlu0 %168, %v18_v7   ;;  %v15_v10 = vld [vmem:[%s218_s1] sm:$0xf] }
   0x4   :  { %159 = vmatprep.subr.msk.bf16.mxu0 %vm38_vm0, %v156_v3  ;;  %161 = vmatprep.subr.msk.bf16.mxu1 %vm38_vm0, %v158_v4  ;;  %v40_v8 = vsel %vm38_vm0, %v155_v5, 0  ;;  %v46_v9 = vsel %vm38_vm0, %v157_v6, 0 }
   0x5   :  { %52 = vmatpush1.bf16.msra.mxu0 %v40_v8  ;;  %93 = vmatpush1.bf16.msra.mxu1 %v46_v9 }
   0x8   :  { %160 = vmatmul.mubr.msk.bf16.vlgmr.msra.gmra.mrb[0].mxu0 %vm34_vm1, %v15_v10  ;;  %162 = vmatmul.mubr.msk.bf16.vlgmr.msra.gmra.mrb[0].mxu1 %vm34_vm1, %v15_v10 }
  0x82   :  { %v22_v11 = vpop.permute.xlu0 %21 }
  0xdb   :  { %v85_v12 = vpop.f32.mrb[0].mxu0  ;;  %v126_v13 = vpop.f32.mrb[0].mxu1 }
  0xdc   :  { %v86_v14 = vadd.f32 %v85_v12, %v22_v11  ;;  %v127_v15 = vadd.f32 %v126_v13, %v22_v11  ;;  %v87_v16 = vpop.f32.mrb[1].mxu0  ;;  %v128_v17 = vpop.f32.mrb[1].mxu1 }
  0xdd   :  { %v88_v18 = vadd.f32 %v87_v16, %v22_v11  ;;  %v129_v19 = vadd.f32 %v128_v17, %v22_v11  ;;  %v89_v20 = vpop.f32.mrb[2].mxu0  ;;  %v130_v21 = vpop.f32.mrb[2].mxu1 }
  0xde   :  { %v90_v22 = vpop.f32.mrb[3].mxu0  ;;  %v131_v23 = vpop.f32.mrb[3].mxu1 }
  0xdf   :  { %v165_v24 = vpack.c.bf16 %v88_v18, %v86_v14  ;;  %v166_v25 = vpack.c.bf16 %v129_v19, %v127_v15 }
  0xe1   :  { %149 = vst [vmem:[%s219_s3] sm:$0xff] %v165_v24  ;;  %150 = vst [vmem:[%s219_s3 + $0x8] sm:$0xff] %v166_v25 }

// kernel: closed_call.198
= control target key start
LH: loop header
LB: loop body
LE: loop exit
PB: predicated region body
PF: predicated region fallthrough
CT: control target
= control target key end

     0   :  { %v204_v1 = vmov 0   ;;  %vm58_vm0 = vcmask 130048   ;;  %s258_s0 = inlined_call_operand.vmem [shape: bf16[16,512], index: 0, kind: input, shape index: {}]   ;;  %s259_s1 = inlined_call_operand.vmem [shape: bf16[16,16], index: 1, kind: input, shape index: {}]   ;;  %s260_s2 = inlined_call_operand.vmem [shape: f32[16,1], index: 2, kind: input, shape index: {}]   ;;  %s261_s3 = inlined_call_operand.vmem [shape: bf16[16,512], index: 3, kind: output, shape index: {}]  }
   0x1   :  { %v197_v0 = vld [vmem:[%s258_s0 + $0x4] ss:$16 sps:$4 sm:$0xff]   ;;  %94 = vmatprep.mubr.bf16.mxu0 %v204_v1  ;;  %137 = vmatprep.mubr.bf16.mxu1 %v204_v1  ;;  %v199_v2 = vld [vmem:[%s258_s0 + $0xc] ss:$16 sps:$4 sm:$0xff]   ;;  %v201_v3 = vld [vmem:[%s258_s0] ss:$16 sps:$4 sm:$0xff]  }
   0x2   :  { %196 = vset.pattern.permute.xlu0 %v204_v1  ;;  %62 = vmatprep.subr.bf16.mxu0 %v197_v0  ;;  %v202_v4 = vld [vmem:[%s258_s0 + $0x8] ss:$16 sps:$4 sm:$0xff]   ;;  %v203_v5 = vld [vmem:[%s259_s1] sm:$0xff]  }
   0x3   :  { %105 = vmatprep.subr.bf16.mxu1 %v199_v2  ;;  %v21_v6 = vld [vmem:[%s260_s2] sm:$0xff]  ;;  %63 = vmatpush1.bf16.msra.mxu0 %v201_v3  ;;  %v22_v7 = vld [vmem:[%s260_s2 + $0x8] sm:$0xff] }
   0x4   :  { %106 = vmatpush1.bf16.msra.mxu1 %v202_v4  ;;  %25 = vperm.xlu0 %196, %v21_v6  }
   0x6   :  { %185 = vmatmul.mubr.msk.bf16.vlgmr.msra.gmra.mrb[0].mxu0 %vm58_vm0, %v203_v5 }
   0x7   :  { %186 = vmatmul.mubr.msk.bf16.vlgmr.msra.gmra.mrb[0].mxu1 %vm58_vm0, %v203_v5 }
   0x8   :  { %30 = vperm.xlu0 %196, %v22_v7  }
  0x83   :  { %v26_v8 = vpop.permute.xlu0 %25 }
  0x87   :  { %v31_v9 = vpop.permute.xlu0 %30 }
  0xd9   :  { %v96_v10 = vpop.f32.mrb[0].mxu0 }
  0xda   :  { %v139_v11 = vpop.f32.mrb[0].mxu1  ;;  %v97_v12 = vadd.f32 %v96_v10, %v26_v8  ;;  %v98_v14 = vpop.f32.mrb[1].mxu0 }
  0xdb   :  { %v140_v13 = vadd.f32 %v139_v11, %v26_v8  ;;  %v141_v15 = vpop.f32.mrb[1].mxu1  ;;  %v99_v16 = vadd.f32 %v98_v14, %v26_v8  ;;  %v100_v18 = vpop.f32.mrb[2].mxu0 }
  0xdc   :  { %v142_v17 = vadd.f32 %v141_v15, %v26_v8  ;;  %v143_v19 = vpop.f32.mrb[2].mxu1  ;;  %v101_v20 = vadd.f32 %v100_v18, %v31_v9  ;;  %v102_v22 = vpop.f32.mrb[3].mxu0 }
  0xdd   :  { %v144_v21 = vadd.f32 %v143_v19, %v31_v9  ;;  %v145_v23 = vpop.f32.mrb[3].mxu1  ;;  %v191_v24 = vpack.c.bf16 %v99_v16, %v97_v12  ;;  %v103_v26 = vadd.f32 %v102_v22, %v31_v9 }
  0xde   :  { %v192_v25 = vpack.c.bf16 %v142_v17, %v140_v13  ;;  %v146_v27 = vadd.f32 %v145_v23, %v31_v9 }
  0xdf   :  { %172 = vst [vmem:[%s261_s3] sm:$0xff] %v191_v24  ;;  %v193_v28 = vpack.c.bf16 %v103_v26, %v101_v20 }
  0xe0   :  { %173 = vst [vmem:[%s261_s3 + $0x8] sm:$0xff] %v192_v25  ;;  %v194_v29 = vpack.c.bf16 %v146_v27, %v144_v21 }
  0xe1   :  { %174 = vst [vmem:[%s261_s3 + $0x10] sm:$0xff] %v193_v28 }
  0xe2   :  { %175 = vst [vmem:[%s261_s3 + $0x18] sm:$0xff] %v194_v29 }

// kernel: closed_call.196
= control target key start
LH: loop header
LB: loop body
LE: loop exit
PB: predicated region body
PF: predicated region fallthrough
CT: control target
= control target key end

     0   :  { %s721_s18 = smov 0   ;;  %s765_s0 = inlined_call_operand.vmem [shape: bf16[2,16,384], index: 0, kind: input, shape index: {}]   ;;  %s766_s1 = inlined_call_operand.vmem [shape: bf16[2,8,16], index: 1, kind: input, shape index: {}]   ;;  %s767_s2 = inlined_call_operand.vmem [shape: f32[2,8,1], index: 2, kind: input, shape index: {}]   ;;  %s768_s3 = inlined_call_operand.vmem [shape: bf16[2,8,8], index: 3, kind: input, shape index: {}]   ;;  %s769_s4 = inlined_call_operand.vmem [shape: f32[2,8,1], index: 4, kind: input, shape index: {}]   ;;  %s770_s5 = inlined_call_operand.vmem [shape: f32[2,8,384], index: 5, kind: output, shape index: {}]  }
   0x1 LB: > { %s626_s19 = sadd.s32 4294967295, %s686_s18   ;;  %p630_p0 = scmp.ge.s32.totalorder %s686_s18, 1  ;;  %s686_s18 = sphi %s721_s18, %s15_s18  }
   0x2   : > { %p223_p1 = scmp.lt.s32.totalorder %s686_s18, 3 }
   0x4   : > { %p224_p2 = pnand %p630_p0, %p223_p1 }
   0x5   : > { %p267_p3 = scmp.lt.s32.totalorder (!%p224_p2), %s626_s19, 1  ;;  %v688_v0 = vmov (!%p224_p2), 0.0   ;;  %vm689_vm0 = vmmov (!%p224_p2), 0   ;;  %v690_v1 = vmov (!%p224_p2), 0   ;;  %vm321_vm1 = vcmask (!%p224_p2), 130048  }
   0x6   : > { %227 = sbr.rel (%p224_p2) target bundleno = 462 (0x1ce), region = 40  ;;  %651 = vmatprep.subr.bf16.mxu1 (!%p224_p2), %v688_v0  ;;  %653 = vmatprep.mubr.msk.bf16.mxu1 (!%p224_p2), %vm689_vm0, %v688_v0  ;;  %vm429_vm5 = vcmask (!%p224_p2), 1043456   ;;  %vm425_vm6 = vcmask (!%p224_p2), 64512  }
   0x7   : > { %357 = vmatprep.mubr.bf16.mxu0 (!%p224_p2), %v690_v1  ;;  %675 = vset.pattern.permute.xlu0 (!%p224_p2), %v690_v1 }
   0xd   : > { %s772_s19 = smov (!%p267_p3, %s626_s19), 1 }
   0xe   : > { %s663_s20 = smul.u32 24, %s772_s19  ;;  %s632_s21 = sshll.u32 %s772_s19, 2 }
   0xf   : > { %s633_s25 = sshll.u32 %s772_s19, 3  ;;  %s275_s28 = scalar_lea.vmem %s766_s1, %s632_s21 }
  0x10   : > { %s271_s24 = scalar_lea.vmem %s765_s0, %s663_s20  ;;  %s279_s6 = scalar_lea.vmem %s767_s2, %s633_s25  ;;  %v294_v6 = vld [vmem:[%s275_s28] sm:$0xf] }
  0x11   : > { %v676_v2 = vld [vmem:[%s271_s24 + $0x4] ss:$12 sps:$4 sm:$0xff]   ;;  %v678_v3 = vld [vmem:[%s271_s24 + $0x8] ss:$12 sps:$4 sm:$0xff]   ;;  %s287_s9 = scalar_lea.vmem %s769_s4, %s633_s25  ;;  %v679_v4 = vld [vmem:[%s271_s24] ss:$12 sps:$4 sm:$0xff]   ;;  %s283_s12 = scalar_lea.vmem %s768_s3, %s632_s21 }
  0x12   : > { %325 = vmatprep.subr.bf16.mxu0 %v676_v2  ;;  %v299_v5 = vld [vmem:[%s279_s6] sm:$0xff]  ;;  %652 = vmatpush3.bf16.msra.mxu1 %v678_v3  ;;  %s292_s15 = scalar_lea.vmem %s770_s5, %s663_s20 }
  0x13   : > { %302 = vperm.xlu0 %675, %v299_v5   ;;  %326 = vmatpush1.bf16.msra.mxu0 %v679_v4  ;;  %v419_v7 = vld [vmem:[%s287_s9] sm:$0xff] }
  0x14   : > { %657 = vmatprep.subr.bf16.mxu1 %v688_v0  ;;  %v415_v31 = vld [vmem:[%s283_s12] sm:$0xf] }
  0x15   : > { %654 = vmatmul.mubr.msk.bf16.vlgmr.msra.gmra.mrb[0].mxu1 %vm321_vm1, %v294_v6 }
  0x16   : > { %640 = vmatmul.mubr.msk.bf16.vlgmr.msra.gmra.mrb[0].mxu0 %vm321_vm1, %v294_v6  ;;  %659 = vmatprep.mubr.msk.bf16.mxu1 %vm689_vm0, %v688_v0 }
  0x17   : > { %422 = vperm.xlu0 %675, %v419_v7   ;;  %471 = vmatprep.mubr.bf16.mxu0 %v690_v1 }
  0x92   : > { %v303_v8 = vpop.permute.xlu0 %302 }
  0x96   : > { %v423_v32 = vpop.permute.xlu0 %422 }
  0xe8   : > { %v400_v9 = vpop.f32.mrb[0].mxu1 }
  0xe9   : > { %v401_v10 = vadd.f32 %v400_v9, %v303_v8  ;;  %v359_v11 = vpop.f32.mrb[0].mxu0  ;;  %v655_v12 = vpop.f32.mrb[1].mxu1 }
  0xea   : > { %v360_v13 = vadd.f32 %v359_v11, %v303_v8  ;;  %v361_v14 = vpop.f32.mrb[1].mxu0  ;;  %v403_v15 = vpop.f32.mrb[2].mxu1 }
  0xeb   : > { %vm408_vm2 = vcmp.ge.f32.partialorder %v401_v10, 0.0  ;;  %v411_v16 = vmul.f32 0.1, %v401_v10  ;;  %v362_v17 = vadd.f32 %v361_v14, %v303_v8  ;;  %v363_v18 = vpop.f32.mrb[2].mxu0  ;;  %v656_v19 = vpop.f32.mrb[3].mxu1 }
  0xec   : > { %vm406_vm3 = vcmp.ge.f32.partialorder %v360_v13, 0.0  ;;  %v409_v20 = vmul.f32 0.1, %v360_v13  ;;  %v364_v21 = vpop.f32.mrb[3].mxu0 }
  0xed   : > { %v414_v22 = vsel %vm408_vm2, %v401_v10, %v411_v16  ;;  %vm407_vm4 = vcmp.ge.f32.partialorder %v362_v17, 0.0  ;;  %v410_v23 = vmul.f32 0.1, %v362_v17 }
  0xee   : > { %v418_v24 = vpack.c.bf16 %v414_v22, %v414_v22  ;;  %v412_v25 = vsel %vm406_vm3, %v360_v13, %v409_v20 }
  0xef   : > { %v416_v26 = vpack.c.bf16 %v412_v25, %v412_v25  ;;  %v413_v27 = vsel %vm407_vm4, %v362_v17, %v410_v23 }
  0xf0   : > { %v417_v28 = vpack.c.bf16 %v413_v27, %v413_v27  ;;  %v437_v29 = vsel %vm429_vm5, %v418_v24, 0 }
  0xf1   : > { %658 = vmatpush3.bf16.msra.mxu1 %v437_v29  ;;  %v431_v30 = vsel %vm429_vm5, %v416_v26, 0 }
  0xf2   : > { %642 = vmatprep.subr.msk.bf16.mxu0 %vm429_vm5, %v417_v28 }
  0xf3   : > { %440 = vmatpush1.bf16.msra.mxu0 %v431_v30 }
  0xf4   : > { %660 = vmatmul.mubr.msk.bf16.vlgmr.msra.gmra.mrb[4].mxu1 %vm425_vm6, %v415_v31 }
  0xf6   : > { %643 = vmatmul.mubr.msk.bf16.vlgmr.msra.gmra.mrb[4].mxu0 %vm425_vm6, %v415_v31 }
 0x1c7   : > { %v514_v33 = vpop.f32.mrb[4].mxu1 }
 0x1c8   : > { %v515_v34 = vadd.f32 %v514_v33, %v423_v32  ;;  %v661_v35 = vpop.f32.mrb[5].mxu1 }
 0x1c9   : > { %v473_v36 = vpop.f32.mrb[4].mxu0  ;;  %v517_v37 = vpop.f32.mrb[6].mxu1 }
 0x1ca   : > { %522 = vst [vmem:[%s292_s15 + $0x10] sm:$0xff] %v515_v34  ;;  %v474_v38 = vadd.f32 %v473_v36, %v423_v32  ;;  %v475_v39 = vpop.f32.mrb[5].mxu0  ;;  %v662_v40 = vpop.f32.mrb[7].mxu1 }
 0x1cb   : > { %v476_v41 = vadd.f32 %v475_v39, %v423_v32  ;;  %v477_v42 = vpop.f32.mrb[6].mxu0 }
 0x1cc   : > { %520 = vst [vmem:[%s292_s15] sm:$0xff] %v474_v38  ;;  %v478_v43 = vpop.f32.mrb[7].mxu0 }
 0x1cd   : > { %521 = vst [vmem:[%s292_s15 + $0x8] sm:$0xff] %v476_v41 }
 0x1ce PF: > { %s15_s18 = sadd.s32 1, %s686_s18  }
 0x1cf   : > { %p12_p4 = scmp.ge.s32.totalorder %s15_s18, 4  }
 0x1d1   :  { %14 = sbr.rel (!%p12_p4) target bundleno = 1 (0x1), region = 82 }

// kernel: reverse.12
= control target key start
LH: loop header
LB: loop body
LE: loop exit
PB: predicated region body
PF: predicated region fallthrough
CT: control target
= control target key end

     0   :  { %v103_v3 = vlaneseq  ;;  %v96_v18 = vld [vmem:[#allocation0 + $0x7] ss:$-1 sm:$0xff]  ;;  %v110_v19 = vld [vmem:[#allocation0 + $0x17] ss:$-1 sm:$0xff]  ;;  %s604_s0 = inlined_call_operand.vmem [shape: f32[8,2,16,7], index: 0, kind: input, shape index: {}]   ;;  %s605_s1 = inlined_call_operand.vmem [shape: f32[8,2,16,7], index: 1, kind: output, shape index: {}]  }
   0x1   :  { %v60_v0 = vld [vmem:[%s604_s0] sm:$0xff]  ;;  %v62_v1 = vld [vmem:[%s604_s0 + $0x8] sm:$0xff]  ;;  %v64_v2 = vld [vmem:[%s604_s0 + $0x10] sm:$0xff]  ;;  %v97_v20 = vrot.slane %v96_v18, 1  ;;  %v111_v21 = vrot.slane %v110_v19, 1 }
   0x2   :  { %61 = vst [vmem:[#allocation0 + $0x8] sm:$0xff] %v60_v0  ;;  %63 = vst [vmem:[#allocation0 + $0x18] sm:$0xff] %v62_v1  ;;  %v66_v4 = vld [vmem:[%s604_s0 + $0x18] sm:$0xff]  ;;  %v68_v5 = vld [vmem:[%s604_s0 + $0x20] sm:$0xff]  ;;  %v500_v10 = vshrl.u32 %v103_v3, 7 }
   0x3   :  { %65 = vst [vmem:[#allocation0 + $0x28] sm:$0xff] %v64_v2  ;;  %v70_v6 = vld [vmem:[%s604_s0 + $0x28] sm:$0xff]  ;;  %67 = vst [vmem:[#allocation0 + $0x38] sm:$0xff] %v66_v4  ;;  %v72_v7 = vld [vmem:[%s604_s0 + $0x30] sm:$0xff] }
   0x4   :  { %69 = vst [vmem:[#allocation0 + $0x48] sm:$0xff] %v68_v5  ;;  %71 = vst [vmem:[#allocation0 + $0x58] sm:$0xff] %v70_v6  ;;  %v74_v8 = vld [vmem:[%s604_s0 + $0x38] sm:$0xff]  ;;  %v76_v9 = vld [vmem:[%s604_s0 + $0x40] sm:$0xff]  ;;  %vm105_vm0 = vcmp.lt.s32.totalorder %v500_v10, 7 }
   0x5   :  { %73 = vst [vmem:[#allocation0 + $0x68] sm:$0xff] %v72_v7  ;;  %75 = vst [vmem:[#allocation0 + $0x78] sm:$0xff] %v74_v8  ;;  %v78_v11 = vld [vmem:[%s604_s0 + $0x48] sm:$0xff]  ;;  %v80_v12 = vld [vmem:[%s604_s0 + $0x50] sm:$0xff] }
   0x6   :  { %77 = vst [vmem:[#allocation0 + $0x88] sm:$0xff] %v76_v9  ;;  %v82_v13 = vld [vmem:[%s604_s0 + $0x58] sm:$0xff]  ;;  %79 = vst [vmem:[#allocation0 + $0x98] sm:$0xff] %v78_v11  ;;  %v84_v14 = vld [vmem:[%s604_s0 + $0x60] sm:$0xff] }
   0x7   :  { %81 = vst [vmem:[#allocation0 + $0xa8] sm:$0xff] %v80_v12  ;;  %83 = vst [vmem:[#allocation0 + $0xb8] sm:$0xff] %v82_v13  ;;  %v86_v15 = vld [vmem:[%s604_s0 + $0x68] sm:$0xff]  ;;  %v88_v16 = vld [vmem:[%s604_s0 + $0x70] sm:$0xff] }
   0x8   :  { %85 = vst [vmem:[#allocation0 + $0xc8] sm:$0xff] %v84_v14  ;;  %87 = vst [vmem:[#allocation0 + $0xd8] sm:$0xff] %v86_v15  ;;  %v90_v17 = vld [vmem:[%s604_s0 + $0x78] sm:$0xff]  ;;  %v124_v22 = vld [vmem:[#allocation0 + $0x27] ss:$-1 sm:$0xff] }
   0x9   :  { %89 = vst [vmem:[#allocation0 + $0xe8] sm:$0xff] %v88_v16  ;;  %91 = vst [vmem:[#allocation0 + $0xf8] sm:$0xff] %v90_v17  ;;  %v138_v23 = vld [vmem:[#allocation0 + $0x37] ss:$-1 sm:$0xff]  ;;  %v125_v24 = vrot.slane %v124_v22, 1 }
   0xa   :  { %v139_v25 = vrot.slane %v138_v23, 1  ;;  %v152_v26 = vld [vmem:[#allocation0 + $0x47] ss:$-1 sm:$0xff]  ;;  %v166_v27 = vld [vmem:[#allocation0 + $0x57] ss:$-1 sm:$0xff]  ;;  %98 = vst [vmem:[#allocation1] sm:$0xff] %v97_v20 }
   0xb   :  { %v101_v28 = vld [vmem:[#allocation0 + $0xf] ss:$-1 sm:$0xff]  ;;  %112 = vst [vmem:[#allocation1 + $0x8] sm:$0xff] %v111_v21  ;;  %v115_v29 = vld [vmem:[#allocation0 + $0x1f] ss:$-1 sm:$0xff]  ;;  %126 = vst [vmem:[#allocation1 + $0x10] sm:$0xff] %v125_v24 }
   0xc   :  { %v129_v30 = vld [vmem:[#allocation0 + $0x2f] ss:$-1 sm:$0xff]  ;;  %v102_v31 = vrot.slane %v101_v28, 1  ;;  %v116_v32 = vrot.slane %v115_v29, 1  ;;  %140 = vst [vmem:[#allocation1 + $0x18] sm:$0xff] %v139_v25  ;;  %v153_v35 = vrot.slane %v152_v26, 1 }
   0xd   :  { %v130_v33 = vrot.slane %v129_v30, 1  ;;  %v143_v34 = vld [vmem:[#allocation0 + $0x3f] ss:$-1 sm:$0xff]  ;;  %v157_v37 = vld [vmem:[#allocation0 + $0x4f] ss:$-1 sm:$0xff]  ;;  %v167_v38 = vrot.slane %v166_v27, 1 }
   0xe   :  { %v144_v36 = vrot.slane %v143_v34, 1  ;;  %v171_v39 = vld [vmem:[#allocation0 + $0x5f] ss:$-1 sm:$0xff]  ;;  %106 = vst.msk [vmem:[#allocation1] sm:$0xff] %vm105_vm0, %v102_v31  ;;  %120 = vst.msk [vmem:[#allocation1 + $0x8] sm:$0xff] %vm105_vm0, %v116_v32  ;;  %v158_v40 = vrot.slane %v157_v37, 1 }
   0xf   :  { %134 = vst.msk [vmem:[#allocation1 + $0x10] sm:$0xff] %vm105_vm0, %v130_v33  ;;  %154 = vst [vmem:[#allocation1 + $0x20] sm:$0xff] %v153_v35  ;;  %v172_v41 = vrot.slane %v171_v39, 1  ;;  %v180_v42 = vld [vmem:[#allocation0 + $0x67] ss:$-1 sm:$0xff] }
  0x10   :  { %v185_v43 = vld [vmem:[#allocation0 + $0x6f] ss:$-1 sm:$0xff]  ;;  %148 = vst.msk [vmem:[#allocation1 + $0x18] sm:$0xff] %vm105_vm0, %v144_v36  ;;  %168 = vst [vmem:[#allocation1 + $0x28] sm:$0xff] %v167_v38  ;;  %v181_v44 = vrot.slane %v180_v42, 1 }
  0x11   :  { %v186_v45 = vrot.slane %v185_v43, 1  ;;  %v194_v46 = vld [vmem:[#allocation0 + $0x77] ss:$-1 sm:$0xff]  ;;  %v199_v47 = vld [vmem:[#allocation0 + $0x7f] ss:$-1 sm:$0xff]  ;;  %162 = vst.msk [vmem:[#allocation1 + $0x20] sm:$0xff] %vm105_vm0, %v158_v40 }
  0x12   :  { %176 = vst.msk [vmem:[#allocation1 + $0x28] sm:$0xff] %vm105_vm0, %v172_v41  ;;  %v195_v48 = vrot.slane %v194_v46, 1  ;;  %v200_v49 = vrot.slane %v199_v47, 1  ;;  %v208_v50 = vld [vmem:[#allocation0 + $0x87] ss:$-1 sm:$0xff]  ;;  %182 = vst [vmem:[#allocation1 + $0x30] sm:$0xff] %v181_v44 }
  0x13   :  { %v213_v51 = vld [vmem:[#allocation0 + $0x8f] ss:$-1 sm:$0xff]  ;;  %v209_v52 = vrot.slane %v208_v50, 1  ;;  %v222_v54 = vld [vmem:[#allocation0 + $0x97] ss:$-1 sm:$0xff]  ;;  %190 = vst.msk [vmem:[#allocation1 + $0x30] sm:$0xff] %vm105_vm0, %v186_v45 }
  0x14   :  { %v214_v53 = vrot.slane %v213_v51, 1  ;;  %v227_v55 = vld [vmem:[#allocation0 + $0x9f] ss:$-1 sm:$0xff]  ;;  %196 = vst [vmem:[#allocation1 + $0x38] sm:$0xff] %v195_v48  ;;  %v223_v56 = vrot.slane %v222_v54, 1 }
  0x15   :  { %v228_v57 = vrot.slane %v227_v55, 1  ;;  %v236_v58 = vld [vmem:[#allocation0 + $0xa7] ss:$-1 sm:$0xff]  ;;  %v241_v59 = vld [vmem:[#allocation0 + $0xaf] ss:$-1 sm:$0xff]  ;;  %204 = vst.msk [vmem:[#allocation1 + $0x38] sm:$0xff] %vm105_vm0, %v200_v49 }
  0x16   :  { %210 = vst [vmem:[#allocation1 + $0x40] sm:$0xff] %v209_v52  ;;  %v237_v60 = vrot.slane %v236_v58, 1  ;;  %v242_v61 = vrot.slane %v241_v59, 1  ;;  %v250_v62 = vld [vmem:[#allocation0 + $0xb7] ss:$-1 sm:$0xff]  ;;  %224 = vst [vmem:[#allocation1 + $0x48] sm:$0xff] %v223_v56 }
  0x17   :  { %v255_v63 = vld [vmem:[#allocation0 + $0xbf] ss:$-1 sm:$0xff]  ;;  %218 = vst.msk [vmem:[#allocation1 + $0x40] sm:$0xff] %vm105_vm0, %v214_v53  ;;  %v251_v0 = vrot.slane %v250_v62, 1  ;;  %v264_v2 = vld [vmem:[#allocation0 + $0xc7] ss:$-1 sm:$0xff] }
  0x18   :  { %v256_v1 = vrot.slane %v255_v63, 1  ;;  %v269_v3 = vld [vmem:[#allocation0 + $0xcf] ss:$-1 sm:$0xff]  ;;  %232 = vst.msk [vmem:[#allocation1 + $0x48] sm:$0xff] %vm105_vm0, %v228_v57  ;;  %238 = vst [vmem:[#allocation1 + $0x50] sm:$0xff] %v237_v60  ;;  %v265_v4 = vrot.slane %v264_v2, 1 }
  0x19   :  { %v270_v5 = vrot.slane %v269_v3, 1  ;;  %v278_v6 = vld [vmem:[#allocation0 + $0xd7] ss:$-1 sm:$0xff]  ;;  %v283_v7 = vld [vmem:[#allocation0 + $0xdf] ss:$-1 sm:$0xff]  ;;  %246 = vst.msk [vmem:[#allocation1 + $0x50] sm:$0xff] %vm105_vm0, %v242_v61 }
  0x1a   :  { %252 = vst [vmem:[#allocation1 + $0x58] sm:$0xff] %v251_v0  ;;  %v279_v8 = vrot.slane %v278_v6, 1  ;;  %v284_v9 = vrot.slane %v283_v7, 1  ;;  %v292_v11 = vld [vmem:[#allocation0 + $0xe7] ss:$-1 sm:$0xff]  ;;  %266 = vst [vmem:[#allocation1 + $0x60] sm:$0xff] %v265_v4 }
  0x1b   :  { %v297_v12 = vld [vmem:[#allocation0 + $0xef] ss:$-1 sm:$0xff]  ;;  %260 = vst.msk [vmem:[#allocation1 + $0x58] sm:$0xff] %vm105_vm0, %v256_v1  ;;  %v293_v13 = vrot.slane %v292_v11, 1  ;;  %v306_v15 = vld [vmem:[#allocation0 + $0xf7] ss:$-1 sm:$0xff] }
  0x1c   :  { %v298_v14 = vrot.slane %v297_v12, 1  ;;  %v311_v16 = vld [vmem:[#allocation0 + $0xff] ss:$-1 sm:$0xff]  ;;  %274 = vst.msk [vmem:[#allocation1 + $0x60] sm:$0xff] %vm105_vm0, %v270_v5  ;;  %280 = vst [vmem:[#allocation1 + $0x68] sm:$0xff] %v279_v8  ;;  %v307_v17 = vrot.slane %v306_v15, 1 }
  0x1d   :  { %v312_v18 = vrot.slane %v311_v16, 1  ;;  %v374_v19 = vld [vmem:[#allocation1] sm:$0xff]  ;;  %v376_v20 = vld [vmem:[#allocation1 + $0x8] sm:$0xff]  ;;  %v378_v21 = vld [vmem:[#allocation1 + $0x10] sm:$0xff]  ;;  %288 = vst.msk [vmem:[#allocation1 + $0x68] sm:$0xff] %vm105_vm0, %v284_v9 }
  0x1e   :  { %294 = vst [vmem:[#allocation1 + $0x70] sm:$0xff] %v293_v13  ;;  %375 = vst [vmem:[%s605_s1] sm:$0xff] %v374_v19  ;;  %v380_v22 = vld [vmem:[#allocation1 + $0x18] sm:$0xff]  ;;  %v382_v23 = vld [vmem:[#allocation1 + $0x20] sm:$0xff] }
  0x1f   :  { %377 = vst [vmem:[%s605_s1 + $0x8] sm:$0xff] %v376_v20  ;;  %379 = vst [vmem:[%s605_s1 + $0x10] sm:$0xff] %v378_v21  ;;  %v384_v24 = vld [vmem:[#allocation1 + $0x28] sm:$0xff]  ;;  %v386_v25 = vld [vmem:[#allocation1 + $0x30] sm:$0xff] }
  0x20   :  { %302 = vst.msk [vmem:[#allocation1 + $0x70] sm:$0xff] %vm105_vm0, %v298_v14  ;;  %308 = vst [vmem:[#allocation1 + $0x78] sm:$0xff] %v307_v17  ;;  %v388_v26 = vld [vmem:[#allocation1 + $0x38] sm:$0xff]  ;;  %v390_v10 = vld [vmem:[#allocation1 + $0x40] sm:$0xff] }
  0x21   :  { %381 = vst [vmem:[%s605_s1 + $0x18] sm:$0xff] %v380_v22  ;;  %383 = vst [vmem:[%s605_s1 + $0x20] sm:$0xff] %v382_v23  ;;  %v392_v27 = vld [vmem:[#allocation1 + $0x48] sm:$0xff]  ;;  %v394_v28 = vld [vmem:[#allocation1 + $0x50] sm:$0xff] }
  0x22   :  { %385 = vst [vmem:[%s605_s1 + $0x28] sm:$0xff] %v384_v24  ;;  %316 = vst.msk [vmem:[#allocation1 + $0x78] sm:$0xff] %vm105_vm0, %v312_v18  ;;  %v396_v29 = vld [vmem:[#allocation1 + $0x58] sm:$0xff] }
  0x23   :  { %387 = vst [vmem:[%s605_s1 + $0x30] sm:$0xff] %v386_v25  ;;  %389 = vst [vmem:[%s605_s1 + $0x38] sm:$0xff] %v388_v26  ;;  %v398_v30 = vld [vmem:[#allocation1 + $0x60] sm:$0xff] }
  0x24   :  { %391 = vst [vmem:[%s605_s1 + $0x40] sm:$0xff] %v390_v10  ;;  %393 = vst [vmem:[%s605_s1 + $0x48] sm:$0xff] %v392_v27  ;;  %v400_v31 = vld [vmem:[#allocation1 + $0x68] sm:$0xff] }
  0x25   :  { %395 = vst [vmem:[%s605_s1 + $0x50] sm:$0xff] %v394_v28  ;;  %397 = vst [vmem:[%s605_s1 + $0x58] sm:$0xff] %v396_v29 }
  0x26   :  { %399 = vst [vmem:[%s605_s1 + $0x60] sm:$0xff] %v398_v30  ;;  %401 = vst [vmem:[%s605_s1 + $0x68] sm:$0xff] %v400_v31 }
  0x27   :  { %v402_v32 = vld [vmem:[#allocation1 + $0x70] sm:$0xff] }
  0x28   :  { %403 = vst [vmem:[%s605_s1 + $0x70] sm:$0xff] %v402_v32 }
  0x29   :  { %v404_v33 = vld [vmem:[#allocation1 + $0x78] sm:$0xff] }
  0x2a   :  { %405 = vst [vmem:[%s605_s1 + $0x78] sm:$0xff] %v404_v33 }

// kernel: closed_call.199
= control target key start
LH: loop header
LB: loop body
LE: loop exit
PB: predicated region body
PF: predicated region fallthrough
CT: control target
= control target key end

     0   :  { %v378_v1 = vmov 0   ;;  %vm146_vm0 = vcmask 1043456   ;;  %vm142_vm1 = vcmask 588800   ;;  %s474_s0 = inlined_call_operand.vmem [shape: bf16[72,512], index: 0, kind: input, shape index: {}]   ;;  %s475_s2 = inlined_call_operand.vmem [shape: f32[16,1], index: 2, kind: input, shape index: {}]   ;;  %s476_s1 = inlined_call_operand.vmem [shape: bf16[16,72], index: 1, kind: input, shape index: {}]   ;;  %s477_s3 = inlined_call_operand.vmem [shape: bf16[16,512], index: 3, kind: output, shape index: {}]  }
   0x1   :  { %v349_v0 = vld [vmem:[%s474_s0 + $0x4] ss:$16 sps:$4 sm:$0xff]   ;;  %191 = vmatprep.mubr.bf16.mxu0 %v378_v1  ;;  %234 = vmatprep.mubr.bf16.mxu1 %v378_v1  ;;  %v351_v2 = vld [vmem:[%s474_s0 + $0xc] ss:$16 sps:$4 sm:$0xff]   ;;  %v353_v3 = vld [vmem:[%s474_s0] ss:$16 sps:$4 sm:$0xff]  }
   0x2   :  { %348 = vset.pattern.permute.xlu0 %v378_v1  ;;  %159 = vmatprep.subr.bf16.mxu0 %v349_v0  ;;  %v354_v4 = vld [vmem:[%s474_s0 + $0x8] ss:$16 sps:$4 sm:$0xff]   ;;  %v355_v5 = vld [vmem:[%s474_s0 + $0x24] ss:$16 sps:$4 sm:$0xff]   ;;  %v357_v6 = vld [vmem:[%s474_s0 + $0x2c] ss:$16 sps:$4 sm:$0xff]  }
   0x3   :  { %202 = vmatprep.subr.bf16.mxu1 %v351_v2  ;;  %160 = vmatpush1.bf16.msra.mxu0 %v353_v3  ;;  %v359_v7 = vld [vmem:[%s474_s0 + $0x20] ss:$16 sps:$4 sm:$0xff]   ;;  %v360_v8 = vld [vmem:[%s474_s0 + $0x28] ss:$16 sps:$4 sm:$0xff]   ;;  %v361_v9 = vld [vmem:[%s474_s0 + $0x44] ss:$16 sps:$4 sm:$0xff]  }
   0x4   :  { %203 = vmatpush1.bf16.msra.mxu1 %v354_v4  ;;  %161 = vmatprep.subr.bf16.mxu0 %v355_v5  ;;  %v363_v10 = vld [vmem:[%s474_s0 + $0x4c] ss:$16 sps:$4 sm:$0xff]   ;;  %v365_v11 = vld [vmem:[%s474_s0 + $0x40] ss:$16 sps:$4 sm:$0xff]   ;;  %v366_v12 = vld [vmem:[%s474_s0 + $0x48] ss:$16 sps:$4 sm:$0xff]  }
   0x5   :  { %204 = vmatprep.subr.bf16.mxu1 %v357_v6  ;;  %v367_v13 = vld [vmem:[%s474_s0 + $0x64] ss:$16 sps:$4 sm:$0xff]   ;;  %v369_v14 = vld [vmem:[%s474_s0 + $0x6c] ss:$16 sps:$4 sm:$0xff]   ;;  %v371_v17 = vld [vmem:[%s474_s0 + $0x60] ss:$16 sps:$4 sm:$0xff]  }
   0x6   :  { %v33_v15 = vld [vmem:[%s474_s0 + $0x80] sm:$0xff]  ;;  %v34_v16 = vld [vmem:[%s474_s0 + $0x88] sm:$0xff] }
   0x7   :  { %162 = vmatpush1.bf16.msra.mxu0 %v359_v7  ;;  %v372_v18 = vld [vmem:[%s474_s0 + $0x68] ss:$16 sps:$4 sm:$0xff]   ;;  %v332_v19 = vcombine.high %v33_v15, %v33_v15  ;;  %v35_v20 = vld [vmem:[%s475_s2] sm:$0xff]  ;;  %v334_v21 = vcombine.high %v34_v16, %v34_v16  ;;  %v331_v22 = vcombine.low %v33_v15, %v33_v15  ;;  %v333_v23 = vcombine.low %v34_v16, %v34_v16 }
   0x8   :  { %205 = vmatpush1.bf16.msra.mxu1 %v360_v8  ;;  %163 = vmatprep.subr.bf16.mxu0 %v361_v9  ;;  %v36_v24 = vld [vmem:[%s475_s2 + $0x8] sm:$0xff]  ;;  %v377_v27 = vld [vmem:[%s476_s1] sm:$0xff]  }
   0x9   :  { %206 = vmatprep.subr.bf16.mxu1 %v363_v10  ;;  %39 = vperm.xlu0 %348, %v35_v20   ;;  %v148_v25 = vsel %vm146_vm0, %v331_v22, 0  ;;  %v154_v26 = vsel %vm146_vm0, %v333_v23, 0 }
   0xb   :  { %164 = vmatpush1.bf16.msra.mxu0 %v365_v11 }
   0xc   :  { %207 = vmatpush1.bf16.msra.mxu1 %v366_v12  ;;  %165 = vmatprep.subr.bf16.mxu0 %v367_v13 }
   0xd   :  { %208 = vmatprep.subr.bf16.mxu1 %v369_v14  ;;  %44 = vperm.xlu0 %348, %v36_v24  }
   0xf   :  { %166 = vmatpush1.bf16.msra.mxu0 %v371_v17 }
  0x10   :  { %209 = vmatpush1.bf16.msra.mxu1 %v372_v18  ;;  %335 = vmatprep.subr.msk.bf16.mxu0 %vm146_vm0, %v332_v19 }
  0x11   :  { %337 = vmatprep.subr.msk.bf16.mxu1 %vm146_vm0, %v334_v21 }
  0x13   :  { %168 = vmatpush1.bf16.msra.mxu0 %v148_v25 }
  0x14   :  { %211 = vmatpush1.bf16.msra.mxu1 %v154_v26 }
  0x16   :  { %336 = vmatmul.mubr.msk.bf16.vlgmr.msra.gmra.mrb[0].mxu0 %vm142_vm1, %v377_v27 }
  0x17   :  { %338 = vmatmul.mubr.msk.bf16.vlgmr.msra.gmra.mrb[0].mxu1 %vm142_vm1, %v377_v27 }
  0x88   :  { %v40_v28 = vpop.permute.xlu0 %39 }
  0x8c   :  { %v45_v41 = vpop.permute.xlu0 %44 }
  0xe9   :  { %v193_v29 = vpop.f32.mrb[0].mxu0 }
  0xea   :  { %v236_v30 = vpop.f32.mrb[0].mxu1  ;;  %v194_v31 = vadd.f32 %v193_v29, %v40_v28  ;;  %v195_v33 = vpop.f32.mrb[1].mxu0 }
  0xeb   :  { %v237_v32 = vadd.f32 %v236_v30, %v40_v28  ;;  %v238_v34 = vpop.f32.mrb[1].mxu1  ;;  %v196_v35 = vadd.f32 %v195_v33, %v40_v28  ;;  %v197_v37 = vpop.f32.mrb[2].mxu0 }
  0xec   :  { %v239_v36 = vadd.f32 %v238_v34, %v40_v28  ;;  %v240_v38 = vpop.f32.mrb[2].mxu1  ;;  %vm250_vm2 = vcmp.ge.f32.partialorder %v194_v31, 0.0  ;;  %v258_v39 = vmul.f32 0.1, %v194_v31  ;;  %v198_v46 = vadd.f32 %v197_v37, %v45_v41  ;;  %v199_v48 = vpop.f32.mrb[3].mxu0 }
  0xed   :  { %vm252_vm3 = vcmp.ge.f32.partialorder %v237_v32, 0.0  ;;  %v260_v40 = vmul.f32 0.1, %v237_v32  ;;  %vm251_vm4 = vcmp.ge.f32.partialorder %v196_v35, 0.0  ;;  %v259_v42 = vmul.f32 0.1, %v196_v35 }
  0xee   :  { %vm253_vm5 = vcmp.ge.f32.partialorder %v239_v36, 0.0  ;;  %v261_v43 = vmul.f32 0.1, %v239_v36  ;;  %v266_v44 = vsel %vm250_vm2, %v194_v31, %v258_v39  ;;  %v241_v47 = vadd.f32 %v240_v38, %v45_v41  ;;  %v242_v49 = vpop.f32.mrb[3].mxu1 }
  0xef   :  { %v268_v45 = vsel %vm252_vm3, %v237_v32, %v260_v40  ;;  %v267_v50 = vsel %vm251_vm4, %v196_v35, %v259_v42  ;;  %v200_v52 = vadd.f32 %v199_v48, %v45_v41  ;;  %v243_v53 = vadd.f32 %v242_v49, %v45_v41 }
  0xf0   :  { %v269_v51 = vsel %vm253_vm5, %v239_v36, %v261_v43  ;;  %v343_v54 = vpack.c.bf16 %v267_v50, %v266_v44 }
  0xf1   :  { %v344_v55 = vpack.c.bf16 %v269_v51, %v268_v45  ;;  %v345_v56 = vpack.c.bf16 %v200_v52, %v198_v46  ;;  %v346_v57 = vpack.c.bf16 %v243_v53, %v241_v47 }
  0xf2   :  { %306 = vst [vmem:[%s477_s3] sm:$0xff] %v343_v54 }
  0xf3   :  { %307 = vst [vmem:[%s477_s3 + $0x8] sm:$0xff] %v344_v55  ;;  %308 = vst [vmem:[%s477_s3 + $0x10] sm:$0xff] %v345_v56 }
  0xf4   :  { %309 = vst [vmem:[%s477_s3 + $0x18] sm:$0xff] %v346_v57 }

// kernel: closed_call.200
= control target key start
LH: loop header
LB: loop body
LE: loop exit
PB: predicated region body
PF: predicated region fallthrough
CT: control target
= control target key end

     0   :  { %v346_v1 = vmov 0   ;;  %vm137_vm0 = vcmask 1043456   ;;  %vm133_vm1 = vcmask 588800   ;;  %s444_s0 = inlined_call_operand.vmem [shape: bf16[72,512], index: 0, kind: input, shape index: {}]   ;;  %s445_s2 = inlined_call_operand.vmem [shape: f32[8,1], index: 2, kind: input, shape index: {}]   ;;  %s446_s1 = inlined_call_operand.vmem [shape: bf16[8,72], index: 1, kind: input, shape index: {}]   ;;  %s447_s3 = inlined_call_operand.vmem [shape: bf16[8,512], index: 3, kind: input, shape index: {}]   ;;  %s448_s4 = inlined_call_operand.vmem [shape: bf16[8,512], index: 4, kind: output, shape index: {}]  }
   0x1   :  { %v318_v0 = vld [vmem:[%s444_s0 + $0x4] ss:$16 sps:$4 sm:$0xff]   ;;  %182 = vmatprep.mubr.bf16.mxu0 %v346_v1  ;;  %223 = vmatprep.mubr.bf16.mxu1 %v346_v1  ;;  %v320_v2 = vld [vmem:[%s444_s0 + $0xc] ss:$16 sps:$4 sm:$0xff]   ;;  %v322_v3 = vld [vmem:[%s444_s0] ss:$16 sps:$4 sm:$0xff]  }
   0x2   :  { %317 = vset.pattern.permute.xlu0 %v346_v1  ;;  %150 = vmatprep.subr.bf16.mxu0 %v318_v0  ;;  %v323_v4 = vld [vmem:[%s444_s0 + $0x8] ss:$16 sps:$4 sm:$0xff]   ;;  %v324_v5 = vld [vmem:[%s444_s0 + $0x24] ss:$16 sps:$4 sm:$0xff]   ;;  %v326_v6 = vld [vmem:[%s444_s0 + $0x2c] ss:$16 sps:$4 sm:$0xff]  }
   0x3   :  { %191 = vmatprep.subr.bf16.mxu1 %v320_v2  ;;  %151 = vmatpush1.bf16.msra.mxu0 %v322_v3  ;;  %v328_v7 = vld [vmem:[%s444_s0 + $0x20] ss:$16 sps:$4 sm:$0xff]   ;;  %v329_v8 = vld [vmem:[%s444_s0 + $0x28] ss:$16 sps:$4 sm:$0xff]   ;;  %v330_v9 = vld [vmem:[%s444_s0 + $0x44] ss:$16 sps:$4 sm:$0xff]  }
   0x4   :  { %192 = vmatpush1.bf16.msra.mxu1 %v323_v4  ;;  %152 = vmatprep.subr.bf16.mxu0 %v324_v5  ;;  %v332_v10 = vld [vmem:[%s444_s0 + $0x4c] ss:$16 sps:$4 sm:$0xff]   ;;  %v334_v11 = vld [vmem:[%s444_s0 + $0x40] ss:$16 sps:$4 sm:$0xff]   ;;  %v335_v12 = vld [vmem:[%s444_s0 + $0x48] ss:$16 sps:$4 sm:$0xff]  }
   0x5   :  { %193 = vmatprep.subr.bf16.mxu1 %v326_v6  ;;  %v336_v13 = vld [vmem:[%s444_s0 + $0x64] ss:$16 sps:$4 sm:$0xff]   ;;  %v338_v14 = vld [vmem:[%s444_s0 + $0x6c] ss:$16 sps:$4 sm:$0xff]   ;;  %v340_v18 = vld [vmem:[%s444_s0 + $0x60] ss:$16 sps:$4 sm:$0xff]  }
   0x6   :  { %v35_v15 = vld [vmem:[%s444_s0 + $0x80] sm:$0xff]  ;;  %v36_v16 = vld [vmem:[%s444_s0 + $0x88] sm:$0xff] }
   0x7   :  { %153 = vmatpush1.bf16.msra.mxu0 %v328_v7  ;;  %v37_v17 = vld [vmem:[%s445_s2] sm:$0xff]  ;;  %v341_v19 = vld [vmem:[%s444_s0 + $0x68] ss:$16 sps:$4 sm:$0xff]   ;;  %v305_v20 = vcombine.high %v35_v15, %v35_v15  ;;  %v307_v21 = vcombine.high %v36_v16, %v36_v16  ;;  %v304_v22 = vcombine.low %v35_v15, %v35_v15  ;;  %v306_v23 = vcombine.low %v36_v16, %v36_v16 }
   0x8   :  { %194 = vmatpush1.bf16.msra.mxu1 %v329_v8  ;;  %154 = vmatprep.subr.bf16.mxu0 %v330_v9  ;;  %v18_v26 = vld [vmem:[%s446_s1] sm:$0xf]  ;;  %v245_v29 = vld [vmem:[%s447_s3 + $0x8] sm:$0xff] }
   0x9   :  { %195 = vmatprep.subr.bf16.mxu1 %v332_v10  ;;  %40 = vperm.xlu0 %317, %v37_v17   ;;  %v139_v24 = vsel %vm137_vm0, %v304_v22, 0  ;;  %v145_v25 = vsel %vm137_vm0, %v306_v23, 0  ;;  %v244_v28 = vld [vmem:[%s447_s3] sm:$0xff]  ;;  %v248_v35 = vunpack.c.l.bf16 %v245_v29  ;;  %v249_v41 = vunpack.c.h.bf16 %v245_v29 }
   0xa   :  { %v246_v33 = vunpack.c.l.bf16 %v244_v28  ;;  %v247_v39 = vunpack.c.h.bf16 %v244_v28 }
   0xb   :  { %155 = vmatpush1.bf16.msra.mxu0 %v334_v11 }
   0xc   :  { %196 = vmatpush1.bf16.msra.mxu1 %v335_v12  ;;  %156 = vmatprep.subr.bf16.mxu0 %v336_v13 }
   0xd   :  { %197 = vmatprep.subr.bf16.mxu1 %v338_v14 }
   0xf   :  { %157 = vmatpush1.bf16.msra.mxu0 %v340_v18 }
  0x10   :  { %198 = vmatpush1.bf16.msra.mxu1 %v341_v19  ;;  %308 = vmatprep.subr.msk.bf16.mxu0 %vm137_vm0, %v305_v20 }
  0x11   :  { %310 = vmatprep.subr.msk.bf16.mxu1 %vm137_vm0, %v307_v21 }
  0x13   :  { %159 = vmatpush1.bf16.msra.mxu0 %v139_v24 }
  0x14   :  { %200 = vmatpush1.bf16.msra.mxu1 %v145_v25 }
  0x16   :  { %309 = vmatmul.mubr.msk.bf16.vlgmr.msra.gmra.mrb[0].mxu0 %vm133_vm1, %v18_v26 }
  0x17   :  { %311 = vmatmul.mubr.msk.bf16.vlgmr.msra.gmra.mrb[0].mxu1 %vm133_vm1, %v18_v26 }
  0x88   :  { %v41_v27 = vpop.permute.xlu0 %40 }
  0xe9   :  { %v184_v30 = vpop.f32.mrb[0].mxu0 }
  0xea   :  { %v225_v31 = vpop.f32.mrb[0].mxu1  ;;  %v185_v32 = vadd.f32 %v184_v30, %v41_v27  ;;  %v186_v36 = vpop.f32.mrb[1].mxu0 }
  0xeb   :  { %v226_v34 = vadd.f32 %v225_v31, %v41_v27  ;;  %v227_v37 = vpop.f32.mrb[1].mxu1  ;;  %v187_v38 = vadd.f32 %v186_v36, %v41_v27  ;;  %v188_v42 = vpop.f32.mrb[2].mxu0 }
  0xec   :  { %v228_v40 = vadd.f32 %v227_v37, %v41_v27  ;;  %v229_v43 = vpop.f32.mrb[2].mxu1  ;;  %vm232_vm2 = vcmp.ge.f32.partialorder %v185_v32, 0.0  ;;  %v236_v44 = vmul.f32 0.1, %v185_v32  ;;  %v189_v50 = vpop.f32.mrb[3].mxu0 }
  0xed   :  { %vm234_vm3 = vcmp.ge.f32.partialorder %v226_v34, 0.0  ;;  %v238_v45 = vmul.f32 0.1, %v226_v34  ;;  %vm233_vm4 = vcmp.ge.f32.partialorder %v187_v38, 0.0  ;;  %v237_v46 = vmul.f32 0.1, %v187_v38 }
  0xee   :  { %vm235_vm5 = vcmp.ge.f32.partialorder %v228_v40, 0.0  ;;  %v239_v47 = vmul.f32 0.1, %v228_v40  ;;  %v240_v48 = vsel %vm232_vm2, %v185_v32, %v236_v44  ;;  %v230_v51 = vpop.f32.mrb[3].mxu1 }
  0xef   :  { %v242_v49 = vsel %vm234_vm3, %v226_v34, %v238_v45  ;;  %v250_v52 = vadd.f32 %v246_v33, %v240_v48  ;;  %v241_v54 = vsel %vm233_vm4, %v187_v38, %v237_v46 }
  0xf0   :  { %v252_v53 = vadd.f32 %v248_v35, %v242_v49  ;;  %v243_v55 = vsel %vm235_vm5, %v228_v40, %v239_v47  ;;  %v251_v56 = vadd.f32 %v247_v39, %v241_v54 }
  0xf1   :  { %v253_v57 = vadd.f32 %v249_v41, %v243_v55  ;;  %vm254_vm6 = vcmp.ge.f32.partialorder %v250_v52, 0.0  ;;  %v258_v58 = vmul.f32 0.2, %v250_v52 }
  0xf2   :  { %vm256_vm7 = vcmp.ge.f32.partialorder %v252_v53, 0.0  ;;  %v260_v59 = vmul.f32 0.2, %v252_v53  ;;  %vm255_vm8 = vcmp.ge.f32.partialorder %v251_v56, 0.0  ;;  %v259_v60 = vmul.f32 0.2, %v251_v56 }
  0xf3   :  { %vm257_vm9 = vcmp.ge.f32.partialorder %v253_v57, 0.0  ;;  %v261_v61 = vmul.f32 0.2, %v253_v57  ;;  %v262_v62 = vsel %vm254_vm6, %v250_v52, %v258_v58 }
  0xf4   :  { %v264_v63 = vsel %vm256_vm7, %v252_v53, %v260_v59  ;;  %v263_v0 = vsel %vm255_vm8, %v251_v56, %v259_v60 }
  0xf5   :  { %v265_v1 = vsel %vm257_vm9, %v253_v57, %v261_v61  ;;  %v314_v2 = vpack.c.bf16 %v263_v0, %v262_v62 }
  0xf6   :  { %v315_v3 = vpack.c.bf16 %v265_v1, %v264_v63 }
  0xf7   :  { %282 = vst [vmem:[%s448_s4] sm:$0xff] %v314_v2 }
  0xf8   :  { %283 = vst [vmem:[%s448_s4 + $0x8] sm:$0xff] %v315_v3 }

// kernel: closed_call.203
= control target key start
LH: loop header
LB: loop body
LE: loop exit
PB: predicated region body
PF: predicated region fallthrough
CT: control target
= control target key end

     0   :  { %v650_v1 = vmov 0   ;;  %vm355_vm0 = vcmask 719872   ;;  %vm359_vm1 = vcmask 1043456   ;;  %s856_s0 = inlined_call_operand.vmem [shape: bf16[216,512], index: 0, kind: input, shape index: {}]   ;;  %s857_s1 = inlined_call_operand.vmem [shape: bf16[8,216], index: 1, kind: input, shape index: {}]   ;;  %s858_s2 = inlined_call_operand.vmem [shape: f32[8,1], index: 2, kind: input, shape index: {}]   ;;  %s859_s3 = inlined_call_operand.vmem [shape: bf16[8,512], index: 3, kind: input, shape index: {}]   ;;  %s860_s4 = inlined_call_operand.vmem [shape: bf16[8,512], index: 4, kind: output, shape index: {}]  }
   0x1   :  { %v566_v0 = vld [vmem:[%s856_s0 + $0x4] ss:$16 sps:$4 sm:$0xff]   ;;  %565 = vset.pattern.permute.xlu0 %v650_v1  ;;  %v568_v2 = vld [vmem:[%s856_s0 + $0xc] ss:$16 sps:$4 sm:$0xff]   ;;  %v570_v3 = vld [vmem:[%s856_s0] ss:$16 sps:$4 sm:$0xff]  }
   0x2   :  { %372 = vmatprep.subr.bf16.mxu0 %v566_v0  ;;  %v571_v4 = vld [vmem:[%s856_s0 + $0x8] ss:$16 sps:$4 sm:$0xff]   ;;  %413 = vmatprep.subr.bf16.mxu1 %v568_v2  ;;  %v572_v5 = vld [vmem:[%s856_s0 + $0x24] ss:$16 sps:$4 sm:$0xff]   ;;  %v574_v6 = vld [vmem:[%s856_s0 + $0x2c] ss:$16 sps:$4 sm:$0xff]  }
   0x3   :  { %373 = vmatpush1.bf16.msra.mxu0 %v570_v3  ;;  %414 = vmatpush1.bf16.msra.mxu1 %v571_v4  ;;  %v576_v7 = vld [vmem:[%s856_s0 + $0x20] ss:$16 sps:$4 sm:$0xff]   ;;  %v577_v8 = vld [vmem:[%s856_s0 + $0x28] ss:$16 sps:$4 sm:$0xff]   ;;  %v578_v9 = vld [vmem:[%s856_s0 + $0x44] ss:$16 sps:$4 sm:$0xff]  }
   0x4   :  { %374 = vmatprep.subr.bf16.mxu0 %v572_v5  ;;  %415 = vmatprep.subr.bf16.mxu1 %v574_v6  ;;  %v580_v10 = vld [vmem:[%s856_s0 + $0x4c] ss:$16 sps:$4 sm:$0xff]   ;;  %v582_v11 = vld [vmem:[%s856_s0 + $0x40] ss:$16 sps:$4 sm:$0xff]   ;;  %v583_v12 = vld [vmem:[%s856_s0 + $0x48] ss:$16 sps:$4 sm:$0xff]  }
   0x5   :  { %v584_v13 = vld [vmem:[%s856_s0 + $0x64] ss:$16 sps:$4 sm:$0xff]   ;;  %v586_v14 = vld [vmem:[%s856_s0 + $0x6c] ss:$16 sps:$4 sm:$0xff]   ;;  %v588_v15 = vld [vmem:[%s856_s0 + $0x60] ss:$16 sps:$4 sm:$0xff]  }
   0x6   :  { %v589_v16 = vld [vmem:[%s856_s0 + $0x68] ss:$16 sps:$4 sm:$0xff]   ;;  %v590_v17 = vld [vmem:[%s856_s0 + $0x84] ss:$16 sps:$4 sm:$0xff]   ;;  %v592_v18 = vld [vmem:[%s856_s0 + $0x8c] ss:$16 sps:$4 sm:$0xff]  }
   0x7   :  { %375 = vmatpush1.bf16.msra.mxu0 %v576_v7  ;;  %416 = vmatpush1.bf16.msra.mxu1 %v577_v8  ;;  %v594_v19 = vld [vmem:[%s856_s0 + $0x80] ss:$16 sps:$4 sm:$0xff]   ;;  %v595_v20 = vld [vmem:[%s856_s0 + $0x88] ss:$16 sps:$4 sm:$0xff]   ;;  %v596_v21 = vld [vmem:[%s856_s0 + $0xa4] ss:$16 sps:$4 sm:$0xff]  }
   0x8   :  { %376 = vmatprep.subr.bf16.mxu0 %v578_v9  ;;  %417 = vmatprep.subr.bf16.mxu1 %v580_v10  ;;  %v598_v22 = vld [vmem:[%s856_s0 + $0xac] ss:$16 sps:$4 sm:$0xff]   ;;  %v600_v23 = vld [vmem:[%s856_s0 + $0xa0] ss:$16 sps:$4 sm:$0xff]   ;;  %v601_v24 = vld [vmem:[%s856_s0 + $0xa8] ss:$16 sps:$4 sm:$0xff]  }
   0x9   :  { %v602_v25 = vld [vmem:[%s856_s0 + $0xc4] ss:$16 sps:$4 sm:$0xff]   ;;  %v604_v26 = vld [vmem:[%s856_s0 + $0xcc] ss:$16 sps:$4 sm:$0xff]   ;;  %v606_v27 = vld [vmem:[%s856_s0 + $0xc0] ss:$16 sps:$4 sm:$0xff]  }
   0xa   :  { %v607_v28 = vld [vmem:[%s856_s0 + $0xc8] ss:$16 sps:$4 sm:$0xff]   ;;  %v608_v29 = vld [vmem:[%s856_s0 + $0xe4] ss:$16 sps:$4 sm:$0xff]   ;;  %v610_v30 = vld [vmem:[%s856_s0 + $0xec] ss:$16 sps:$4 sm:$0xff]  }
   0xb   :  { %377 = vmatpush1.bf16.msra.mxu0 %v582_v11  ;;  %418 = vmatpush1.bf16.msra.mxu1 %v583_v12  ;;  %v612_v31 = vld [vmem:[%s856_s0 + $0xe0] ss:$16 sps:$4 sm:$0xff]   ;;  %v613_v32 = vld [vmem:[%s856_s0 + $0xe8] ss:$16 sps:$4 sm:$0xff]   ;;  %v614_v33 = vld [vmem:[%s856_s0 + $0x104] ss:$16 sps:$4 sm:$0xff]  }
   0xc   :  { %378 = vmatprep.subr.bf16.mxu0 %v584_v13  ;;  %419 = vmatprep.subr.bf16.mxu1 %v586_v14  ;;  %v616_v34 = vld [vmem:[%s856_s0 + $0x10c] ss:$16 sps:$4 sm:$0xff]   ;;  %v618_v35 = vld [vmem:[%s856_s0 + $0x100] ss:$16 sps:$4 sm:$0xff]   ;;  %v619_v36 = vld [vmem:[%s856_s0 + $0x108] ss:$16 sps:$4 sm:$0xff]  }
   0xd   :  { %v620_v37 = vld [vmem:[%s856_s0 + $0x124] ss:$16 sps:$4 sm:$0xff]   ;;  %v622_v38 = vld [vmem:[%s856_s0 + $0x12c] ss:$16 sps:$4 sm:$0xff]   ;;  %v624_v41 = vld [vmem:[%s856_s0 + $0x120] ss:$16 sps:$4 sm:$0xff]  }
   0xe   :  { %v18_v39 = vld [vmem:[%s857_s1] sm:$0xff]  ;;  %v625_v42 = vld [vmem:[%s856_s0 + $0x128] ss:$16 sps:$4 sm:$0xff]   ;;  %v628_v44 = vld [vmem:[%s856_s0 + $0x14c] ss:$16 sps:$4 sm:$0xff]  }
   0xf   :  { %379 = vmatpush1.bf16.msra.mxu0 %v588_v15  ;;  %420 = vmatpush1.bf16.msra.mxu1 %v589_v16  ;;  %v73_v40 = vld [vmem:[%s858_s2] sm:$0xff]  ;;  %v499_v45 = vcombine.high %v18_v39, %v18_v39  ;;  %v631_v47 = vld [vmem:[%s856_s0 + $0x148] ss:$16 sps:$4 sm:$0xff]   ;;  %v634_v49 = vld [vmem:[%s856_s0 + $0x16c] ss:$16 sps:$4 sm:$0xff]   ;;  %v498_v0 = vcombine.low %v18_v39, %v18_v39 }
  0x10   :  { %380 = vmatprep.subr.bf16.mxu0 %v590_v17  ;;  %421 = vmatprep.subr.bf16.mxu1 %v592_v18  ;;  %v626_v43 = vld [vmem:[%s856_s0 + $0x144] ss:$16 sps:$4 sm:$0xff]   ;;  %v630_v46 = vld [vmem:[%s856_s0 + $0x140] ss:$16 sps:$4 sm:$0xff]   ;;  %v637_v51 = vld [vmem:[%s856_s0 + $0x168] ss:$16 sps:$4 sm:$0xff]  }
  0x11   :  { %76 = vperm.xlu0 %565, %v73_v40   ;;  %557 = vmatprep.mubr.msk.bf16.mxu0 %vm355_vm0, %v499_v45  ;;  %v632_v48 = vld [vmem:[%s856_s0 + $0x164] ss:$16 sps:$4 sm:$0xff]   ;;  %v636_v50 = vld [vmem:[%s856_s0 + $0x160] ss:$16 sps:$4 sm:$0xff]   ;;  %v640_v53 = vld [vmem:[%s856_s0 + $0x18c] ss:$16 sps:$4 sm:$0xff]  }
  0x12   :  { %559 = vmatprep.mubr.msk.bf16.mxu1 %vm355_vm0, %v499_v45  ;;  %v638_v52 = vld [vmem:[%s856_s0 + $0x184] ss:$16 sps:$4 sm:$0xff]   ;;  %v72_v55 = vld [vmem:[%s856_s0 + $0x1a8] sm:$0xff]  ;;  %v642_v56 = vld [vmem:[%s856_s0 + $0x180] ss:$16 sps:$4 sm:$0xff]  }
  0x13   :  { %381 = vmatpush1.bf16.msra.mxu0 %v594_v19  ;;  %422 = vmatpush1.bf16.msra.mxu1 %v595_v20  ;;  %v71_v54 = vld [vmem:[%s856_s0 + $0x1a0] sm:$0xff]  ;;  %v643_v57 = vld [vmem:[%s856_s0 + $0x188] ss:$16 sps:$4 sm:$0xff]   ;;  %v555_v59 = vcombine.high %v72_v55, %v72_v55  ;;  %v554_v61 = vcombine.low %v72_v55, %v72_v55 }
  0x14   :  { %382 = vmatprep.subr.bf16.mxu0 %v596_v21  ;;  %423 = vmatprep.subr.bf16.mxu1 %v598_v22  ;;  %v553_v58 = vcombine.high %v71_v54, %v71_v54  ;;  %v552_v60 = vcombine.low %v71_v54, %v71_v54  ;;  %v466_v2 = vld [vmem:[%s859_s3] sm:$0xff]  ;;  %v467_v3 = vld [vmem:[%s859_s3 + $0x8] sm:$0xff] }
  0x15   :  { %v367_v63 = vsel %vm359_vm1, %v554_v61, 0  ;;  %v468_v7 = vunpack.c.l.bf16 %v466_v2  ;;  %v470_v9 = vunpack.c.l.bf16 %v467_v3  ;;  %v469_v13 = vunpack.c.h.bf16 %v466_v2 }
  0x16   :  { %v361_v62 = vsel %vm359_vm1, %v552_v60, 0  ;;  %v471_v15 = vunpack.c.h.bf16 %v467_v3 }
  0x17   :  { %383 = vmatpush1.bf16.msra.mxu0 %v600_v23  ;;  %424 = vmatpush1.bf16.msra.mxu1 %v601_v24 }
  0x18   :  { %384 = vmatprep.subr.bf16.mxu0 %v602_v25  ;;  %425 = vmatprep.subr.bf16.mxu1 %v604_v26 }
  0x1b   :  { %385 = vmatpush1.bf16.msra.mxu0 %v606_v27  ;;  %426 = vmatpush1.bf16.msra.mxu1 %v607_v28 }
  0x1c   :  { %386 = vmatprep.subr.bf16.mxu0 %v608_v29  ;;  %427 = vmatprep.subr.bf16.mxu1 %v610_v30 }
  0x1f   :  { %387 = vmatpush1.bf16.msra.mxu0 %v612_v31  ;;  %428 = vmatpush1.bf16.msra.mxu1 %v613_v32 }
  0x20   :  { %388 = vmatprep.subr.bf16.mxu0 %v614_v33  ;;  %429 = vmatprep.subr.bf16.mxu1 %v616_v34 }
  0x23   :  { %389 = vmatpush1.bf16.msra.mxu0 %v618_v35  ;;  %430 = vmatpush1.bf16.msra.mxu1 %v619_v36 }
  0x24   :  { %390 = vmatprep.subr.bf16.mxu0 %v620_v37  ;;  %431 = vmatprep.subr.bf16.mxu1 %v622_v38 }
  0x27   :  { %391 = vmatpush1.bf16.msra.mxu0 %v624_v41  ;;  %432 = vmatpush1.bf16.msra.mxu1 %v625_v42 }
  0x28   :  { %392 = vmatprep.subr.bf16.mxu0 %v626_v43  ;;  %433 = vmatprep.subr.bf16.mxu1 %v628_v44 }
  0x2b   :  { %393 = vmatpush1.bf16.msra.mxu0 %v630_v46  ;;  %434 = vmatpush1.bf16.msra.mxu1 %v631_v47 }
  0x2c   :  { %394 = vmatprep.subr.bf16.mxu0 %v632_v48  ;;  %435 = vmatprep.subr.bf16.mxu1 %v634_v49 }
  0x2f   :  { %395 = vmatpush1.bf16.msra.mxu0 %v636_v50  ;;  %436 = vmatpush1.bf16.msra.mxu1 %v637_v51 }
  0x30   :  { %396 = vmatprep.subr.bf16.mxu0 %v638_v52  ;;  %437 = vmatprep.subr.bf16.mxu1 %v640_v53 }
  0x33   :  { %397 = vmatpush1.bf16.msra.mxu0 %v642_v56  ;;  %438 = vmatpush1.bf16.msra.mxu1 %v643_v57 }
  0x34   :  { %556 = vmatprep.subr.msk.bf16.mxu0 %vm359_vm1, %v553_v58  ;;  %558 = vmatprep.subr.msk.bf16.mxu1 %vm359_vm1, %v555_v59 }
  0x37   :  { %399 = vmatpush1.bf16.msra.mxu0 %v361_v62  ;;  %440 = vmatpush1.bf16.msra.mxu1 %v367_v63 }
  0x3a   :  { %405 = vmatmul.mubr.bf16.vlgmr.msra.gmra.mrb[0].mxu0 %v498_v0  ;;  %446 = vmatmul.mubr.bf16.vlgmr.msra.gmra.mrb[0].mxu1 %v498_v0 }
  0x90   :  { %v77_v1 = vpop.permute.xlu0 %76 }
 0x10d   :  { %v406_v4 = vpop.f32.mrb[0].mxu0  ;;  %v447_v5 = vpop.f32.mrb[0].mxu1 }
 0x10e   :  { %v407_v6 = vadd.f32 %v406_v4, %v77_v1  ;;  %v448_v8 = vadd.f32 %v447_v5, %v77_v1  ;;  %v408_v10 = vpop.f32.mrb[1].mxu0  ;;  %v449_v11 = vpop.f32.mrb[1].mxu1 }
 0x10f   :  { %v409_v12 = vadd.f32 %v408_v10, %v77_v1  ;;  %v450_v14 = vadd.f32 %v449_v11, %v77_v1  ;;  %v410_v16 = vpop.f32.mrb[2].mxu0  ;;  %v451_v17 = vpop.f32.mrb[2].mxu1 }
 0x110   :  { %vm454_vm2 = vcmp.ge.f32.partialorder %v407_v6, 0.0  ;;  %v458_v18 = vmul.f32 0.2, %v407_v6  ;;  %vm456_vm3 = vcmp.ge.f32.partialorder %v448_v8, 0.0  ;;  %v460_v19 = vmul.f32 0.2, %v448_v8 }
 0x111   :  { %vm455_vm4 = vcmp.ge.f32.partialorder %v409_v12, 0.0  ;;  %v459_v20 = vmul.f32 0.2, %v409_v12  ;;  %vm457_vm5 = vcmp.ge.f32.partialorder %v450_v14, 0.0  ;;  %v461_v21 = vmul.f32 0.2, %v450_v14 }
 0x112   :  { %v462_v22 = vsel %vm454_vm2, %v407_v6, %v458_v18  ;;  %v464_v23 = vsel %vm456_vm3, %v448_v8, %v460_v19  ;;  %v411_v24 = vpop.f32.mrb[3].mxu0  ;;  %v452_v25 = vpop.f32.mrb[3].mxu1 }
 0x113   :  { %v472_v26 = vadd.f32 %v468_v7, %v462_v22  ;;  %v474_v27 = vadd.f32 %v470_v9, %v464_v23  ;;  %v463_v28 = vsel %vm455_vm4, %v409_v12, %v459_v20  ;;  %v465_v29 = vsel %vm457_vm5, %v450_v14, %v461_v21 }
 0x114   :  { %v473_v30 = vadd.f32 %v469_v13, %v463_v28  ;;  %v475_v31 = vadd.f32 %v471_v15, %v465_v29 }
 0x116   :  { %v562_v32 = vpack.c.bf16 %v473_v30, %v472_v26  ;;  %v563_v33 = vpack.c.bf16 %v475_v31, %v474_v27 }
 0x118   :  { %492 = vst [vmem:[%s860_s4] sm:$0xff] %v562_v32  ;;  %493 = vst [vmem:[%s860_s4 + $0x8] sm:$0xff] %v563_v33 }

// kernel: closed_call.212
= control target key start
LH: loop header
LB: loop body
LE: loop exit
PB: predicated region body
PF: predicated region fallthrough
CT: control target
= control target key end

     0   :  { %v637_v1 = vmov 0   ;;  %vm352_vm0 = vcmask 719872   ;;  %vm356_vm1 = vcmask 1043456   ;;  %s832_s0 = inlined_call_operand.vmem [shape: bf16[216,512], index: 0, kind: input, shape index: {}]   ;;  %s833_s1 = inlined_call_operand.vmem [shape: bf16[8,216], index: 1, kind: input, shape index: {}]   ;;  %s834_s2 = inlined_call_operand.vmem [shape: f32[8,1], index: 2, kind: input, shape index: {}]   ;;  %s835_s3 = inlined_call_operand.vmem [shape: bf16[8,512], index: 3, kind: output, shape index: {}]  }
   0x1   :  { %v553_v0 = vld [vmem:[%s832_s0 + $0x4] ss:$16 sps:$4 sm:$0xff]   ;;  %552 = vset.pattern.permute.xlu0 %v637_v1  ;;  %v555_v2 = vld [vmem:[%s832_s0 + $0xc] ss:$16 sps:$4 sm:$0xff]   ;;  %v557_v3 = vld [vmem:[%s832_s0] ss:$16 sps:$4 sm:$0xff]  }
   0x2   :  { %369 = vmatprep.subr.bf16.mxu0 %v553_v0  ;;  %v558_v4 = vld [vmem:[%s832_s0 + $0x8] ss:$16 sps:$4 sm:$0xff]   ;;  %410 = vmatprep.subr.bf16.mxu1 %v555_v2  ;;  %v559_v5 = vld [vmem:[%s832_s0 + $0x24] ss:$16 sps:$4 sm:$0xff]   ;;  %v561_v6 = vld [vmem:[%s832_s0 + $0x2c] ss:$16 sps:$4 sm:$0xff]  }
   0x3   :  { %370 = vmatpush1.bf16.msra.mxu0 %v557_v3  ;;  %411 = vmatpush1.bf16.msra.mxu1 %v558_v4  ;;  %v563_v7 = vld [vmem:[%s832_s0 + $0x20] ss:$16 sps:$4 sm:$0xff]   ;;  %v564_v8 = vld [vmem:[%s832_s0 + $0x28] ss:$16 sps:$4 sm:$0xff]   ;;  %v565_v9 = vld [vmem:[%s832_s0 + $0x44] ss:$16 sps:$4 sm:$0xff]  }
   0x4   :  { %371 = vmatprep.subr.bf16.mxu0 %v559_v5  ;;  %412 = vmatprep.subr.bf16.mxu1 %v561_v6  ;;  %v567_v10 = vld [vmem:[%s832_s0 + $0x4c] ss:$16 sps:$4 sm:$0xff]   ;;  %v569_v11 = vld [vmem:[%s832_s0 + $0x40] ss:$16 sps:$4 sm:$0xff]   ;;  %v570_v12 = vld [vmem:[%s832_s0 + $0x48] ss:$16 sps:$4 sm:$0xff]  }
   0x5   :  { %v571_v13 = vld [vmem:[%s832_s0 + $0x64] ss:$16 sps:$4 sm:$0xff]   ;;  %v573_v14 = vld [vmem:[%s832_s0 + $0x6c] ss:$16 sps:$4 sm:$0xff]   ;;  %v575_v15 = vld [vmem:[%s832_s0 + $0x60] ss:$16 sps:$4 sm:$0xff]  }
   0x6   :  { %v576_v16 = vld [vmem:[%s832_s0 + $0x68] ss:$16 sps:$4 sm:$0xff]   ;;  %v577_v17 = vld [vmem:[%s832_s0 + $0x84] ss:$16 sps:$4 sm:$0xff]   ;;  %v579_v18 = vld [vmem:[%s832_s0 + $0x8c] ss:$16 sps:$4 sm:$0xff]  }
   0x7   :  { %372 = vmatpush1.bf16.msra.mxu0 %v563_v7  ;;  %413 = vmatpush1.bf16.msra.mxu1 %v564_v8  ;;  %v581_v19 = vld [vmem:[%s832_s0 + $0x80] ss:$16 sps:$4 sm:$0xff]   ;;  %v582_v20 = vld [vmem:[%s832_s0 + $0x88] ss:$16 sps:$4 sm:$0xff]   ;;  %v583_v21 = vld [vmem:[%s832_s0 + $0xa4] ss:$16 sps:$4 sm:$0xff]  }
   0x8   :  { %373 = vmatprep.subr.bf16.mxu0 %v565_v9  ;;  %414 = vmatprep.subr.bf16.mxu1 %v567_v10  ;;  %v585_v22 = vld [vmem:[%s832_s0 + $0xac] ss:$16 sps:$4 sm:$0xff]   ;;  %v587_v23 = vld [vmem:[%s832_s0 + $0xa0] ss:$16 sps:$4 sm:$0xff]   ;;  %v588_v24 = vld [vmem:[%s832_s0 + $0xa8] ss:$16 sps:$4 sm:$0xff]  }
   0x9   :  { %v589_v25 = vld [vmem:[%s832_s0 + $0xc4] ss:$16 sps:$4 sm:$0xff]   ;;  %v591_v26 = vld [vmem:[%s832_s0 + $0xcc] ss:$16 sps:$4 sm:$0xff]   ;;  %v593_v27 = vld [vmem:[%s832_s0 + $0xc0] ss:$16 sps:$4 sm:$0xff]  }
   0xa   :  { %v594_v28 = vld [vmem:[%s832_s0 + $0xc8] ss:$16 sps:$4 sm:$0xff]   ;;  %v595_v29 = vld [vmem:[%s832_s0 + $0xe4] ss:$16 sps:$4 sm:$0xff]   ;;  %v597_v30 = vld [vmem:[%s832_s0 + $0xec] ss:$16 sps:$4 sm:$0xff]  }
   0xb   :  { %374 = vmatpush1.bf16.msra.mxu0 %v569_v11  ;;  %415 = vmatpush1.bf16.msra.mxu1 %v570_v12  ;;  %v599_v31 = vld [vmem:[%s832_s0 + $0xe0] ss:$16 sps:$4 sm:$0xff]   ;;  %v600_v32 = vld [vmem:[%s832_s0 + $0xe8] ss:$16 sps:$4 sm:$0xff]   ;;  %v601_v33 = vld [vmem:[%s832_s0 + $0x104] ss:$16 sps:$4 sm:$0xff]  }
   0xc   :  { %375 = vmatprep.subr.bf16.mxu0 %v571_v13  ;;  %416 = vmatprep.subr.bf16.mxu1 %v573_v14  ;;  %v603_v34 = vld [vmem:[%s832_s0 + $0x10c] ss:$16 sps:$4 sm:$0xff]   ;;  %v605_v35 = vld [vmem:[%s832_s0 + $0x100] ss:$16 sps:$4 sm:$0xff]   ;;  %v606_v36 = vld [vmem:[%s832_s0 + $0x108] ss:$16 sps:$4 sm:$0xff]  }
   0xd   :  { %v607_v37 = vld [vmem:[%s832_s0 + $0x124] ss:$16 sps:$4 sm:$0xff]   ;;  %v609_v38 = vld [vmem:[%s832_s0 + $0x12c] ss:$16 sps:$4 sm:$0xff]   ;;  %v611_v41 = vld [vmem:[%s832_s0 + $0x120] ss:$16 sps:$4 sm:$0xff]  }
   0xe   :  { %v15_v39 = vld [vmem:[%s833_s1] sm:$0xff]  ;;  %v612_v42 = vld [vmem:[%s832_s0 + $0x128] ss:$16 sps:$4 sm:$0xff]   ;;  %v615_v44 = vld [vmem:[%s832_s0 + $0x14c] ss:$16 sps:$4 sm:$0xff]  }
   0xf   :  { %376 = vmatpush1.bf16.msra.mxu0 %v575_v15  ;;  %417 = vmatpush1.bf16.msra.mxu1 %v576_v16  ;;  %v70_v40 = vld [vmem:[%s834_s2] sm:$0xff]  ;;  %v486_v45 = vcombine.high %v15_v39, %v15_v39  ;;  %v618_v47 = vld [vmem:[%s832_s0 + $0x148] ss:$16 sps:$4 sm:$0xff]   ;;  %v621_v49 = vld [vmem:[%s832_s0 + $0x16c] ss:$16 sps:$4 sm:$0xff]   ;;  %v485_v0 = vcombine.low %v15_v39, %v15_v39 }
  0x10   :  { %377 = vmatprep.subr.bf16.mxu0 %v577_v17  ;;  %418 = vmatprep.subr.bf16.mxu1 %v579_v18  ;;  %v613_v43 = vld [vmem:[%s832_s0 + $0x144] ss:$16 sps:$4 sm:$0xff]   ;;  %v617_v46 = vld [vmem:[%s832_s0 + $0x140] ss:$16 sps:$4 sm:$0xff]   ;;  %v624_v51 = vld [vmem:[%s832_s0 + $0x168] ss:$16 sps:$4 sm:$0xff]  }
  0x11   :  { %73 = vperm.xlu0 %552, %v70_v40   ;;  %544 = vmatprep.mubr.msk.bf16.mxu0 %vm352_vm0, %v486_v45  ;;  %v619_v48 = vld [vmem:[%s832_s0 + $0x164] ss:$16 sps:$4 sm:$0xff]   ;;  %v623_v50 = vld [vmem:[%s832_s0 + $0x160] ss:$16 sps:$4 sm:$0xff]   ;;  %v627_v53 = vld [vmem:[%s832_s0 + $0x18c] ss:$16 sps:$4 sm:$0xff]  }
  0x12   :  { %546 = vmatprep.mubr.msk.bf16.mxu1 %vm352_vm0, %v486_v45  ;;  %v625_v52 = vld [vmem:[%s832_s0 + $0x184] ss:$16 sps:$4 sm:$0xff]   ;;  %v69_v55 = vld [vmem:[%s832_s0 + $0x1a8] sm:$0xff]  ;;  %v629_v56 = vld [vmem:[%s832_s0 + $0x180] ss:$16 sps:$4 sm:$0xff]  }
  0x13   :  { %378 = vmatpush1.bf16.msra.mxu0 %v581_v19  ;;  %419 = vmatpush1.bf16.msra.mxu1 %v582_v20  ;;  %v68_v54 = vld [vmem:[%s832_s0 + $0x1a0] sm:$0xff]  ;;  %v630_v57 = vld [vmem:[%s832_s0 + $0x188] ss:$16 sps:$4 sm:$0xff]   ;;  %v542_v59 = vcombine.high %v69_v55, %v69_v55  ;;  %v541_v61 = vcombine.low %v69_v55, %v69_v55 }
  0x14   :  { %379 = vmatprep.subr.bf16.mxu0 %v583_v21  ;;  %420 = vmatprep.subr.bf16.mxu1 %v585_v22  ;;  %v540_v58 = vcombine.high %v68_v54, %v68_v54  ;;  %v539_v60 = vcombine.low %v68_v54, %v68_v54 }
  0x15   :  { %v364_v63 = vsel %vm356_vm1, %v541_v61, 0 }
  0x16   :  { %v358_v62 = vsel %vm356_vm1, %v539_v60, 0 }
  0x17   :  { %380 = vmatpush1.bf16.msra.mxu0 %v587_v23  ;;  %421 = vmatpush1.bf16.msra.mxu1 %v588_v24 }
  0x18   :  { %381 = vmatprep.subr.bf16.mxu0 %v589_v25  ;;  %422 = vmatprep.subr.bf16.mxu1 %v591_v26 }
  0x1b   :  { %382 = vmatpush1.bf16.msra.mxu0 %v593_v27  ;;  %423 = vmatpush1.bf16.msra.mxu1 %v594_v28 }
  0x1c   :  { %383 = vmatprep.subr.bf16.mxu0 %v595_v29  ;;  %424 = vmatprep.subr.bf16.mxu1 %v597_v30 }
  0x1f   :  { %384 = vmatpush1.bf16.msra.mxu0 %v599_v31  ;;  %425 = vmatpush1.bf16.msra.mxu1 %v600_v32 }
  0x20   :  { %385 = vmatprep.subr.bf16.mxu0 %v601_v33  ;;  %426 = vmatprep.subr.bf16.mxu1 %v603_v34 }
  0x23   :  { %386 = vmatpush1.bf16.msra.mxu0 %v605_v35  ;;  %427 = vmatpush1.bf16.msra.mxu1 %v606_v36 }
  0x24   :  { %387 = vmatprep.subr.bf16.mxu0 %v607_v37  ;;  %428 = vmatprep.subr.bf16.mxu1 %v609_v38 }
  0x27   :  { %388 = vmatpush1.bf16.msra.mxu0 %v611_v41  ;;  %429 = vmatpush1.bf16.msra.mxu1 %v612_v42 }
  0x28   :  { %389 = vmatprep.subr.bf16.mxu0 %v613_v43  ;;  %430 = vmatprep.subr.bf16.mxu1 %v615_v44 }
  0x2b   :  { %390 = vmatpush1.bf16.msra.mxu0 %v617_v46  ;;  %431 = vmatpush1.bf16.msra.mxu1 %v618_v47 }
  0x2c   :  { %391 = vmatprep.subr.bf16.mxu0 %v619_v48  ;;  %432 = vmatprep.subr.bf16.mxu1 %v621_v49 }
  0x2f   :  { %392 = vmatpush1.bf16.msra.mxu0 %v623_v50  ;;  %433 = vmatpush1.bf16.msra.mxu1 %v624_v51 }
  0x30   :  { %393 = vmatprep.subr.bf16.mxu0 %v625_v52  ;;  %434 = vmatprep.subr.bf16.mxu1 %v627_v53 }
  0x33   :  { %394 = vmatpush1.bf16.msra.mxu0 %v629_v56  ;;  %435 = vmatpush1.bf16.msra.mxu1 %v630_v57 }
  0x34   :  { %543 = vmatprep.subr.msk.bf16.mxu0 %vm356_vm1, %v540_v58  ;;  %545 = vmatprep.subr.msk.bf16.mxu1 %vm356_vm1, %v542_v59 }
  0x37   :  { %396 = vmatpush1.bf16.msra.mxu0 %v358_v62  ;;  %437 = vmatpush1.bf16.msra.mxu1 %v364_v63 }
  0x3a   :  { %402 = vmatmul.mubr.bf16.vlgmr.msra.gmra.mrb[0].mxu0 %v485_v0  ;;  %443 = vmatmul.mubr.bf16.vlgmr.msra.gmra.mrb[0].mxu1 %v485_v0 }
  0x90   :  { %v74_v1 = vpop.permute.xlu0 %73 }
 0x10d   :  { %v403_v2 = vpop.f32.mrb[0].mxu0  ;;  %v444_v3 = vpop.f32.mrb[0].mxu1 }
 0x10e   :  { %v404_v4 = vadd.f32 %v403_v2, %v74_v1  ;;  %v445_v5 = vadd.f32 %v444_v3, %v74_v1  ;;  %v405_v6 = vpop.f32.mrb[1].mxu0  ;;  %v446_v7 = vpop.f32.mrb[1].mxu1 }
 0x10f   :  { %v406_v8 = vadd.f32 %v405_v6, %v74_v1  ;;  %v447_v9 = vadd.f32 %v446_v7, %v74_v1  ;;  %v407_v10 = vpop.f32.mrb[2].mxu0  ;;  %v448_v11 = vpop.f32.mrb[2].mxu1 }
 0x110   :  { %vm451_vm2 = vcmp.ge.f32.partialorder %v404_v4, 0.0  ;;  %v455_v12 = vmul.f32 0.2, %v404_v4  ;;  %vm453_vm3 = vcmp.ge.f32.partialorder %v445_v5, 0.0  ;;  %v457_v13 = vmul.f32 0.2, %v445_v5 }
 0x111   :  { %vm452_vm4 = vcmp.ge.f32.partialorder %v406_v8, 0.0  ;;  %v456_v14 = vmul.f32 0.2, %v406_v8  ;;  %vm454_vm5 = vcmp.ge.f32.partialorder %v447_v9, 0.0  ;;  %v458_v15 = vmul.f32 0.2, %v447_v9 }
 0x112   :  { %v459_v16 = vsel %vm451_vm2, %v404_v4, %v455_v12  ;;  %v461_v17 = vsel %vm453_vm3, %v445_v5, %v457_v13  ;;  %v408_v18 = vpop.f32.mrb[3].mxu0  ;;  %v449_v19 = vpop.f32.mrb[3].mxu1 }
 0x113   :  { %v460_v20 = vsel %vm452_vm4, %v406_v8, %v456_v14  ;;  %v462_v21 = vsel %vm454_vm5, %v447_v9, %v458_v15 }
 0x114   :  { %v549_v22 = vpack.c.bf16 %v460_v20, %v459_v16  ;;  %v550_v23 = vpack.c.bf16 %v462_v21, %v461_v17 }
 0x116   :  { %479 = vst [vmem:[%s835_s3] sm:$0xff] %v549_v22  ;;  %480 = vst [vmem:[%s835_s3 + $0x8] sm:$0xff] %v550_v23 }

// kernel: closed_call.213
= control target key start
LH: loop header
LB: loop body
LE: loop exit
PB: predicated region body
PF: predicated region fallthrough
CT: control target
= control target key end

     0   :  { %v735_v1 = vmov 0   ;;  %vm358_vm0 = vcmask 719872   ;;  %vm362_vm1 = vcmask 1043456   ;;  %s952_s0 = inlined_call_operand.vmem [shape: bf16[216,512], index: 0, kind: input, shape index: {}]   ;;  %s953_s1 = inlined_call_operand.vmem [shape: bf16[8,216], index: 1, kind: input, shape index: {}]   ;;  %s954_s2 = inlined_call_operand.vmem [shape: f32[8,1], index: 2, kind: input, shape index: {}]   ;;  %s955_s4 = inlined_call_operand.vmem [shape: bf16[8,512], index: 4, kind: input, shape index: {}]   ;;  %s956_s3 = inlined_call_operand.vmem [shape: bf16[8,512], index: 3, kind: input, shape index: {}]   ;;  %s957_s5 = inlined_call_operand.vmem [shape: bf16[8,512], index: 5, kind: output, shape index: {}]  }
   0x1   :  { %v627_v0 = vld [vmem:[%s952_s0 + $0x4] ss:$16 sps:$4 sm:$0xff]   ;;  %626 = vset.pattern.permute.xlu0 %v735_v1  ;;  %v629_v2 = vld [vmem:[%s952_s0 + $0xc] ss:$16 sps:$4 sm:$0xff]   ;;  %v631_v3 = vld [vmem:[%s952_s0] ss:$16 sps:$4 sm:$0xff]  }
   0x2   :  { %375 = vmatprep.subr.bf16.mxu0 %v627_v0  ;;  %v632_v4 = vld [vmem:[%s952_s0 + $0x8] ss:$16 sps:$4 sm:$0xff]   ;;  %416 = vmatprep.subr.bf16.mxu1 %v629_v2  ;;  %v633_v5 = vld [vmem:[%s952_s0 + $0x24] ss:$16 sps:$4 sm:$0xff]   ;;  %v635_v6 = vld [vmem:[%s952_s0 + $0x2c] ss:$16 sps:$4 sm:$0xff]  }
   0x3   :  { %376 = vmatpush1.bf16.msra.mxu0 %v631_v3  ;;  %417 = vmatpush1.bf16.msra.mxu1 %v632_v4  ;;  %v637_v7 = vld [vmem:[%s952_s0 + $0x20] ss:$16 sps:$4 sm:$0xff]   ;;  %v638_v8 = vld [vmem:[%s952_s0 + $0x28] ss:$16 sps:$4 sm:$0xff]   ;;  %v639_v9 = vld [vmem:[%s952_s0 + $0x44] ss:$16 sps:$4 sm:$0xff]  }
   0x4   :  { %377 = vmatprep.subr.bf16.mxu0 %v633_v5  ;;  %418 = vmatprep.subr.bf16.mxu1 %v635_v6  ;;  %v641_v10 = vld [vmem:[%s952_s0 + $0x4c] ss:$16 sps:$4 sm:$0xff]   ;;  %v643_v11 = vld [vmem:[%s952_s0 + $0x40] ss:$16 sps:$4 sm:$0xff]   ;;  %v644_v12 = vld [vmem:[%s952_s0 + $0x48] ss:$16 sps:$4 sm:$0xff]  }
   0x5   :  { %v645_v13 = vld [vmem:[%s952_s0 + $0x64] ss:$16 sps:$4 sm:$0xff]   ;;  %v647_v14 = vld [vmem:[%s952_s0 + $0x6c] ss:$16 sps:$4 sm:$0xff]   ;;  %v649_v15 = vld [vmem:[%s952_s0 + $0x60] ss:$16 sps:$4 sm:$0xff]  }
   0x6   :  { %v650_v16 = vld [vmem:[%s952_s0 + $0x68] ss:$16 sps:$4 sm:$0xff]   ;;  %v651_v17 = vld [vmem:[%s952_s0 + $0x84] ss:$16 sps:$4 sm:$0xff]   ;;  %v653_v18 = vld [vmem:[%s952_s0 + $0x8c] ss:$16 sps:$4 sm:$0xff]  }
   0x7   :  { %378 = vmatpush1.bf16.msra.mxu0 %v637_v7  ;;  %419 = vmatpush1.bf16.msra.mxu1 %v638_v8  ;;  %v655_v19 = vld [vmem:[%s952_s0 + $0x80] ss:$16 sps:$4 sm:$0xff]   ;;  %v656_v20 = vld [vmem:[%s952_s0 + $0x88] ss:$16 sps:$4 sm:$0xff]   ;;  %v657_v21 = vld [vmem:[%s952_s0 + $0xa4] ss:$16 sps:$4 sm:$0xff]  }
   0x8   :  { %379 = vmatprep.subr.bf16.mxu0 %v639_v9  ;;  %420 = vmatprep.subr.bf16.mxu1 %v641_v10  ;;  %v659_v22 = vld [vmem:[%s952_s0 + $0xac] ss:$16 sps:$4 sm:$0xff]   ;;  %v661_v23 = vld [vmem:[%s952_s0 + $0xa0] ss:$16 sps:$4 sm:$0xff]   ;;  %v662_v24 = vld [vmem:[%s952_s0 + $0xa8] ss:$16 sps:$4 sm:$0xff]  }
   0x9   :  { %v663_v25 = vld [vmem:[%s952_s0 + $0xc4] ss:$16 sps:$4 sm:$0xff]   ;;  %v665_v26 = vld [vmem:[%s952_s0 + $0xcc] ss:$16 sps:$4 sm:$0xff]   ;;  %v667_v27 = vld [vmem:[%s952_s0 + $0xc0] ss:$16 sps:$4 sm:$0xff]  }
   0xa   :  { %v668_v28 = vld [vmem:[%s952_s0 + $0xc8] ss:$16 sps:$4 sm:$0xff]   ;;  %v669_v29 = vld [vmem:[%s952_s0 + $0xe4] ss:$16 sps:$4 sm:$0xff]   ;;  %v671_v30 = vld [vmem:[%s952_s0 + $0xec] ss:$16 sps:$4 sm:$0xff]  }
   0xb   :  { %380 = vmatpush1.bf16.msra.mxu0 %v643_v11  ;;  %421 = vmatpush1.bf16.msra.mxu1 %v644_v12  ;;  %v673_v31 = vld [vmem:[%s952_s0 + $0xe0] ss:$16 sps:$4 sm:$0xff]   ;;  %v674_v32 = vld [vmem:[%s952_s0 + $0xe8] ss:$16 sps:$4 sm:$0xff]   ;;  %v675_v33 = vld [vmem:[%s952_s0 + $0x104] ss:$16 sps:$4 sm:$0xff]  }
   0xc   :  { %381 = vmatprep.subr.bf16.mxu0 %v645_v13  ;;  %422 = vmatprep.subr.bf16.mxu1 %v647_v14  ;;  %v677_v34 = vld [vmem:[%s952_s0 + $0x10c] ss:$16 sps:$4 sm:$0xff]   ;;  %v679_v35 = vld [vmem:[%s952_s0 + $0x100] ss:$16 sps:$4 sm:$0xff]   ;;  %v680_v36 = vld [vmem:[%s952_s0 + $0x108] ss:$16 sps:$4 sm:$0xff]  }
   0xd   :  { %v681_v37 = vld [vmem:[%s952_s0 + $0x124] ss:$16 sps:$4 sm:$0xff]   ;;  %v683_v38 = vld [vmem:[%s952_s0 + $0x12c] ss:$16 sps:$4 sm:$0xff]   ;;  %v685_v41 = vld [vmem:[%s952_s0 + $0x120] ss:$16 sps:$4 sm:$0xff]  }
   0xe   :  { %v21_v39 = vld [vmem:[%s953_s1] sm:$0xff]  ;;  %v686_v42 = vld [vmem:[%s952_s0 + $0x128] ss:$16 sps:$4 sm:$0xff]   ;;  %v689_v44 = vld [vmem:[%s952_s0 + $0x14c] ss:$16 sps:$4 sm:$0xff]  }
   0xf   :  { %382 = vmatpush1.bf16.msra.mxu0 %v649_v15  ;;  %423 = vmatpush1.bf16.msra.mxu1 %v650_v16  ;;  %v76_v40 = vld [vmem:[%s954_s2] sm:$0xff]  ;;  %v556_v45 = vcombine.high %v21_v39, %v21_v39  ;;  %v692_v47 = vld [vmem:[%s952_s0 + $0x148] ss:$16 sps:$4 sm:$0xff]   ;;  %v695_v49 = vld [vmem:[%s952_s0 + $0x16c] ss:$16 sps:$4 sm:$0xff]   ;;  %v555_v0 = vcombine.low %v21_v39, %v21_v39 }
  0x10   :  { %383 = vmatprep.subr.bf16.mxu0 %v651_v17  ;;  %424 = vmatprep.subr.bf16.mxu1 %v653_v18  ;;  %v687_v43 = vld [vmem:[%s952_s0 + $0x144] ss:$16 sps:$4 sm:$0xff]   ;;  %v691_v46 = vld [vmem:[%s952_s0 + $0x140] ss:$16 sps:$4 sm:$0xff]   ;;  %v698_v51 = vld [vmem:[%s952_s0 + $0x168] ss:$16 sps:$4 sm:$0xff]  }
  0x11   :  { %79 = vperm.xlu0 %626, %v76_v40   ;;  %614 = vmatprep.mubr.msk.bf16.mxu0 %vm358_vm0, %v556_v45  ;;  %v693_v48 = vld [vmem:[%s952_s0 + $0x164] ss:$16 sps:$4 sm:$0xff]   ;;  %v697_v50 = vld [vmem:[%s952_s0 + $0x160] ss:$16 sps:$4 sm:$0xff]   ;;  %v701_v53 = vld [vmem:[%s952_s0 + $0x18c] ss:$16 sps:$4 sm:$0xff]  }
  0x12   :  { %616 = vmatprep.mubr.msk.bf16.mxu1 %vm358_vm0, %v556_v45  ;;  %v699_v52 = vld [vmem:[%s952_s0 + $0x184] ss:$16 sps:$4 sm:$0xff]   ;;  %v75_v55 = vld [vmem:[%s952_s0 + $0x1a8] sm:$0xff]  ;;  %v703_v56 = vld [vmem:[%s952_s0 + $0x180] ss:$16 sps:$4 sm:$0xff]  }
  0x13   :  { %384 = vmatpush1.bf16.msra.mxu0 %v655_v19  ;;  %425 = vmatpush1.bf16.msra.mxu1 %v656_v20  ;;  %v74_v54 = vld [vmem:[%s952_s0 + $0x1a0] sm:$0xff]  ;;  %v704_v57 = vld [vmem:[%s952_s0 + $0x188] ss:$16 sps:$4 sm:$0xff]   ;;  %v612_v59 = vcombine.high %v75_v55, %v75_v55  ;;  %v611_v61 = vcombine.low %v75_v55, %v75_v55 }
  0x14   :  { %385 = vmatprep.subr.bf16.mxu0 %v657_v21  ;;  %426 = vmatprep.subr.bf16.mxu1 %v659_v22  ;;  %v610_v58 = vcombine.high %v74_v54, %v74_v54  ;;  %v609_v60 = vcombine.low %v74_v54, %v74_v54  ;;  %v475_v1 = vld [vmem:[%s955_s4] sm:$0xff]  ;;  %v476_v2 = vld [vmem:[%s955_s4 + $0x8] sm:$0xff] }
  0x15   :  { %v370_v63 = vsel %vm362_vm1, %v611_v61, 0  ;;  %v477_v3 = vunpack.c.l.bf16 %v475_v1  ;;  %v479_v4 = vunpack.c.l.bf16 %v476_v2  ;;  %v478_v5 = vunpack.c.h.bf16 %v475_v1 }
  0x16   :  { %v364_v62 = vsel %vm362_vm1, %v609_v60, 0  ;;  %v480_v6 = vunpack.c.h.bf16 %v476_v2 }
  0x17   :  { %386 = vmatpush1.bf16.msra.mxu0 %v661_v23  ;;  %427 = vmatpush1.bf16.msra.mxu1 %v662_v24  ;;  %v481_v7 = vsub.f32 0.0, %v477_v3  ;;  %v483_v8 = vsub.f32 0.0, %v479_v4  ;;  %v482_v9 = vsub.f32 0.0, %v478_v5 }
  0x18   :  { %387 = vmatprep.subr.bf16.mxu0 %v663_v25  ;;  %428 = vmatprep.subr.bf16.mxu1 %v665_v26  ;;  %v484_v10 = vsub.f32 0.0, %v480_v6 }
  0x19   :  { %v485_v11 = vmul.f32 1.442695, %v481_v7  ;;  %v489_v12 = vmul.f32 1.442695, %v483_v8  ;;  %v487_v13 = vmul.f32 1.442695, %v482_v9 }
  0x1a   :  { %v491_v14 = vmul.f32 1.442695, %v484_v10 }
  0x1b   :  { %388 = vmatpush1.bf16.msra.mxu0 %v667_v27  ;;  %429 = vmatpush1.bf16.msra.mxu1 %v668_v28  ;;  %711 = vpow2.f32 %v485_v11 }
  0x1c   :  { %389 = vmatprep.subr.bf16.mxu0 %v669_v29  ;;  %430 = vmatprep.subr.bf16.mxu1 %v671_v30  ;;  %713 = vpow2.f32 %v489_v12 }
  0x1d   :  { %715 = vpow2.f32 %v487_v13 }
  0x1e   :  { %717 = vpow2.f32 %v491_v14 }
  0x1f   :  { %390 = vmatpush1.bf16.msra.mxu0 %v673_v31  ;;  %431 = vmatpush1.bf16.msra.mxu1 %v674_v32 }
  0x20   :  { %391 = vmatprep.subr.bf16.mxu0 %v675_v33  ;;  %432 = vmatprep.subr.bf16.mxu1 %v677_v34 }
  0x23   :  { %392 = vmatpush1.bf16.msra.mxu0 %v679_v35  ;;  %433 = vmatpush1.bf16.msra.mxu1 %v680_v36 }
  0x24   :  { %393 = vmatprep.subr.bf16.mxu0 %v681_v37  ;;  %434 = vmatprep.subr.bf16.mxu1 %v683_v38 }
  0x25   :  { %v712_v15 = vpop.eup %711 }
  0x26   :  { %v714_v16 = vpop.eup %713  ;;  %v493_v19 = vadd.f32 1.0, %v712_v15 }
  0x27   :  { %394 = vmatpush1.bf16.msra.mxu0 %v685_v41  ;;  %435 = vmatpush1.bf16.msra.mxu1 %v686_v42  ;;  %v716_v17 = vpop.eup %715  ;;  %v495_v20 = vadd.f32 1.0, %v714_v16 }
  0x28   :  { %395 = vmatprep.subr.bf16.mxu0 %v687_v43  ;;  %436 = vmatprep.subr.bf16.mxu1 %v689_v44  ;;  %v718_v18 = vpop.eup %717  ;;  %v494_v21 = vadd.f32 1.0, %v716_v17  ;;  %719 = vrcp.f32 %v493_v19  ;;  %v469_v43 = vld [vmem:[%s956_s3] sm:$0xff]  ;;  %v470_v44 = vld [vmem:[%s956_s3 + $0x8] sm:$0xff] }
  0x29   :  { %v496_v22 = vadd.f32 1.0, %v718_v18  ;;  %721 = vrcp.f32 %v495_v20 }
  0x2a   :  { %723 = vrcp.f32 %v494_v21 }
  0x2b   :  { %396 = vmatpush1.bf16.msra.mxu0 %v691_v46  ;;  %437 = vmatpush1.bf16.msra.mxu1 %v692_v47  ;;  %725 = vrcp.f32 %v496_v22  ;;  %v471_v47 = vunpack.c.l.bf16 %v469_v43 }
  0x2c   :  { %397 = vmatprep.subr.bf16.mxu0 %v693_v48  ;;  %438 = vmatprep.subr.bf16.mxu1 %v695_v49  ;;  %v473_v48 = vunpack.c.l.bf16 %v470_v44 }
  0x2f   :  { %398 = vmatpush1.bf16.msra.mxu0 %v697_v50  ;;  %439 = vmatpush1.bf16.msra.mxu1 %v698_v51  ;;  %v472_v51 = vunpack.c.h.bf16 %v469_v43 }
  0x30   :  { %399 = vmatprep.subr.bf16.mxu0 %v699_v52  ;;  %440 = vmatprep.subr.bf16.mxu1 %v701_v53  ;;  %v474_v52 = vunpack.c.h.bf16 %v470_v44 }
  0x32   :  { %v720_v23 = vpop.eup %719 }
  0x33   :  { %400 = vmatpush1.bf16.msra.mxu0 %v703_v56  ;;  %441 = vmatpush1.bf16.msra.mxu1 %v704_v57  ;;  %v722_v24 = vpop.eup %721  ;;  %v505_v27 = vmul.f32 2.0, %v720_v23 }
  0x34   :  { %613 = vmatprep.subr.msk.bf16.mxu0 %vm362_vm1, %v610_v58  ;;  %615 = vmatprep.subr.msk.bf16.mxu1 %vm362_vm1, %v612_v59  ;;  %v724_v25 = vpop.eup %723  ;;  %v507_v28 = vmul.f32 2.0, %v722_v24 }
  0x35   :  { %v726_v26 = vpop.eup %725  ;;  %v506_v29 = vmul.f32 2.0, %v724_v25  ;;  %v617_v31 = vadd.f32 -1.0, %v505_v27 }
  0x36   :  { %v508_v30 = vmul.f32 2.0, %v726_v26  ;;  %v619_v32 = vadd.f32 -1.0, %v507_v28 }
  0x37   :  { %402 = vmatpush1.bf16.msra.mxu0 %v364_v62  ;;  %443 = vmatpush1.bf16.msra.mxu1 %v370_v63  ;;  %v618_v33 = vadd.f32 -1.0, %v506_v29  ;;  %v513_v35 = vmul.f32 0.8, %v617_v31 }
  0x38   :  { %v620_v34 = vadd.f32 -1.0, %v508_v30  ;;  %v515_v36 = vmul.f32 0.8, %v619_v32 }
  0x39   :  { %v514_v37 = vmul.f32 0.8, %v618_v33  ;;  %v517_v39 = vmul.f32 1.442695, %v513_v35 }
  0x3a   :  { %408 = vmatmul.mubr.bf16.vlgmr.msra.gmra.mrb[0].mxu0 %v555_v0  ;;  %449 = vmatmul.mubr.bf16.vlgmr.msra.gmra.mrb[0].mxu1 %v555_v0  ;;  %v516_v38 = vmul.f32 0.8, %v620_v34  ;;  %v521_v40 = vmul.f32 1.442695, %v515_v36 }
  0x3b   :  { %v519_v41 = vmul.f32 1.442695, %v514_v37  ;;  %727 = vpow2.f32 %v517_v39 }
  0x3c   :  { %v523_v42 = vmul.f32 1.442695, %v516_v38  ;;  %729 = vpow2.f32 %v521_v40 }
  0x3d   :  { %731 = vpow2.f32 %v519_v41 }
  0x3e   :  { %733 = vpow2.f32 %v523_v42 }
  0x45   :  { %v728_v45 = vpop.eup %727 }
  0x46   :  { %v730_v46 = vpop.eup %729  ;;  %v525_v57 = vmul.f32 %v728_v45, %v471_v47 }
  0x47   :  { %v732_v49 = vpop.eup %731  ;;  %v527_v59 = vmul.f32 %v730_v46, %v473_v48 }
  0x48   :  { %v734_v53 = vpop.eup %733  ;;  %v526_v63 = vmul.f32 %v732_v49, %v472_v51 }
  0x49   :  { %v528_v1 = vmul.f32 %v734_v53, %v474_v52 }
  0x90   :  { %v80_v50 = vpop.permute.xlu0 %79 }
 0x10d   :  { %v409_v54 = vpop.f32.mrb[0].mxu0  ;;  %v450_v55 = vpop.f32.mrb[0].mxu1 }
 0x10e   :  { %v410_v56 = vadd.f32 %v409_v54, %v80_v50  ;;  %v451_v58 = vadd.f32 %v450_v55, %v80_v50  ;;  %v411_v60 = vpop.f32.mrb[1].mxu0  ;;  %v452_v61 = vpop.f32.mrb[1].mxu1 }
 0x10f   :  { %v412_v62 = vadd.f32 %v411_v60, %v80_v50  ;;  %v453_v0 = vadd.f32 %v452_v61, %v80_v50  ;;  %v413_v2 = vpop.f32.mrb[2].mxu0  ;;  %v454_v3 = vpop.f32.mrb[2].mxu1 }
 0x110   :  { %vm457_vm2 = vcmp.ge.f32.partialorder %v410_v56, 0.0  ;;  %v461_v4 = vmul.f32 0.2, %v410_v56  ;;  %vm459_vm3 = vcmp.ge.f32.partialorder %v451_v58, 0.0  ;;  %v463_v5 = vmul.f32 0.2, %v451_v58 }
 0x111   :  { %vm458_vm4 = vcmp.ge.f32.partialorder %v412_v62, 0.0  ;;  %v462_v6 = vmul.f32 0.2, %v412_v62  ;;  %vm460_vm5 = vcmp.ge.f32.partialorder %v453_v0, 0.0  ;;  %v464_v7 = vmul.f32 0.2, %v453_v0 }
 0x112   :  { %v465_v8 = vsel %vm457_vm2, %v410_v56, %v461_v4  ;;  %v467_v9 = vsel %vm459_vm3, %v451_v58, %v463_v5  ;;  %v414_v10 = vpop.f32.mrb[3].mxu0  ;;  %v455_v11 = vpop.f32.mrb[3].mxu1 }
 0x113   :  { %v529_v12 = vadd.f32 %v525_v57, %v465_v8  ;;  %v531_v13 = vadd.f32 %v527_v59, %v467_v9  ;;  %v466_v14 = vsel %vm458_vm4, %v412_v62, %v462_v6  ;;  %v468_v15 = vsel %vm460_vm5, %v453_v0, %v464_v7 }
 0x114   :  { %v530_v16 = vadd.f32 %v526_v63, %v466_v14  ;;  %v532_v17 = vadd.f32 %v528_v1, %v468_v15 }
 0x116   :  { %v623_v18 = vpack.c.bf16 %v530_v16, %v529_v12  ;;  %v624_v19 = vpack.c.bf16 %v532_v17, %v531_v13 }
 0x118   :  { %549 = vst [vmem:[%s957_s5] sm:$0xff] %v623_v18  ;;  %550 = vst [vmem:[%s957_s5 + $0x8] sm:$0xff] %v624_v19 }

// kernel: sub.7
= control target key start
LH: loop header
LB: loop body
LE: loop exit
PB: predicated region body
PF: predicated region fallthrough
CT: control target
= control target key end

     0   :  { %s109_s0 = inlined_call_operand.vmem [shape: bf16[8,512], index: 0, kind: input, shape index: {}]   ;;  %s110_s1 = inlined_call_operand.vmem [shape: bf16[8,512], index: 1, kind: input, shape index: {}]   ;;  %s111_s2 = inlined_call_operand.vmem [shape: bf16[8,512], index: 2, kind: output, shape index: {}]  }
   0x1   :  { %v3_v0 = vld [vmem:[%s109_s0] sm:$0xff]   ;;  %v70_v2 = vld [vmem:[%s109_s0 + $0x8] sm:$0xff]  }
   0x2   :  { %v6_v1 = vld [vmem:[%s110_s1] sm:$0xff]   ;;  %v4_v3 = vunpack.c.l.bf16 %v3_v0  ;;  %v15_v5 = vunpack.c.h.bf16 %v3_v0  ;;  %v71_v7 = vld [vmem:[%s110_s1 + $0x8] sm:$0xff]   ;;  %v33_v8 = vunpack.c.l.bf16 %v70_v2  ;;  %v46_v10 = vunpack.c.h.bf16 %v70_v2 }
   0x3   :  { %v7_v4 = vunpack.c.l.bf16 %v6_v1  ;;  %v19_v6 = vunpack.c.h.bf16 %v6_v1  ;;  %v37_v9 = vunpack.c.l.bf16 %v71_v7  ;;  %v50_v11 = vunpack.c.h.bf16 %v71_v7 }
   0x5   :  { %v11_v12 = vsub.f32 %v4_v3, %v7_v4  ;;  %v23_v13 = vsub.f32 %v15_v5, %v19_v6  ;;  %v41_v14 = vsub.f32 %v33_v8, %v37_v9  ;;  %v54_v15 = vsub.f32 %v46_v10, %v50_v11 }
   0x7   :  { %v29_v16 = vpack.c.bf16 %v23_v13, %v11_v12  ;;  %v60_v17 = vpack.c.bf16 %v54_v15, %v41_v14 }
   0x9   :  { %69 = vst [vmem:[%s111_s2] sm:$0xff] %v29_v16  ;;  %75 = vst [vmem:[%s111_s2 + $0x8] sm:$0xff] %v60_v17 }

// kernel: closed_call.214
= control target key start
LH: loop header
LB: loop body
LE: loop exit
PB: predicated region body
PF: predicated region fallthrough
CT: control target
= control target key end

     0   :  { %v172_v1 = vmov 0   ;;  %vm46_vm0 = vcmask 130048   ;;  %s217_s0 = inlined_call_operand.vmem [shape: bf16[16,512], index: 0, kind: input, shape index: {}]   ;;  %s218_s2 = inlined_call_operand.vmem [shape: f32[8,1], index: 2, kind: input, shape index: {}]   ;;  %s219_s1 = inlined_call_operand.vmem [shape: bf16[8,16], index: 1, kind: input, shape index: {}]   ;;  %s220_s3 = inlined_call_operand.vmem [shape: bf16[8,512], index: 3, kind: output, shape index: {}]  }
   0x1   :  { %v166_v0 = vld [vmem:[%s217_s0 + $0x4] ss:$16 sps:$4 sm:$0xff]   ;;  %82 = vmatprep.mubr.bf16.mxu0 %v172_v1  ;;  %123 = vmatprep.mubr.bf16.mxu1 %v172_v1  ;;  %v168_v2 = vld [vmem:[%s217_s0 + $0xc] ss:$16 sps:$4 sm:$0xff]   ;;  %v170_v3 = vld [vmem:[%s217_s0] ss:$16 sps:$4 sm:$0xff]  }
   0x2   :  { %165 = vset.pattern.permute.xlu0 %v172_v1  ;;  %50 = vmatprep.subr.bf16.mxu0 %v166_v0  ;;  %v171_v4 = vld [vmem:[%s217_s0 + $0x8] ss:$16 sps:$4 sm:$0xff]   ;;  %v20_v5 = vld [vmem:[%s218_s2] sm:$0xff] }
   0x3   :  { %91 = vmatprep.subr.bf16.mxu1 %v168_v2  ;;  %51 = vmatpush1.bf16.msra.mxu0 %v170_v3  ;;  %v15_v6 = vld [vmem:[%s219_s1] sm:$0xf] }
   0x4   :  { %92 = vmatpush1.bf16.msra.mxu1 %v171_v4  ;;  %23 = vperm.xlu0 %165, %v20_v5  }
   0x6   :  { %158 = vmatmul.mubr.msk.bf16.vlgmr.msra.gmra.mrb[0].mxu0 %vm46_vm0, %v15_v6 }
   0x7   :  { %159 = vmatmul.mubr.msk.bf16.vlgmr.msra.gmra.mrb[0].mxu1 %vm46_vm0, %v15_v6 }
  0x83   :  { %v24_v7 = vpop.permute.xlu0 %23 }
  0xd9   :  { %v84_v8 = vpop.f32.mrb[0].mxu0 }
  0xda   :  { %v125_v9 = vpop.f32.mrb[0].mxu1  ;;  %v85_v10 = vadd.f32 %v84_v8, %v24_v7  ;;  %v86_v12 = vpop.f32.mrb[1].mxu0 }
  0xdb   :  { %v126_v11 = vadd.f32 %v125_v9, %v24_v7  ;;  %v127_v13 = vpop.f32.mrb[1].mxu1  ;;  %v87_v14 = vadd.f32 %v86_v12, %v24_v7  ;;  %v88_v16 = vpop.f32.mrb[2].mxu0 }
  0xdc   :  { %v128_v15 = vadd.f32 %v127_v13, %v24_v7  ;;  %v129_v17 = vpop.f32.mrb[2].mxu1  ;;  %v89_v18 = vpop.f32.mrb[3].mxu0 }
  0xdd   :  { %v130_v19 = vpop.f32.mrb[3].mxu1  ;;  %v162_v20 = vpack.c.bf16 %v87_v14, %v85_v10 }
  0xde   :  { %v163_v21 = vpack.c.bf16 %v128_v15, %v126_v11 }
  0xdf   :  { %148 = vst [vmem:[%s220_s3] sm:$0xff] %v162_v20 }
  0xe0   :  { %149 = vst [vmem:[%s220_s3 + $0x8] sm:$0xff] %v163_v21 }

// kernel: closed_call.215
= control target key start
LH: loop header
LB: loop body
LE: loop exit
PB: predicated region body
PF: predicated region fallthrough
CT: control target
= control target key end

     0   :  { %v329_v1 = vmov 0   ;;  %vm134_vm0 = vcmask 1043456   ;;  %vm130_vm1 = vcmask 588800   ;;  %v330_v27 = vmov 1983009808   ;;  %s414_s0 = inlined_call_operand.vmem [shape: bf16[72,512], index: 0, kind: input, shape index: {}]   ;;  %s415_s2 = inlined_call_operand.vmem [shape: f32[4,1], index: 2, kind: input, shape index: {}]   ;;  %s416_s1 = inlined_call_operand.vmem [shape: bf16[4,72], index: 1, kind: input, shape index: {}]   ;;  %s417_s3 = inlined_call_operand.vmem [shape: bf16[4,512], index: 3, kind: output, shape index: {}]  }
   0x1   :  { %v301_v0 = vld [vmem:[%s414_s0 + $0x4] ss:$16 sps:$4 sm:$0xff]   ;;  %179 = vmatprep.mubr.bf16.mxu0 %v329_v1  ;;  %220 = vmatprep.mubr.bf16.mxu1 %v329_v1  ;;  %v303_v2 = vld [vmem:[%s414_s0 + $0xc] ss:$16 sps:$4 sm:$0xff]   ;;  %v305_v3 = vld [vmem:[%s414_s0] ss:$16 sps:$4 sm:$0xff]   ;;  %v252_v28 = vunpack.c.l.s4 %v330_v27  ;;  %v254_v29 = vlaneseq }
   0x2   :  { %300 = vset.pattern.permute.xlu0 %v329_v1  ;;  %147 = vmatprep.subr.bf16.mxu0 %v301_v0  ;;  %v306_v4 = vld [vmem:[%s414_s0 + $0x8] ss:$16 sps:$4 sm:$0xff]   ;;  %v307_v5 = vld [vmem:[%s414_s0 + $0x24] ss:$16 sps:$4 sm:$0xff]   ;;  %v309_v6 = vld [vmem:[%s414_s0 + $0x2c] ss:$16 sps:$4 sm:$0xff]  }
   0x3   :  { %188 = vmatprep.subr.bf16.mxu1 %v303_v2  ;;  %148 = vmatpush1.bf16.msra.mxu0 %v305_v3  ;;  %v311_v7 = vld [vmem:[%s414_s0 + $0x20] ss:$16 sps:$4 sm:$0xff]   ;;  %v312_v8 = vld [vmem:[%s414_s0 + $0x28] ss:$16 sps:$4 sm:$0xff]   ;;  %v313_v9 = vld [vmem:[%s414_s0 + $0x44] ss:$16 sps:$4 sm:$0xff]   ;;  %v253_v36 = vunpack.c.0.s8 %v252_v28 }
   0x4   :  { %189 = vmatpush1.bf16.msra.mxu1 %v306_v4  ;;  %149 = vmatprep.subr.bf16.mxu0 %v307_v5  ;;  %v315_v10 = vld [vmem:[%s414_s0 + $0x4c] ss:$16 sps:$4 sm:$0xff]   ;;  %v317_v11 = vld [vmem:[%s414_s0 + $0x40] ss:$16 sps:$4 sm:$0xff]   ;;  %v318_v12 = vld [vmem:[%s414_s0 + $0x48] ss:$16 sps:$4 sm:$0xff]  }
   0x5   :  { %190 = vmatprep.subr.bf16.mxu1 %v309_v6  ;;  %v319_v13 = vld [vmem:[%s414_s0 + $0x64] ss:$16 sps:$4 sm:$0xff]   ;;  %v321_v14 = vld [vmem:[%s414_s0 + $0x6c] ss:$16 sps:$4 sm:$0xff]   ;;  %v34_v17 = vld [vmem:[%s415_s2] sm:$0xf] }
   0x6   :  { %v32_v15 = vld [vmem:[%s414_s0 + $0x80] sm:$0xff]  ;;  %v33_v16 = vld [vmem:[%s414_s0 + $0x88] sm:$0xff]  ;;  %37 = vperm.xlu0 %300, %v34_v17   ;;  %v255_v37 = vshrl.u32 %v254_v29, 7 }
   0x7   :  { %150 = vmatpush1.bf16.msra.mxu0 %v311_v7  ;;  %v323_v18 = vld [vmem:[%s414_s0 + $0x60] ss:$16 sps:$4 sm:$0xff]   ;;  %v324_v19 = vld [vmem:[%s414_s0 + $0x68] ss:$16 sps:$4 sm:$0xff]   ;;  %v289_v20 = vcombine.high %v32_v15, %v32_v15  ;;  %v291_v21 = vcombine.high %v33_v16, %v33_v16  ;;  %v288_v22 = vcombine.low %v32_v15, %v32_v15  ;;  %v290_v23 = vcombine.low %v33_v16, %v33_v16 }
   0x8   :  { %191 = vmatpush1.bf16.msra.mxu1 %v312_v8  ;;  %151 = vmatprep.subr.bf16.mxu0 %v313_v9  ;;  %v15_v26 = vld [vmem:[%s416_s1] sm:$0x3]  ;;  %v256_v49 = vsub.s32 %v253_v36, %v255_v37 }
   0x9   :  { %192 = vmatprep.subr.bf16.mxu1 %v315_v10  ;;  %v136_v24 = vsel %vm134_vm0, %v288_v22, 0  ;;  %v142_v25 = vsel %vm134_vm0, %v290_v23, 0 }
   0xb   :  { %152 = vmatpush1.bf16.msra.mxu0 %v317_v11 }
   0xc   :  { %193 = vmatpush1.bf16.msra.mxu1 %v318_v12  ;;  %153 = vmatprep.subr.bf16.mxu0 %v319_v13 }
   0xd   :  { %194 = vmatprep.subr.bf16.mxu1 %v321_v14 }
   0xf   :  { %154 = vmatpush1.bf16.msra.mxu0 %v323_v18 }
  0x10   :  { %195 = vmatpush1.bf16.msra.mxu1 %v324_v19  ;;  %292 = vmatprep.subr.msk.bf16.mxu0 %vm134_vm0, %v289_v20 }
  0x11   :  { %294 = vmatprep.subr.msk.bf16.mxu1 %vm134_vm0, %v291_v21 }
  0x13   :  { %156 = vmatpush1.bf16.msra.mxu0 %v136_v24 }
  0x14   :  { %197 = vmatpush1.bf16.msra.mxu1 %v142_v25 }
  0x16   :  { %293 = vmatmul.mubr.msk.bf16.vlgmr.msra.gmra.mrb[0].mxu0 %vm130_vm1, %v15_v26 }
  0x17   :  { %295 = vmatmul.mubr.msk.bf16.vlgmr.msra.gmra.mrb[0].mxu1 %vm130_vm1, %v15_v26 }
  0x85   :  { %v38_v30 = vpop.permute.xlu0 %37 }
  0xe9   :  { %v181_v31 = vpop.f32.mrb[0].mxu0 }
  0xea   :  { %v222_v32 = vpop.f32.mrb[0].mxu1  ;;  %v182_v33 = vadd.f32 %v181_v31, %v38_v30  ;;  %v183_v35 = vpop.f32.mrb[1].mxu0 }
  0xeb   :  { %v223_v34 = vadd.f32 %v222_v32, %v38_v30  ;;  %v224_v38 = vpop.f32.mrb[1].mxu1  ;;  %v184_v39 = vadd.f32 %v183_v35, %v38_v30  ;;  %v185_v41 = vpop.f32.mrb[2].mxu0 }
  0xec   :  { %v225_v40 = vadd.f32 %v224_v38, %v38_v30  ;;  %v226_v42 = vpop.f32.mrb[2].mxu1  ;;  %vm229_vm2 = vcmp.ge.f32.partialorder %v182_v33, 0.0  ;;  %v233_v43 = vmul.f32 0.1, %v182_v33  ;;  %v186_v50 = vpop.f32.mrb[3].mxu0 }
  0xed   :  { %vm231_vm3 = vcmp.ge.f32.partialorder %v223_v34, 0.0  ;;  %v235_v44 = vmul.f32 0.1, %v223_v34  ;;  %vm230_vm4 = vcmp.ge.f32.partialorder %v184_v39, 0.0  ;;  %v234_v45 = vmul.f32 0.1, %v184_v39 }
  0xee   :  { %vm232_vm5 = vcmp.ge.f32.partialorder %v225_v40, 0.0  ;;  %v236_v46 = vmul.f32 0.1, %v225_v40  ;;  %v237_v47 = vsel %vm229_vm2, %v182_v33, %v233_v43  ;;  %v227_v51 = vpop.f32.mrb[3].mxu1 }
  0xef   :  { %v239_v48 = vsel %vm231_vm3, %v223_v34, %v235_v44  ;;  %v238_v52 = vsel %vm230_vm4, %v184_v39, %v234_v45 }
  0xf0   :  { %v240_v53 = vsel %vm232_vm5, %v225_v40, %v236_v46  ;;  %v296_v54 = vpack.c.bf16 %v238_v52, %v237_v47 }
  0xf1   :  { %v297_v55 = vpack.c.bf16 %v240_v53, %v239_v48 }
  0xf2   :  { %v257_v56 = vrot.slane %v296_v54, %v256_v49 }
  0xf3   :  { %v264_v57 = vrot.slane %v297_v55, %v256_v49 }
  0xf5   :  { %v265_v58 = vcombine.low %v257_v56, %v264_v57 }
  0xf7   :  { %267 = vst [vmem:[%s417_s3] sm:$0xff] %v265_v58 }

// kernel: closed_call.216
= control target key start
LH: loop header
LB: loop body
LE: loop exit
PB: predicated region body
PF: predicated region fallthrough
CT: control target
= control target key end

     0   :  { %v307_v1 = vmov 0   ;;  %vm92_vm0 = vcmask 1041408   ;;  %vm88_vm1 = vcmask 293888   ;;  %s396_s0 = inlined_call_operand.vmem [shape: bf16[36,512], index: 0, kind: input, shape index: {}]   ;;  %s397_s2 = inlined_call_operand.vmem [shape: f32[8,1], index: 2, kind: input, shape index: {}]   ;;  %s398_s1 = inlined_call_operand.vmem [shape: bf16[8,36], index: 1, kind: input, shape index: {}]   ;;  %s399_s3 = inlined_call_operand.vmem [shape: bf16[8,512], index: 3, kind: input, shape index: {}]   ;;  %s400_s4 = inlined_call_operand.vmem [shape: bf16[8,512], index: 4, kind: input, shape index: {}]   ;;  %s401_s5 = inlined_call_operand.vmem [shape: bf16[8,512], index: 5, kind: output, shape index: {}]  }
   0x1   :  { %v275_v0 = vld [vmem:[%s396_s0 + $0x4] ss:$16 sps:$4 sm:$0xff]   ;;  %137 = vmatprep.mubr.bf16.mxu0 %v307_v1  ;;  %178 = vmatprep.mubr.bf16.mxu1 %v307_v1  ;;  %v277_v2 = vld [vmem:[%s396_s0 + $0xc] ss:$16 sps:$4 sm:$0xff]   ;;  %v279_v3 = vld [vmem:[%s396_s0] ss:$16 sps:$4 sm:$0xff]  }
   0x2   :  { %274 = vset.pattern.permute.xlu0 %v307_v1  ;;  %105 = vmatprep.subr.bf16.mxu0 %v275_v0  ;;  %v280_v4 = vld [vmem:[%s396_s0 + $0x8] ss:$16 sps:$4 sm:$0xff]   ;;  %v281_v5 = vld [vmem:[%s396_s0 + $0x24] ss:$16 sps:$4 sm:$0xff]   ;;  %v283_v6 = vld [vmem:[%s396_s0 + $0x2c] ss:$16 sps:$4 sm:$0xff]  }
   0x3   :  { %146 = vmatprep.subr.bf16.mxu1 %v277_v2  ;;  %106 = vmatpush1.bf16.msra.mxu0 %v279_v3  ;;  %v285_v7 = vld [vmem:[%s396_s0 + $0x20] ss:$16 sps:$4 sm:$0xff]   ;;  %v286_v8 = vld [vmem:[%s396_s0 + $0x28] ss:$16 sps:$4 sm:$0xff]  }
   0x4   :  { %147 = vmatpush1.bf16.msra.mxu1 %v280_v4  ;;  %107 = vmatprep.subr.bf16.mxu0 %v281_v5  ;;  %v30_v9 = vld [vmem:[%s396_s0 + $0x40] sm:$0x33]  ;;  %v31_v10 = vld [vmem:[%s396_s0 + $0x48] sm:$0x33] }
   0x5   :  { %148 = vmatprep.subr.bf16.mxu1 %v283_v6  ;;  %v262_v11 = vcombine.high %v30_v9, %v30_v9  ;;  %v264_v12 = vcombine.high %v31_v10, %v31_v10  ;;  %v261_v13 = vcombine.low %v30_v9, %v30_v9  ;;  %v263_v14 = vcombine.low %v31_v10, %v31_v10  ;;  %v32_v15 = vld [vmem:[%s397_s2] sm:$0xff]  ;;  %v188_v49 = vld [vmem:[%s399_s3 + $0x8] sm:$0xff] }
   0x6   :  { %35 = vperm.xlu0 %274, %v32_v15   ;;  %v21_v18 = vld [vmem:[%s398_s1] sm:$0xf]  ;;  %v194_v52 = vld [vmem:[%s400_s4 + $0x8] sm:$0xff]  ;;  %v191_v53 = vunpack.c.l.bf16 %v188_v49  ;;  %v192_v58 = vunpack.c.h.bf16 %v188_v49 }
   0x7   :  { %108 = vmatpush1.bf16.msra.mxu0 %v285_v7  ;;  %v94_v16 = vsel %vm92_vm0, %v261_v13, 0  ;;  %v100_v17 = vsel %vm92_vm0, %v263_v14, 0  ;;  %v187_v48 = vld [vmem:[%s399_s3] sm:$0xff]  ;;  %v197_v57 = vunpack.c.l.bf16 %v194_v52  ;;  %v198_v0 = vunpack.c.h.bf16 %v194_v52 }
   0x8   :  { %149 = vmatpush1.bf16.msra.mxu1 %v286_v8  ;;  %265 = vmatprep.subr.msk.bf16.mxu0 %vm92_vm0, %v262_v11  ;;  %v193_v50 = vld [vmem:[%s400_s4] sm:$0xff]  ;;  %v189_v51 = vunpack.c.l.bf16 %v187_v48  ;;  %v190_v55 = vunpack.c.h.bf16 %v187_v48 }
   0x9   :  { %267 = vmatprep.subr.msk.bf16.mxu1 %vm92_vm0, %v264_v12  ;;  %v195_v54 = vunpack.c.l.bf16 %v193_v50  ;;  %v196_v61 = vunpack.c.h.bf16 %v193_v50 }
   0xb   :  { %110 = vmatpush1.bf16.msra.mxu0 %v94_v16 }
   0xc   :  { %151 = vmatpush1.bf16.msra.mxu1 %v100_v17 }
   0xe   :  { %266 = vmatmul.mubr.msk.bf16.vlgmr.msra.gmra.mrb[0].mxu0 %vm88_vm1, %v21_v18 }
   0xf   :  { %268 = vmatmul.mubr.msk.bf16.vlgmr.msra.gmra.mrb[0].mxu1 %vm88_vm1, %v21_v18 }
  0x85   :  { %v36_v19 = vpop.permute.xlu0 %35 }
  0xe1   :  { %v139_v20 = vpop.f32.mrb[0].mxu0 }
  0xe2   :  { %v180_v21 = vpop.f32.mrb[0].mxu1  ;;  %v140_v22 = vadd.f32 %v139_v20, %v36_v19  ;;  %v141_v24 = vpop.f32.mrb[1].mxu0 }
  0xe3   :  { %v181_v23 = vadd.f32 %v180_v21, %v36_v19  ;;  %v182_v25 = vpop.f32.mrb[1].mxu1  ;;  %v142_v26 = vadd.f32 %v141_v24, %v36_v19  ;;  %v143_v28 = vpop.f32.mrb[2].mxu0 }
  0xe4   :  { %v183_v27 = vadd.f32 %v182_v25, %v36_v19  ;;  %v184_v29 = vpop.f32.mrb[2].mxu1  ;;  %v199_v30 = vsub.f32 0.0, %v140_v22  ;;  %v144_v32 = vpop.f32.mrb[3].mxu0 }
  0xe5   :  { %v201_v31 = vsub.f32 0.0, %v181_v23  ;;  %v185_v33 = vpop.f32.mrb[3].mxu1  ;;  %v200_v34 = vsub.f32 0.0, %v142_v26 }
  0xe6   :  { %v202_v35 = vsub.f32 0.0, %v183_v27  ;;  %v203_v36 = vmul.f32 1.442695, %v199_v30 }
  0xe7   :  { %v207_v37 = vmul.f32 1.442695, %v201_v31  ;;  %v205_v38 = vmul.f32 1.442695, %v200_v34 }
  0xe8   :  { %v209_v39 = vmul.f32 1.442695, %v202_v35  ;;  %291 = vpow2.f32 %v203_v36 }
  0xe9   :  { %293 = vpow2.f32 %v207_v37 }
  0xea   :  { %295 = vpow2.f32 %v205_v38 }
  0xeb   :  { %297 = vpow2.f32 %v209_v39 }
  0xf2   :  { %v292_v40 = vpop.eup %291 }
  0xf3   :  { %v294_v41 = vpop.eup %293  ;;  %v211_v42 = vadd.f32 1.0, %v292_v40 }
  0xf4   :  { %v296_v43 = vpop.eup %295  ;;  %v213_v44 = vadd.f32 1.0, %v294_v41 }
  0xf5   :  { %v298_v45 = vpop.eup %297  ;;  %299 = vrcp.f32 %v211_v42  ;;  %v212_v46 = vadd.f32 1.0, %v296_v43 }
  0xf6   :  { %301 = vrcp.f32 %v213_v44  ;;  %v214_v47 = vadd.f32 1.0, %v298_v45 }
  0xf7   :  { %303 = vrcp.f32 %v212_v46 }
  0xf8   :  { %305 = vrcp.f32 %v214_v47 }
  0xff   :  { %v300_v56 = vpop.eup %299 }
 0x100   :  { %v302_v59 = vpop.eup %301  ;;  %v223_v60 = vmul.f32 %v300_v56, %v189_v51 }
 0x101   :  { %v304_v62 = vpop.eup %303  ;;  %v225_v63 = vmul.f32 %v302_v59, %v191_v53 }
 0x102   :  { %v306_v1 = vpop.eup %305  ;;  %v227_v2 = vadd.f32 %v223_v60, %v195_v54  ;;  %v224_v3 = vmul.f32 %v304_v62, %v190_v55 }
 0x103   :  { %v229_v4 = vadd.f32 %v225_v63, %v197_v57  ;;  %v226_v5 = vmul.f32 %v306_v1, %v192_v58 }
 0x104   :  { %v228_v6 = vadd.f32 %v224_v3, %v196_v61 }
 0x105   :  { %v230_v7 = vadd.f32 %v226_v5, %v198_v0 }
 0x106   :  { %v271_v8 = vpack.c.bf16 %v228_v6, %v227_v2 }
 0x107   :  { %v272_v9 = vpack.c.bf16 %v230_v7, %v229_v4 }
 0x108   :  { %247 = vst [vmem:[%s401_s5] sm:$0xff] %v271_v8 }
 0x109   :  { %248 = vst [vmem:[%s401_s5 + $0x8] sm:$0xff] %v272_v9 }

// kernel: closed_call.217
= control target key start
LH: loop header
LB: loop body
LE: loop exit
PB: predicated region body
PF: predicated region fallthrough
CT: control target
= control target key end

     0   :  { %v71_v0 = vlaneseq  ;;  %v1686_v2 = vmov 1983009808   ;;  %vm228_vm0 = vcmask 1041408   ;;  %vm1688_vm1 = vmmov 0   ;;  %s2480_s0 = inlined_call_operand.vmem [shape: bf16[16,2,256], index: 0, kind: input, shape index: {}]   ;;  %s2481_s2 = inlined_call_operand.vmem [shape: f32[4,1], index: 2, kind: input, shape index: {}]   ;;  %s2482_s1 = inlined_call_operand.vmem [shape: bf16[4,16], index: 1, kind: input, shape index: {}]   ;;  %s2483_s3 = inlined_call_operand.vmem [shape: bf16[16,4], index: 3, kind: input, shape index: {}]   ;;  %s2484_s4 = inlined_call_operand.vmem [shape: f32[16,1], index: 4, kind: input, shape index: {}]   ;;  %s2485_s5 = inlined_call_operand.vmem [shape: bf16[16,2,256], index: 5, kind: output, shape index: {}]  }
   0x1   :  { %v28_v1 = vld [vmem:[%s2480_s0 + $0x10] sm:$0x3]  ;;  %v69_v3 = vunpack.c.l.s4 %v1686_v2  ;;  %v20_v4 = vld [vmem:[%s2480_s0] sm:$0x3]  ;;  %v29_v5 = vld [vmem:[%s2480_s0 + $0x12] sm:$0x3] }
   0x2   :  { %v44_v6 = vunpack.c.l.bf16 %v28_v1  ;;  %v1732_v7 = vshrl.u32 %v71_v0, 7  ;;  %v21_v8 = vld [vmem:[%s2480_s0 + $0x2] sm:$0x3]  ;;  %v30_v9 = vld [vmem:[%s2480_s0 + $0x14] sm:$0x3]  ;;  %v36_v11 = vunpack.c.l.bf16 %v20_v4  ;;  %v45_v12 = vunpack.c.l.bf16 %v29_v5 }
   0x3   :  { %v70_v10 = vunpack.c.0.s8 %v69_v3  ;;  %v37_v13 = vunpack.c.l.bf16 %v21_v8  ;;  %v22_v14 = vld [vmem:[%s2480_s0 + $0x4] sm:$0x3]  ;;  %v31_v15 = vld [vmem:[%s2480_s0 + $0x16] sm:$0x3]  ;;  %v23_v16 = vld [vmem:[%s2480_s0 + $0x6] sm:$0x3]  ;;  %v46_v17 = vunpack.c.l.bf16 %v30_v9 }
   0x4   :  { %v1749_v18 = vunpack.c.l.bf16 %v22_v14  ;;  %v1751_v19 = vunpack.c.l.bf16 %v31_v15  ;;  %v1756_v21 = vunpack.c.l.bf16 %v23_v16  ;;  %v325_v22 = vmul.f32 %v36_v11, %v36_v11  ;;  %v32_v55 = vld [vmem:[%s2480_s0 + $0x18] sm:$0x3]  ;;  %v24_v56 = vld [vmem:[%s2480_s0 + $0x8] sm:$0x3] }
   0x5   :  { %v1754_v20 = vsub.s32 %v70_v10, %v1732_v7  ;;  %v326_v30 = vmul.f32 %v37_v13, %v37_v13  ;;  %v334_v49 = vmul.f32 %v45_v12, %v45_v12  ;;  %v333_v50 = vmul.f32 %v44_v6, %v44_v6 }
   0x6   :  { %v1851_v1 = vunpack.c.l.bf16 %v32_v55  ;;  %v1853_v2 = vunpack.c.l.bf16 %v24_v56  ;;  %v327_v15 = vmul.f32 %v1749_v18, %v1749_v18  ;;  %vm879_vm10 = vcmask 1041409  }
   0x7   :  { %v1759_v23 = vrot.slane %v44_v6, %v1754_v20  ;;  %v1762_v24 = vrot.slane %v36_v11, %v1754_v20  ;;  %v1765_v25 = vrot.slane %v45_v12, %v1754_v20  ;;  %v1768_v26 = vrot.slane %v37_v13, %v1754_v20 }
   0x8   :  { %v1771_v27 = vrot.slane %v46_v17, %v1754_v20  ;;  %v1775_v28 = vrot.slane %v1749_v18, %v1754_v20  ;;  %v1779_v29 = vrot.slane %v1751_v19, %v1754_v20  ;;  %v1805_v38 = vrot.slane %v1756_v21, %v1754_v20 }
   0x9   :  { %2501 = vst [vmem:[#allocation2_spill] sm:$0xff] %v1768_v26  ;;  %v1783_v31 = vcombine.high %v1759_v23, %v1759_v23  ;;  %v269_v32 = vsel %vm228_vm0, %v1759_v23, 0.0  ;;  %v1789_v33 = vcombine.high %v1762_v24, %v1762_v24  ;;  %v229_v34 = vsel %vm228_vm0, %v1762_v24, 0.0 }
   0xa   :  { %2502 = vst [vmem:[#allocation3_spill] sm:$0xff] %v1775_v28  ;;  %v1795_v35 = vcombine.high %v1765_v25, %v1765_v25  ;;  %v274_v36 = vsel %vm228_vm0, %v1765_v25, 0.0  ;;  %v1801_v37 = vcombine.high %v1768_v26, %v1768_v26  ;;  %2504 = vst [vmem:[#allocation5_spill] sm:$0xff] %v1805_v38  ;;  %v234_v41 = vsel %vm228_vm0, %v1768_v26, 0.0 }
   0xb   :  { %v270_v39 = vsel %vm228_vm0, %v1783_v31, 0.0  ;;  %v230_v40 = vsel %vm228_vm0, %v1789_v33, 0.0  ;;  %v1815_v42 = vcombine.high %v1771_v27, %v1771_v27  ;;  %v279_v47 = vsel %vm228_vm0, %v1771_v27, 0.0 }
   0xc   :  { %2503 = vst [vmem:[#allocation4_spill] sm:$0xff] %v1801_v37  ;;  %v271_v43 = vadd.f32 %v270_v39, %v269_v32  ;;  %v231_v44 = vadd.f32 %v230_v40, %v229_v34  ;;  %v275_v45 = vsel %vm228_vm0, %v1795_v35, 0.0  ;;  %v235_v46 = vsel %vm228_vm0, %v1801_v37, 0.0  ;;  %v33_v34 = vld [vmem:[%s2480_s0 + $0x1a] sm:$0x3] }
   0xd   :  { %v1825_v48 = vcombine.high %v1775_v28, %v1775_v28  ;;  %v276_v51 = vadd.f32 %v275_v45, %v274_v36  ;;  %v236_v52 = vadd.f32 %v235_v46, %v234_v41  ;;  %v280_v53 = vsel %vm228_vm0, %v1815_v42, 0.0  ;;  %v25_v40 = vld [vmem:[%s2480_s0 + $0xa] sm:$0x3] }
   0xe   :  { %272 = vadd.xlane.f32.xlu1 %v271_v43  ;;  %232 = vadd.xlane.f32.xlu0 %v231_v44  ;;  %v1831_v54 = vcombine.high %v1779_v29, %v1779_v29  ;;  %v239_v57 = vsel %vm228_vm0, %v1775_v28, 0.0  ;;  %v1845_v59 = vcombine.high %v1805_v38, %v1805_v38  ;;  %v371_v60 = vrot.slane %v326_v30, %v1754_v20 }
   0xf   :  { %2505 = vst [vmem:[#allocation6_spill] sm:$0xff] %v1825_v48  ;;  %v240_v58 = vsel %vm228_vm0, %v1825_v48, 0.0  ;;  %v363_v61 = vrot.slane %v325_v22, %v1754_v20  ;;  %v281_v62 = vadd.f32 %v280_v53, %v279_v47  ;;  %v284_v63 = vsel %vm228_vm0, %v1779_v29, 0.0 }
  0x10   :  { %2506 = vst [vmem:[#allocation7_spill] sm:$0xff] %v1845_v59  ;;  %v241_v3 = vadd.f32 %v240_v58, %v239_v57  ;;  %v285_v4 = vsel %vm228_vm0, %v1831_v54, 0.0  ;;  %v372_v5 = vcombine.high %v371_v60, %v371_v60  ;;  %v435_v6 = vrot.slane %v334_v49, %v1754_v20 }
  0x11   :  { %v244_v8 = vsel %vm228_vm0, %v1805_v38, 0.0  ;;  %v245_v9 = vsel %vm228_vm0, %v1845_v59, 0.0  ;;  %v364_v10 = vcombine.high %v363_v61, %v363_v61  ;;  %v427_v11 = vrot.slane %v333_v50, %v1754_v20 }
  0x12   :  { %277 = vadd.xlane.f32.xlu1 %v276_v51  ;;  %237 = vadd.xlane.f32.xlu0 %v236_v52  ;;  %v335_v12 = vmul.f32 %v46_v17, %v46_v17  ;;  %v286_v13 = vadd.f32 %v285_v4, %v284_v63  ;;  %v522_v14 = vsel %vm228_vm0, %v371_v60, 0.0  ;;  %v246_v16 = vadd.f32 %v245_v9, %v244_v8  ;;  %v26_v8 = vld [vmem:[%s2480_s0 + $0xc] sm:$0x3] }
  0x13   :  { %v523_v22 = vsel %vm228_vm0, %v372_v5, 0.0  ;;  %v517_v30 = vsel %vm228_vm0, %v363_v61, 0.0  ;;  %v436_v32 = vcombine.high %v435_v6, %v435_v6  ;;  %v518_v17 = vsel %vm228_vm0, %v364_v10, 0.0 }
  0x14   :  { %v428_v36 = vcombine.high %v427_v11, %v427_v11  ;;  %v1874_v39 = vrot.slane %v1851_v1, %v1754_v20  ;;  %v1878_v18 = vrot.slane %v1853_v2, %v1754_v20  ;;  %v443_v41 = vrot.slane %v335_v12, %v1754_v20 }
  0x15   :  { %v562_v43 = vsel %vm228_vm0, %v435_v6, 0.0  ;;  %v379_v44 = vrot.slane %v327_v15, %v1754_v20  ;;  %v1886_v45 = vunpack.c.l.bf16 %v33_v34  ;;  %v524_v46 = vadd.f32 %v523_v22, %v522_v14 }
  0x16   :  { %282 = vadd.xlane.f32.xlu1 %v281_v62  ;;  %242 = vadd.xlane.f32.xlu0 %v241_v3  ;;  %2507 = vst [vmem:[#allocation8_spill] sm:$0xff] %v1878_v18  ;;  %v519_v47 = vadd.f32 %v518_v17, %v517_v30  ;;  %v563_v49 = vsel %vm228_vm0, %v436_v32, 0.0  ;;  %v1889_v50 = vunpack.c.l.bf16 %v25_v40  ;;  %v557_v51 = vsel %vm228_vm0, %v427_v11, 0.0  ;;  %v34_v62 = vld [vmem:[%s2480_s0 + $0x1c] sm:$0x3] }
  0x17   :  { %v558_v52 = vsel %vm228_vm0, %v428_v36, 0.0  ;;  %v1895_v53 = vcombine.high %v1874_v39, %v1874_v39  ;;  %v1899_v55 = vcombine.high %v1878_v18, %v1878_v18  ;;  %v444_v56 = vcombine.high %v443_v41, %v443_v41 }
  0x18   :  { %v380_v57 = vcombine.high %v379_v44, %v379_v44  ;;  %v1903_v58 = vrot.slane %v1886_v45, %v1754_v20  ;;  %v336_v60 = vmul.f32 %v1751_v19, %v1751_v19  ;;  %v328_v61 = vmul.f32 %v1756_v21, %v1756_v21 }
  0x19   :  { %2508 = vst [vmem:[#allocation9_spill] sm:$0xff] %v1899_v55  ;;  %v564_v63 = vadd.f32 %v563_v49, %v562_v43  ;;  %v559_v3 = vadd.f32 %v558_v52, %v557_v51  ;;  %v1914_v4 = vrot.slane %v1889_v50, %v1754_v20  ;;  %v289_v5 = vsel %vm228_vm0, %v1874_v39, 0.0 }
  0x1a   :  { %287 = vadd.xlane.f32.xlu1 %v286_v13  ;;  %247 = vadd.xlane.f32.xlu0 %v246_v16  ;;  %v290_v19 = vsel %vm228_vm0, %v1895_v53, 0.0  ;;  %v249_v21 = vsel %vm228_vm0, %v1878_v18, 0.0  ;;  %v250_v6 = vsel %vm228_vm0, %v1899_v55, 0.0  ;;  %v567_v9 = vsel %vm228_vm0, %v443_v41, 0.0 }
  0x1b   :  { %2509 = vst [vmem:[#allocation10_spill] sm:$0xff] %v1914_v4  ;;  %v568_v10 = vsel %vm228_vm0, %v444_v56, 0.0  ;;  %v527_v11 = vsel %vm228_vm0, %v379_v44, 0.0  ;;  %v50_v12 = vunpack.c.l.bf16 %v34_v62  ;;  %v528_v13 = vsel %vm228_vm0, %v380_v57, 0.0  ;;  %v35_v57 = vld [vmem:[%s2480_s0 + $0x1e] sm:$0x3] }
  0x1c   :  { %v1933_v14 = vcombine.high %v1903_v58, %v1903_v58  ;;  %v451_v15 = vrot.slane %v336_v60, %v1754_v20  ;;  %v387_v16 = vrot.slane %v328_v61, %v1754_v20  ;;  %v291_v22 = vadd.f32 %v290_v19, %v289_v5 }
  0x1d   :  { %v251_v30 = vadd.f32 %v250_v6, %v249_v21  ;;  %v1939_v32 = vcombine.high %v1914_v4, %v1914_v4  ;;  %v42_v34 = vunpack.c.l.bf16 %v26_v8  ;;  %v569_v17 = vadd.f32 %v568_v10, %v567_v9 }
  0x1e   :  { %525 = vadd.xlane.f32.xlu1 %v524_v46  ;;  %520 = vadd.xlane.f32.xlu0 %v519_v47  ;;  %v529_v36 = vadd.f32 %v528_v13, %v527_v11  ;;  %v294_v40 = vsel %vm228_vm0, %v1903_v58, 0.0  ;;  %v1944_v41 = vrot.slane %v50_v12, %v1754_v20  ;;  %v295_v43 = vsel %vm228_vm0, %v1933_v14, 0.0 }
  0x1f   :  { %2510 = vst [vmem:[#allocation11_spill] sm:$0xff] %v1939_v32  ;;  %v254_v44 = vsel %vm228_vm0, %v1914_v4, 0.0  ;;  %v452_v46 = vcombine.high %v451_v15, %v451_v15  ;;  %v388_v47 = vcombine.high %v387_v16, %v387_v16  ;;  %v255_v49 = vsel %vm228_vm0, %v1939_v32, 0.0 }
  0x20   :  { %v1953_v51 = vrot.slane %v42_v34, %v1754_v20  ;;  %v337_v52 = vmul.f32 %v1851_v1, %v1851_v1  ;;  %v329_v56 = vmul.f32 %v1853_v2, %v1853_v2  ;;  %v296_v60 = vadd.f32 %v295_v43, %v294_v40 }
  0x21   :  { %v572_v61 = vsel %vm228_vm0, %v451_v15, 0.0  ;;  %v1965_v62 = vcombine.high %v1944_v41, %v1944_v41  ;;  %v573_v1 = vsel %vm228_vm0, %v452_v46, 0.0  ;;  %v532_v2 = vsel %vm228_vm0, %v387_v16, 0.0 }
  0x22   :  { %565 = vadd.xlane.f32.xlu1 %v564_v63  ;;  %560 = vadd.xlane.f32.xlu0 %v559_v3  ;;  %v27_v63 = vld [vmem:[%s2480_s0 + $0xe] sm:$0x3]  ;;  %v256_v3 = vadd.f32 %v255_v49, %v254_v44  ;;  %v533_v5 = vsel %vm228_vm0, %v388_v47, 0.0  ;;  %v1975_v19 = vcombine.high %v1953_v51, %v1953_v51  ;;  %v459_v21 = vrot.slane %v337_v52, %v1754_v20 }
  0x23   :  { %2511 = vst [vmem:[#allocation12_spill] sm:$0xff] %v1965_v62  ;;  %v395_v6 = vrot.slane %v329_v56, %v1754_v20  ;;  %v51_v8 = vunpack.c.l.bf16 %v35_v57  ;;  %v43_v9 = vunpack.c.l.bf16 %v27_v63  ;;  %v574_v10 = vadd.f32 %v573_v1, %v572_v61 }
  0x24   :  { %v299_v11 = vsel %vm228_vm0, %v1944_v41, 0.0  ;;  %v300_v13 = vsel %vm228_vm0, %v1965_v62, 0.0  ;;  %v534_v15 = vadd.f32 %v533_v5, %v532_v2  ;;  %v259_v16 = vsel %vm228_vm0, %v1953_v51, 0.0 }
  0x25   :  { %v396_v40 = vcombine.high %v395_v6, %v395_v6  ;;  %v1992_v43 = vrot.slane %v51_v8, %v1754_v20  ;;  %v1995_v44 = vrot.slane %v43_v9, %v1754_v20  ;;  %v301_v46 = vadd.f32 %v300_v13, %v299_v11 }
  0x26   :  { %292 = vadd.xlane.f32.xlu1 %v291_v22  ;;  %252 = vadd.xlane.f32.xlu0 %v251_v30  ;;  %v338_v22 = vmul.f32 %v1886_v45, %v1886_v45  ;;  %v330_v30 = vmul.f32 %v1889_v50, %v1889_v50  ;;  %v339_v47 = vmul.f32 %v50_v12, %v50_v12  ;;  %v577_v45 = vsel %vm228_vm0, %v459_v21, 0.0 }
  0x27   :  { %2512 = vst [vmem:[#allocation13_spill] sm:$0xff] %v1992_v43  ;;  %2513 = vst [vmem:[#allocation14_spill] sm:$0xff] %v1995_v44  ;;  %v537_v50 = vsel %vm228_vm0, %v395_v6, 0.0  ;;  %v538_v57 = vsel %vm228_vm0, %v396_v40, 0.0  ;;  %v2009_v12 = vcombine.high %v1995_v44, %v1995_v44  ;;  %v331_v63 = vmul.f32 %v42_v34, %v42_v34 }
  0x28   :  { %v467_v52 = vrot.slane %v338_v22, %v1754_v20  ;;  %v403_v61 = vrot.slane %v330_v30, %v1754_v20  ;;  %v539_v1 = vadd.f32 %v538_v57, %v537_v50  ;;  %v304_v2 = vsel %vm228_vm0, %v1992_v43, 0.0 }
  0x29   :  { %2515 = vst [vmem:[#allocation16_spill] sm:$0xff] %v2009_v12  ;;  %v475_v5 = vrot.slane %v339_v47, %v1754_v20  ;;  %v264_v6 = vsel %vm228_vm0, %v1995_v44, 0.0  ;;  %v265_v34 = vsel %vm228_vm0, %v2009_v12, 0.0  ;;  %v411_v13 = vrot.slane %v331_v63, %v1754_v20 }
  0x2a   :  { %570 = vadd.xlane.f32.xlu1 %v569_v17  ;;  %530 = vadd.xlane.f32.xlu0 %v529_v36  ;;  %v260_v17 = vsel %vm228_vm0, %v1975_v19, 0.0  ;;  %v460_v36 = vcombine.high %v459_v21, %v459_v21  ;;  %v404_v11 = vcombine.high %v403_v61, %v403_v61  ;;  %v582_v22 = vsel %vm228_vm0, %v467_v52, 0.0 }
  0x2b   :  { %v261_v49 = vadd.f32 %v260_v17, %v259_v16  ;;  %v332_v16 = vmul.f32 %v43_v9, %v43_v9  ;;  %v542_v30 = vsel %vm228_vm0, %v403_v61, 0.0  ;;  %v547_v57 = vsel %vm228_vm0, %v411_v13, 0.0 }
  0x2c   :  { %v578_v56 = vsel %vm228_vm0, %v460_v36, 0.0  ;;  %v266_v36 = vadd.f32 %v265_v34, %v264_v6  ;;  %v543_v47 = vsel %vm228_vm0, %v404_v11, 0.0  ;;  %v1687_v34 = vmov 0.0|0.0  }
  0x2d   :  { %v419_v50 = vrot.slane %v332_v16, %v1754_v20  ;;  %v544_v9 = vadd.f32 %v543_v47, %v542_v30  ;;  %1635 = vmatprep.subr.bf16.mxu0 %v1687_v34  ;;  %v791_v16 = vld [vmem:[%s2481_s2] sm:$0xf] }
  0x2e   :  { %297 = vadd.xlane.f32.xlu1 %v296_v60  ;;  %257 = vadd.xlane.f32.xlu0 %v256_v3  ;;  %v2004_v60 = vcombine.high %v1992_v43, %v1992_v43  ;;  %v579_v3 = vadd.f32 %v578_v56, %v577_v45 }
  0x2f   :  { %v552_v6 = vsel %vm228_vm0, %v419_v50, 0.0 }
  0x30   :  { %2514 = vst [vmem:[#allocation15_spill] sm:$0xff] %v2004_v60  ;;  %v305_v21 = vsel %vm228_vm0, %v2004_v60, 0.0 }
  0x31   :  { %v306_v17 = vadd.f32 %v305_v21, %v304_v2 }
  0x32   :  { %575 = vadd.xlane.f32.xlu1 %v574_v10  ;;  %535 = vadd.xlane.f32.xlu0 %v534_v15  ;;  %v468_v10 = vcombine.high %v467_v52, %v467_v52  ;;  %v340_v15 = vmul.f32 %v51_v8, %v51_v8  ;;  %v587_v52 = vsel %vm228_vm0, %v475_v5, 0.0 }
  0x34   :  { %v583_v40 = vsel %vm228_vm0, %v468_v10, 0.0  ;;  %v483_v45 = vrot.slane %v340_v15, %v1754_v20  ;;  %v1690_v15 = vmov 0  }
  0x35   :  { %v584_v8 = vadd.f32 %v583_v40, %v582_v22  ;;  %1644 = vset.pattern.permute.xlu0 %v1690_v15  ;;  %1645 = vset.pattern.permute.xlu1 %v1690_v15 }
  0x36   :  { %302 = vadd.xlane.f32.xlu1 %v301_v46  ;;  %262 = vadd.xlane.f32.xlu0 %v261_v49  ;;  %v476_v46 = vcombine.high %v475_v5, %v475_v5  ;;  %v412_v49 = vcombine.high %v411_v13, %v411_v13  ;;  %v484_v63 = vcombine.high %v483_v45, %v483_v45  ;;  %v592_v20 = vsel %vm228_vm0, %v483_v45, 0.0 }
  0x37   :  { %v1689_v13 = vmov 0.0  }
  0x38   :  { %v588_v56 = vsel %vm228_vm0, %v476_v46, 0.0  ;;  %v548_v61 = vsel %vm228_vm0, %v412_v49, 0.0  ;;  %v593_v21 = vsel %vm228_vm0, %v484_v63, 0.0  ;;  %1627 = vmatprep.mubr.msk.f32.mxu0 %vm1688_vm1, %v1689_v13 }
  0x39   :  { %v549_v2 = vadd.f32 %v548_v61, %v547_v57  ;;  %v594_v10 = vadd.f32 %v593_v21, %v592_v20 }
  0x3a   :  { %580 = vadd.xlane.f32.xlu1 %v579_v3  ;;  %540 = vadd.xlane.f32.xlu0 %v539_v1  ;;  %v420_v3 = vcombine.high %v419_v50, %v419_v50  ;;  %v589_v1 = vadd.f32 %v588_v56, %v587_v52 }
  0x3c   :  { %v553_v5 = vsel %vm228_vm0, %v420_v3, 0.0 }
  0x3d   :  { %v554_v11 = vadd.f32 %v553_v5, %v552_v6 }
  0x3e   :  { %307 = vadd.xlane.f32.xlu1 %v306_v17  ;;  %267 = vadd.xlane.f32.xlu0 %v266_v36 }
  0x42   :  { %585 = vadd.xlane.f32.xlu1 %v584_v8  ;;  %545 = vadd.xlane.f32.xlu0 %v544_v9 }
  0x46   :  { %590 = vadd.xlane.f32.xlu1 %v589_v1  ;;  %550 = vadd.xlane.f32.xlu0 %v549_v2 }
  0x4a   :  { %595 = vadd.xlane.f32.xlu1 %v594_v10  ;;  %555 = vadd.xlane.f32.xlu0 %v554_v11 }
  0x60   :  { %794 = vperm.xlu0 %1644, %v791_v16  }
  0x9b   :  { %v273_v22 = vpop.xlane.xlu1 %272  ;;  %v233_v30 = vpop.xlane.xlu0 %232 }
  0x9c   :  { %v2038_v45 = vmul.f32 0.00390625, %v233_v30  ;;  %v2046_v63 = vmul.f32 0.00390625, %v273_v22 }
  0x9e   :  { %v613_v52 = vmul.f32 %v2038_v45, %v2038_v45  ;;  %v621_v34 = vmul.f32 %v2046_v63, %v2046_v63 }
  0x9f   :  { %v278_v17 = vpop.xlane.xlu1 %277  ;;  %v238_v36 = vpop.xlane.xlu0 %237 }
  0xa0   :  { %v2040_v50 = vmul.f32 0.00390625, %v238_v36  ;;  %v2048_v3 = vmul.f32 0.00390625, %v278_v17 }
  0xa2   :  { %v614_v56 = vmul.f32 %v2040_v50, %v2040_v50  ;;  %v622_v13 = vmul.f32 %v2048_v3, %v2048_v3 }
  0xa3   :  { %v283_v40 = vpop.xlane.xlu1 %282  ;;  %v243_v46 = vpop.xlane.xlu0 %242 }
  0xa4   :  { %v2060_v17 = vmul.f32 0.00390625, %v283_v40  ;;  %v2062_v36 = vmul.f32 0.00390625, %v243_v46 }
  0xa7   :  { %v288_v47 = vpop.xlane.xlu1 %287  ;;  %v248_v49 = vpop.xlane.xlu0 %247 }
  0xab   :  { %v526_v8 = vpop.xlane.xlu1 %525  ;;  %v521_v9 = vpop.xlane.xlu0 %520 }
  0xac   :  { %v598_v57 = vmul.f32 0.00390625, %v526_v8  ;;  %v597_v61 = vmul.f32 0.00390625, %v521_v9 }
  0xae   :  { %v630_v1 = vsub.f32 %v598_v57, %v614_v56  ;;  %v629_v2 = vsub.f32 %v597_v61, %v613_v52  ;;  %v623_v57 = vmul.f32 %v2060_v17, %v2060_v17  ;;  %v615_v61 = vmul.f32 %v2062_v36, %v2062_v36 }
  0xaf   :  { %v566_v20 = vpop.xlane.xlu1 %565  ;;  %v561_v21 = vpop.xlane.xlu0 %560 }
  0xb0   :  { %v2050_v6 = vmax.f32 %v630_v1, 0.0  ;;  %v2052_v5 = vmax.f32 %v629_v2, 0.0  ;;  %v606_v10 = vmul.f32 0.00390625, %v566_v20  ;;  %v605_v11 = vmul.f32 0.00390625, %v561_v21 }
  0xb1   :  { %v814_v20 = vand.u32 127, %v71_v0  ;;  %v2075_v21 = vmul.f32 0.00390625, %v288_v47 }
  0xb2   :  { %1646 = vrsqrt.f32 %v2052_v5  ;;  %v638_v22 = vsub.f32 %v606_v10, %v622_v13  ;;  %v637_v30 = vsub.f32 %v605_v11, %v621_v34  ;;  %v2077_v10 = vmul.f32 0.00390625, %v248_v49 }
  0xb3   :  { %v293_v15 = vpop.xlane.xlu1 %292  ;;  %v253_v16 = vpop.xlane.xlu0 %252  ;;  %1648 = vrsqrt.f32 %v2050_v6  ;;  %v2087_v0 = vsub.s32 %v814_v20, %v1732_v7  ;;  %v624_v47 = vmul.f32 %v2075_v21, %v2075_v21  ;;  %vm670_vm2 = vcmp.eq.f32.partialorder %v2050_v6, inf }
  0xb4   :  { %v2064_v8 = vmax.f32 %v638_v22, 0.0  ;;  %v2066_v9 = vmax.f32 %v637_v30, 0.0  ;;  %v616_v49 = vmul.f32 %v2077_v10, %v2077_v10  ;;  %vm672_vm3 = vcmp.eq.f32.partialorder %v2050_v6, 0.0 }
  0xb5   :  { %vm663_vm4 = vcmp.eq.f32.partialorder %v2052_v5, inf  ;;  %vm665_vm5 = vcmp.eq.f32.partialorder %v2052_v5, 0.0 }
  0xb6   :  { %1650 = vrsqrt.f32 %v2064_v8  ;;  %vm726_vm6 = vcmp.eq.f32.partialorder %v2064_v8, inf  ;;  %vm728_vm7 = vcmp.eq.f32.partialorder %v2064_v8, 0.0  ;;  %vm719_vm8 = vcmp.eq.f32.partialorder %v2066_v9, inf }
  0xb7   :  { %v571_v52 = vpop.xlane.xlu1 %570  ;;  %v531_v56 = vpop.xlane.xlu0 %530  ;;  %1652 = vrsqrt.f32 %v2066_v9  ;;  %vm721_vm9 = vcmp.eq.f32.partialorder %v2066_v9, 0.0 }
  0xb8   :  { %v607_v40 = vmul.f32 0.00390625, %v571_v52  ;;  %v599_v1 = vmul.f32 0.00390625, %v531_v56  ;;  %v2084_v52 = vmul.f32 0.00390625, %v293_v15  ;;  %v673_v15 = vand.u32 2147483648, %v2050_v6 }
  0xba   :  { %v639_v11 = vsub.f32 %v607_v40, %v623_v57  ;;  %v631_v34 = vsub.f32 %v599_v1, %v615_v61  ;;  %v2094_v57 = vmul.f32 0.00390625, %v253_v16 }
  0xbb   :  { %v298_v46 = vpop.xlane.xlu1 %297  ;;  %v258_v2 = vpop.xlane.xlu0 %257 }
  0xbc   :  { %v1647_v13 = vpop.eup %1646  ;;  %v2079_v30 = vmax.f32 %v639_v11, 0.0  ;;  %v2081_v60 = vmax.f32 %v631_v34, 0.0  ;;  %v666_v11 = vand.u32 2147483648, %v2052_v5  ;;  %v625_v34 = vmul.f32 %v2084_v52, %v2084_v52 }
  0xbd   :  { %v1649_v22 = vpop.eup %1648  ;;  %v662_v43 = vmul.f32 %v1647_v13, %v2052_v5  ;;  %v617_v4 = vmul.f32 %v2094_v57, %v2094_v57  ;;  %v2110_v55 = vmul.f32 0.00390625, %v298_v46  ;;  %v2116_v59 = vmul.f32 0.00390625, %v258_v2 }
  0xbe   :  { %v669_v61 = vmul.f32 %v1649_v22, %v2050_v6  ;;  %1654 = vrsqrt.f32 %v2081_v60  ;;  %v729_v46 = vand.u32 2147483648, %v2064_v8  ;;  %vm733_vm11 = vcmp.eq.f32.partialorder %v2079_v30, inf }
  0xbf   :  { %v576_v56 = vpop.xlane.xlu1 %575  ;;  %v536_v12 = vpop.xlane.xlu0 %535  ;;  %1656 = vrsqrt.f32 %v2079_v30  ;;  %v664_v16 = vsel %vm663_vm4, %v2052_v5, %v662_v43  ;;  %vm735_vm12 = vcmp.eq.f32.partialorder %v2079_v30, 0.0  ;;  %vm677_vm13 = vcmp.eq.f32.partialorder %v2081_v60, inf }
  0xc0   :  { %v1651_v40 = vpop.eup %1650  ;;  %v608_v1 = vmul.f32 0.00390625, %v576_v56  ;;  %v600_v13 = vmul.f32 0.00390625, %v536_v12  ;;  %v671_v43 = vsel %vm670_vm2, %v2050_v6, %v669_v61  ;;  %v667_v12 = vsel %vm665_vm5, %v666_v11, %v664_v16 }
  0xc1   :  { %v1653_v20 = vpop.eup %1652  ;;  %v725_v32 = vmul.f32 %v1651_v40, %v2064_v8  ;;  %v674_v5 = vsel %vm672_vm3, %v673_v15, %v671_v43  ;;  %v2140_v16 = vmul.f32 %v2116_v59, %v2116_v59  ;;  %vm679_vm14 = vcmp.eq.f32.partialorder %v2081_v60, 0.0 }
  0xc2   :  { %v640_v18 = vsub.f32 %v608_v1, %v624_v47  ;;  %v718_v56 = vmul.f32 %v1653_v20, %v2066_v9  ;;  %v632_v38 = vsub.f32 %v600_v13, %v616_v49  ;;  %v722_v1 = vand.u32 2147483648, %v2066_v9 }
  0xc3   :  { %v303_v22 = vpop.xlane.xlu1 %302  ;;  %v263_v44 = vpop.xlane.xlu0 %262  ;;  %v727_v49 = vsel %vm726_vm6, %v2064_v8, %v725_v32  ;;  %v736_v13 = vand.u32 2147483648, %v2079_v30  ;;  %v774_v28 = vadd.f32 %v674_v5, %v2040_v50  ;;  %v680_v8 = vand.u32 2147483648, %v2081_v60 }
  0xc4   :  { %v2122_v40 = vmax.f32 %v640_v18, 0.0  ;;  %v2127_v47 = vmax.f32 %v632_v38, 0.0  ;;  %v2135_v18 = vmul.f32 %v2110_v55, %v2110_v55  ;;  %v720_v20 = vsel %vm719_vm8, %v2066_v9, %v718_v56 }
  0xc5   :  { %v773_v38 = vadd.f32 %v667_v12, %v2038_v45  ;;  %v730_v11 = vsel %vm728_vm7, %v729_v46, %v727_v49  ;;  %v2149_v43 = vmul.f32 0.00390625, %v303_v22  ;;  %v723_v12 = vsel %vm721_vm9, %v722_v1, %v720_v20 }
  0xc6   :  { %1658 = vrsqrt.f32 %v2122_v40  ;;  %v2154_v37 = vmul.f32 0.00390625, %v263_v44  ;;  %v782_v44 = vadd.f32 %v730_v11, %v2048_v3  ;;  %v781_v1 = vadd.f32 %v723_v12, %v2046_v63 }
  0xc7   :  { %v581_v2 = vpop.xlane.xlu1 %580  ;;  %v541_v61 = vpop.xlane.xlu0 %540  ;;  %1660 = vrsqrt.f32 %v2127_v47  ;;  %v818_v22 = vrot.slane %v773_v38, %v2087_v0  ;;  %v822_v20 = vrot.slane %v774_v28, %v2087_v0  ;;  %vm740_vm15 = vcmp.eq.f32.partialorder %v2122_v40, inf }
  0xc8   :  { %v609_v32 = vmul.f32 0.00390625, %v581_v2  ;;  %v601_v6 = vmul.f32 0.00390625, %v541_v61  ;;  %v1655_v15 = vpop.eup %1654  ;;  %vm684_vm0 = vcmp.eq.f32.partialorder %v2127_v47, inf  ;;  %v687_v63 = vand.u32 2147483648, %v2127_v47 }
  0xc9   :  { %v1657_v45 = vpop.eup %1656  ;;  %v676_v50 = vmul.f32 %v1655_v15, %v2081_v60  ;;  %vm742_vm1 = vcmp.eq.f32.partialorder %v2122_v40, 0.0  ;;  %vm686_vm2 = vcmp.eq.f32.partialorder %v2127_v47, 0.0  ;;  %vm881_vm7 = vcmask 1042434  }
  0xca   :  { %v641_v2 = vsub.f32 %v609_v32, %v625_v34  ;;  %v633_v61 = vsub.f32 %v601_v6, %v617_v4  ;;  %v732_v4 = vmul.f32 %v1657_v45, %v2079_v30  ;;  %v627_v34 = vmul.f32 %v2149_v43, %v2149_v43 }
  0xcb   :  { %v308_v56 = vpop.xlane.xlu1 %307  ;;  %v268_v48 = vpop.xlane.xlu0 %267  ;;  %v619_v32 = vmul.f32 %v2154_v37, %v2154_v37  ;;  %v678_v28 = vsel %vm677_vm13, %v2081_v60, %v676_v50  ;;  %v854_v45 = vrot.slane %v782_v44, %v2087_v0  ;;  %v2197_v44 = vsel %vm879_vm10, %v822_v20, %v818_v22 }
  0xcc   :  { %v2162_v46 = vmax.f32 %v641_v2, 0.0  ;;  %v2164_v9 = vmax.f32 %v633_v61, 0.0  ;;  %v2176_v6 = vmul.f32 0.00390625, %v308_v56  ;;  %v2180_v3 = vmul.f32 0.00390625, %v268_v48 }
  0xcd   :  { %v734_v12 = vsel %vm733_vm11, %v2079_v30, %v732_v4 }
  0xce   :  { %1662 = vrsqrt.f32 %v2162_v46  ;;  %v628_v38 = vmul.f32 %v2176_v6, %v2176_v6  ;;  %v737_v22 = vsel %vm735_vm12, %v736_v13, %v734_v12  ;;  %vm747_vm3 = vcmp.eq.f32.partialorder %v2162_v46, inf }
  0xcf   :  { %v586_v5 = vpop.xlane.xlu1 %585  ;;  %v546_v49 = vpop.xlane.xlu0 %545  ;;  %1664 = vrsqrt.f32 %v2164_v9  ;;  %v750_v30 = vand.u32 2147483648, %v2162_v46  ;;  %vm691_vm4 = vcmp.eq.f32.partialorder %v2164_v9, inf  ;;  %vm693_vm5 = vcmp.eq.f32.partialorder %v2164_v9, 0.0 }
  0xd0   :  { %v610_v15 = vmul.f32 0.00390625, %v586_v5  ;;  %v602_v11 = vmul.f32 0.00390625, %v546_v49  ;;  %v1659_v56 = vpop.eup %1658  ;;  %v850_v49 = vrot.slane %v781_v1, %v2087_v0  ;;  %v681_v1 = vsel %vm679_vm14, %v680_v8, %v678_v28 }
  0xd1   :  { %v1661_v50 = vpop.eup %1660  ;;  %v2225_v8 = vadd.f32 %v681_v1, %v2062_v36  ;;  %vm749_vm6 = vcmp.eq.f32.partialorder %v2162_v46, 0.0 }
  0xd2   :  { %v642_v48 = vsub.f32 %v610_v15, %v2135_v18  ;;  %v634_v2 = vsub.f32 %v602_v11, %v2140_v16  ;;  %v620_v18 = vmul.f32 %v2180_v3, %v2180_v3  ;;  %v739_v15 = vmul.f32 %v1659_v56, %v2122_v40 }
  0xd3   :  { %v591_v61 = vpop.xlane.xlu1 %590  ;;  %v551_v5 = vpop.xlane.xlu0 %550  ;;  %v683_v20 = vmul.f32 %v1661_v50, %v2127_v47  ;;  %v694_v50 = vand.u32 2147483648, %v2164_v9 }
  0xd4   :  { %v611_v26 = vmul.f32 0.00390625, %v591_v61  ;;  %v603_v62 = vmul.f32 0.00390625, %v551_v5  ;;  %v2203_v16 = vmax.f32 %v642_v48, 0.0  ;;  %v2205_v4 = vmax.f32 %v634_v2, 0.0 }
  0xd5   :  { %v2216_v2 = vsel %vm879_vm10, %v854_v45, %v850_v49  ;;  %v741_v28 = vsel %vm740_vm15, %v2122_v40, %v739_v15  ;;  %v685_v12 = vsel %vm684_vm0, %v2127_v47, %v683_v20  ;;  %vm887_vm0 = vcmask 1045509  }
  0xd6   :  { %v643_v11 = vsub.f32 %v611_v26, %v627_v34  ;;  %v635_v61 = vsub.f32 %v603_v62, %v619_v32  ;;  %1666 = vrsqrt.f32 %v2203_v16  ;;  %v2228_v34 = vadd.f32 %v737_v22, %v2060_v17 }
  0xd7   :  { %v596_v48 = vpop.xlane.xlu1 %595  ;;  %v556_v5 = vpop.xlane.xlu0 %555  ;;  %1668 = vrsqrt.f32 %v2205_v4  ;;  %vm698_vm8 = vcmp.eq.f32.partialorder %v2205_v4, inf  ;;  %vm700_vm9 = vcmp.eq.f32.partialorder %v2205_v4, 0.0  ;;  %v701_v20 = vand.u32 2147483648, %v2205_v4 }
  0xd8   :  { %v2219_v60 = vmax.f32 %v643_v11, 0.0  ;;  %v2221_v26 = vmax.f32 %v635_v61, 0.0  ;;  %v612_v62 = vmul.f32 0.00390625, %v596_v48  ;;  %v604_v13 = vmul.f32 0.00390625, %v556_v5  ;;  %v1663_v32 = vpop.eup %1662 }
  0xd9   :  { %v1665_v56 = vpop.eup %1664  ;;  %v746_v36 = vmul.f32 %v1663_v32, %v2162_v46  ;;  %v858_v11 = vrot.slane %v2228_v34, %v2087_v0  ;;  %v2516_v61 = vand.u32 2147483648, %v2122_v40  ;;  %vm754_vm11 = vcmp.eq.f32.partialorder %v2203_v16, inf }
  0xda   :  { %1670 = vrsqrt.f32 %v2219_v60  ;;  %v644_v45 = vsub.f32 %v612_v62, %v628_v38  ;;  %v636_v17 = vsub.f32 %v604_v13, %v620_v18  ;;  %v690_v49 = vmul.f32 %v1665_v56, %v2164_v9 }
  0xdb   :  { %1672 = vrsqrt.f32 %v2221_v26  ;;  %v826_v38 = vrot.slane %v2225_v8, %v2087_v0  ;;  %v688_v18 = vsel %vm686_vm2, %v687_v63, %v685_v12  ;;  %v744_v22 = vsel %vm742_vm1, %v2516_v61, %v741_v28 }
  0xdc   :  { %v2242_v1 = vmax.f32 %v644_v45, 0.0  ;;  %v2245_v15 = vmax.f32 %v636_v17, 0.0  ;;  %v748_v48 = vsel %vm747_vm3, %v2162_v46, %v746_v36  ;;  %v692_v47 = vsel %vm691_vm4, %v2164_v9, %v690_v49 }
  0xdd   :  { %vm705_vm10 = vcmp.eq.f32.partialorder %v2221_v26, inf  ;;  %vm756_vm12 = vcmp.eq.f32.partialorder %v2203_v16, 0.0  ;;  %vm707_vm13 = vcmp.eq.f32.partialorder %v2221_v26, 0.0  ;;  %v708_v63 = vand.u32 2147483648, %v2221_v26 }
  0xde   :  { %1674 = vrsqrt.f32 %v2242_v1  ;;  %v757_v5 = vand.u32 2147483648, %v2203_v16  ;;  %vm761_vm14 = vcmp.eq.f32.partialorder %v2219_v60, inf  ;;  %v751_v8 = vsel %vm749_vm6, %v750_v30, %v748_v48 }
  0xdf   :  { %1676 = vrsqrt.f32 %v2245_v15  ;;  %vm763_vm15 = vcmp.eq.f32.partialorder %v2219_v60, 0.0  ;;  %v764_v32 = vand.u32 2147483648, %v2219_v60  ;;  %v695_v45 = vsel %vm693_vm5, %v694_v50, %v692_v47 }
  0xe0   :  { %v1667_v40 = vpop.eup %1666  ;;  %vm712_vm1 = vcmp.eq.f32.partialorder %v2245_v15, inf  ;;  %vm768_vm2 = vcmp.eq.f32.partialorder %v2242_v1, inf  ;;  %vm885_vm3 = vcmask 1044484   ;;  %vm714_vm4 = vcmp.eq.f32.partialorder %v2245_v15, 0.0 }
  0xe1   :  { %v1669_v62 = vpop.eup %1668  ;;  %v753_v13 = vmul.f32 %v1667_v40, %v2203_v16  ;;  %v715_v46 = vand.u32 2147483648, %v2245_v15  ;;  %vm770_vm6 = vcmp.eq.f32.partialorder %v2242_v1, 0.0  ;;  %v784_v49 = vadd.f32 %v744_v22, %v2075_v21 }
  0xe2   :  { %v697_v28 = vmul.f32 %v1669_v62, %v2205_v4  ;;  %vm889_vm5 = vcmask 1046534   ;;  %v776_v48 = vadd.f32 %v688_v18, %v2077_v10  ;;  %v785_v47 = vadd.f32 %v751_v8, %v2084_v52 }
  0xe3   :  { %v755_v30 = vsel %vm754_vm11, %v2203_v16, %v753_v13  ;;  %v771_v16 = vand.u32 2147483648, %v2242_v1  ;;  %v882_v18 = vsel %vm881_vm7, %v826_v38, %v2197_v44  ;;  %v862_v13 = vrot.slane %v784_v49, %v2087_v0 }
  0xe4   :  { %v1671_v56 = vpop.eup %1670  ;;  %v699_v9 = vsel %vm698_vm8, %v2205_v4, %v697_v28  ;;  %v758_v36 = vsel %vm756_vm12, %v757_v5, %v755_v30  ;;  %v777_v5 = vadd.f32 %v695_v45, %v2094_v57  ;;  %vm2517_vm8 = vcmask 1043459  }
  0xe5   :  { %v1673_v12 = vpop.eup %1672  ;;  %v760_v17 = vmul.f32 %v1671_v56, %v2219_v60  ;;  %v702_v50 = vsel %vm700_vm9, %v701_v20, %v699_v9  ;;  %v786_v21 = vadd.f32 %v758_v36, %v2110_v55  ;;  %vm891_vm9 = vcmask 1047559  }
  0xe6   :  { %v704_v61 = vmul.f32 %v1673_v12, %v2221_v26  ;;  %v778_v52 = vadd.f32 %v702_v50, %v2116_v59  ;;  %v866_v59 = vrot.slane %v785_v47, %v2087_v0  ;;  %v789_v50 = vld [vmem:[%s2482_s1] sm:$0x3]  ;;  %vm995_vm11 = vcmask 31744  }
  0xe7   :  { %v762_v40 = vsel %vm761_vm14, %v2219_v60, %v760_v17  ;;  %v870_v38 = vrot.slane %v786_v21, %v2087_v0  ;;  %v790_v47 = vunpack.c.l.bf16 %v789_v50  ;;  %v795_v21 = vpop.permute.xlu0 %794 }
  0xe8   :  { %v1675_v22 = vpop.eup %1674  ;;  %v706_v4 = vsel %vm705_vm10, %v2221_v26, %v704_v61  ;;  %v765_v10 = vsel %vm763_vm15, %v764_v32, %v762_v40  ;;  %v830_v32 = vrot.slane %v776_v48, %v2087_v0  ;;  %v834_v26 = vrot.slane %v777_v5, %v2087_v0  ;;  %v984_v5 = vld [vmem:[%s2484_s4 + $0x8] sm:$0xff] }
  0xe9   :  { %v1677_v20 = vpop.eup %1676  ;;  %v709_v62 = vsel %vm707_vm13, %v708_v63, %v706_v4  ;;  %v767_v57 = vmul.f32 %v1675_v22, %v2242_v1  ;;  %v787_v55 = vadd.f32 %v765_v10, %v2149_v43  ;;  %v894_v43 = vsel %vm881_vm7, %v858_v11, %v2216_v2  ;;  %vm2518_vm7 = vmmov %vm2517_vm8 }
  0xea   :  { %v711_v8 = vmul.f32 %v1677_v20, %v2245_v15  ;;  %v779_v60 = vadd.f32 %v709_v62, %v2154_v37  ;;  %v838_v28 = vrot.slane %v778_v52, %v2087_v0  ;;  %v895_v2 = vsel %vm2517_vm8, %v862_v13, %v894_v43 }
  0xeb   :  { %v769_v44 = vsel %vm768_vm2, %v2242_v1, %v767_v57  ;;  %v874_v45 = vrot.slane %v787_v55, %v2087_v0  ;;  %v884_v12 = vsel %vm2518_vm7, %v830_v32, %v882_v18  ;;  %v896_v1 = vsel %vm885_vm3, %v866_v59, %v895_v2 }
  0xec   :  { %v713_v37 = vsel %vm712_vm1, %v2245_v15, %v711_v8  ;;  %v772_v63 = vsel %vm770_vm6, %v771_v16, %v769_v44  ;;  %v842_v34 = vrot.slane %v779_v60, %v2087_v0  ;;  %v886_v36 = vsel %vm885_vm3, %v834_v26, %v884_v12  ;;  %v983_v16 = vld [vmem:[%s2484_s4] sm:$0xff] }
  0xed   :  { %v716_v56 = vsel %vm714_vm4, %v715_v46, %v713_v37  ;;  %v788_v30 = vadd.f32 %v772_v63, %v2176_v6  ;;  %v897_v15 = vsel %vm887_vm0, %v870_v38, %v896_v1  ;;  %v888_v6 = vsel %vm887_vm0, %v838_v28, %v886_v36  ;;  %987 = vperm.xlu1 %1645, %v983_v16  }
  0xee   :  { %v780_v11 = vadd.f32 %v716_v56, %v2180_v3  ;;  %v898_v17 = vsel %vm889_vm5, %v874_v45, %v897_v15  ;;  %v890_v49 = vsel %vm889_vm5, %v842_v34, %v888_v6  ;;  %vm902_vm10 = vcmask 130048  }
  0xef   :  { %v878_v9 = vrot.slane %v788_v30, %v2087_v0  ;;  %vm1002_vm13 = vcmask 1043456   ;;  %v1102_v28 = vsub.s32 1, %v1732_v7  ;;  %v1095_v45 = vsub.s32 0, %v1732_v7 }
  0xf0   :  { %v846_v46 = vrot.slane %v780_v11, %v2087_v0  ;;  %v1614_v0 = vld [vmem:[%s2483_s3] sm:$0xff]   ;;  %v1116_v2 = vsub.s32 3, %v1732_v7  ;;  %v1109_v11 = vsub.s32 2, %v1732_v7  ;;  %v1123_v36 = vsub.s32 4, %v1732_v7 }
  0xf1   :  { %v899_v3 = vsel %vm891_vm9, %v878_v9, %v898_v17  ;;  %v1615_v40 = vunpack.c.l.bf16 %v1614_v0  ;;  %992 = vperm.xlu1 %1645, %v984_v5   ;;  %v1616_v18 = vunpack.c.h.bf16 %v1614_v0  ;;  %v1130_v9 = vsub.s32 5, %v1732_v7 }
  0xf2   :  { %v892_v61 = vsel %vm891_vm9, %v846_v46, %v890_v49  ;;  %v1137_v6 = vsub.s32 6, %v1732_v7  ;;  %v1144_v16 = vsub.s32 7, %v1732_v7 }
  0xf3   :  { %v1636_v48 = vpack.c.bf16 %v899_v3, %v892_v61  ;;  %1632 = vmatprep.mubr.msk.f32.mxu1 %vm995_vm11, %v1615_v40 }
  0xf5   :  { %1637 = vmatpush3.bf16.msra.mxu0 %v1636_v48 }
  0xf8   :  { %1628 = vmatmul.mubr.msk.f32.vlgmr.msra.gmra.mrb[0].mxu0 %vm902_vm10, %v790_v47 }
 0x16c   :  { %v988_v62 = vpop.permute.xlu1 %987 }
 0x170   :  { %v993_v57 = vpop.permute.xlu1 %992 }
 0x1cb   :  { %v972_v22 = vpop.f32.mrb[0].mxu0 }
 0x1cc   :  { %v973_v4 = vadd.f32 %v972_v22, %v795_v21  ;;  %v1629_v10 = vpop.f32.mrb[1].mxu0  ;;  %v1691_v22 = vmov 1966171168  }
 0x1ce   :  { %vm976_vm12 = vcmp.ge.f32.partialorder %v973_v4, 0.0  ;;  %v977_v52 = vmul.f32 0.1, %v973_v4 }
 0x1d0   :  { %v978_v20 = vsel %vm976_vm12, %v973_v4, %v977_v52  ;;  %v1303_v4 = vunpack.c.l.s4 %v1691_v22 }
 0x1d1   :  { %1630 = vmatprep.subr.msk.mxu1 %vm1002_vm13, %v978_v20 }
 0x1d2   :  { %1631 = vmatpush3.msk.msra.mxu1 %vm1002_vm13, %v978_v20  ;;  %v1304_v10 = vunpack.c.0.s8 %v1303_v4  ;;  %v2524_v4 = vld [vmem:[#allocation5_spill] sm:$0xff] }
 0x1d3   :  { %1633 = vmatmul.mubr.msk.f32.vlgmr.msra.gmra.mrb[0].mxu1 %vm995_vm11, %v1616_v18 }
 0x1d4   :  { %v2382_v52 = vsub.s32 %v1304_v10, %v1732_v7 }
 0x2a6   :  { %v1634_v55 = vpop.f32.mrb[0].mxu1 }
 0x2a7   :  { %v1078_v13 = vadd.f32 %v1634_v55, %v993_v57  ;;  %v1072_v8 = vpop.f32.mrb[1].mxu1 }
 0x2a8   :  { %v1073_v60 = vadd.f32 %v1072_v8, %v988_v62 }
 0x2a9   :  { %v1082_v32 = vsub.f32 0.0, %v1078_v13 }
 0x2aa   :  { %v1081_v44 = vsub.f32 0.0, %v1073_v60 }
 0x2ab   :  { %v1085_v59 = vmul.f32 1.442695, %v1082_v32 }
 0x2ac   :  { %v1083_v26 = vmul.f32 1.442695, %v1081_v44 }
 0x2ad   :  { %1678 = vpow2.f32 %v1085_v59 }
 0x2ae   :  { %1680 = vpow2.f32 %v1083_v26 }
 0x2b7   :  { %v1679_v38 = vpop.eup %1678 }
 0x2b8   :  { %v1088_v43 = vadd.f32 1.0, %v1679_v38  ;;  %v1681_v37 = vpop.eup %1680 }
 0x2b9   :  { %v1087_v63 = vadd.f32 1.0, %v1681_v37 }
 0x2ba   :  { %1682 = vrcp.f32 %v1088_v43 }
 0x2bb   :  { %1684 = vrcp.f32 %v1087_v63 }
 0x2c4   :  { %v1683_v56 = vpop.eup %1682 }
 0x2c5   :  { %v1159_v30 = vrot.slane %v1683_v56, %v1102_v28  ;;  %v1152_v34 = vrot.slane %v1683_v56, %v1095_v45  ;;  %v1173_v12 = vrot.slane %v1683_v56, %v1116_v2  ;;  %v1166_v1 = vrot.slane %v1683_v56, %v1109_v11  ;;  %v1685_v17 = vpop.eup %1684 }
 0x2c6   :  { %v1187_v15 = vrot.slane %v1683_v56, %v1130_v9  ;;  %v1180_v46 = vrot.slane %v1683_v56, %v1123_v36  ;;  %v1138_v49 = vrot.slane %v1685_v17, %v1137_v6  ;;  %v1096_v3 = vrot.slane %v1685_v17, %v1095_v45 }
 0x2c7   :  { %1161 = vbcast.lane.b32.xlu1 %v1159_v30, 256  ;;  %1154 = vbcast.lane.b32.xlu0 %v1152_v34, 256  ;;  %v1194_v50 = vrot.slane %v1683_v56, %v1137_v6  ;;  %v1103_v61 = vrot.slane %v1685_v17, %v1102_v28  ;;  %v1110_v48 = vrot.slane %v1685_v17, %v1109_v11 }
 0x2c8   :  { %v1117_v47 = vrot.slane %v1685_v17, %v1116_v2  ;;  %v1124_v0 = vrot.slane %v1685_v17, %v1123_v36  ;;  %v1131_v40 = vrot.slane %v1685_v17, %v1130_v9  ;;  %v1145_v5 = vrot.slane %v1685_v17, %v1144_v16  ;;  %v2519_v36 = vld [vmem:[#allocation12_spill] sm:$0xff] }
 0x2c9   :  { %v1201_v21 = vrot.slane %v1683_v56, %v1144_v16  ;;  %v2521_v17 = vld [vmem:[#allocation4_spill] sm:$0xff] }
 0x2cb   :  { %1175 = vbcast.lane.b32.xlu1 %v1173_v12, 256  ;;  %1168 = vbcast.lane.b32.xlu0 %v1166_v1, 256 }
 0x2cf   :  { %1189 = vbcast.lane.b32.xlu1 %v1187_v15, 256  ;;  %1182 = vbcast.lane.b32.xlu0 %v1180_v46, 256  ;;  %v2520_v46 = vld [vmem:[#allocation2_spill] sm:$0xff] }
 0x2d3   :  { %1140 = vbcast.lane.b32.xlu0 %v1138_v49, 256  ;;  %1098 = vbcast.lane.b32.xlu1 %v1096_v3, 256 }
 0x2d7   :  { %1196 = vbcast.lane.b32.xlu0 %v1194_v50, 256  ;;  %1105 = vbcast.lane.b32.xlu1 %v1103_v61, 256 }
 0x2db   :  { %1112 = vbcast.lane.b32.xlu1 %v1110_v48, 256  ;;  %v2522_v48 = vld [vmem:[#allocation3_spill] sm:$0xff] }
 0x2df   :  { %1119 = vbcast.lane.b32.xlu1 %v1117_v47, 256 }
 0x2e3   :  { %1126 = vbcast.lane.b32.xlu1 %v1124_v0, 256  ;;  %v2523_v0 = vld [vmem:[#allocation6_spill] sm:$0xff] }
 0x2e7   :  { %1133 = vbcast.lane.b32.xlu1 %v1131_v40, 256 }
 0x2eb   :  { %1147 = vbcast.lane.b32.xlu1 %v1145_v5, 256 }
 0x2ef   :  { %1203 = vbcast.lane.b32.xlu1 %v1201_v21, 256 }
 0x339   :  { %v1162_v18 = vpop.permute.xlu1 %1161  ;;  %v1155_v20 = vpop.permute.xlu0 %1154 }
 0x33a   :  { %v1223_v62 = vmul.f32 %v1162_v18, %v1765_v25  ;;  %v1224_v57 = vmul.f32 %v1162_v18, %v1795_v35  ;;  %v1221_v55 = vmul.f32 %v1155_v20, %v1759_v23  ;;  %v1222_v13 = vmul.f32 %v1155_v20, %v1783_v31  ;;  %v2525_v18 = vld [vmem:[#allocation7_spill] sm:$0xff] }
 0x33c   :  { %v1590_v8 = vpack.c.bf16 %v1224_v57, %v1223_v62  ;;  %v1589_v60 = vpack.c.bf16 %v1222_v13, %v1221_v55  ;;  %v2526_v13 = vld [vmem:[#allocation8_spill] sm:$0xff] }
 0x33d   :  { %v1176_v32 = vpop.permute.xlu1 %1175  ;;  %v1169_v59 = vpop.permute.xlu0 %1168 }
 0x33e   :  { %v1443_v44 = vrot.slane %v1590_v8, %v2382_v52  ;;  %v1428_v26 = vrot.slane %v1589_v60, %v2382_v52  ;;  %v1227_v7 = vmul.f32 %v1176_v32, %v1779_v29  ;;  %v1228_v38 = vmul.f32 %v1176_v32, %v1831_v54  ;;  %v2527_v60 = vld [vmem:[#allocation9_spill] sm:$0xff] }
 0x33f   :  { %v1225_v25 = vmul.f32 %v1169_v59, %v1771_v27  ;;  %v1226_v35 = vmul.f32 %v1169_v59, %v1815_v42 }
 0x340   :  { %1606 = vst.sshfl [vmem:[%s2485_s5 + $0x12] sm:$0x5 pattern:$0x73625140] %v1443_v44  ;;  %v1592_v23 = vpack.c.bf16 %v1228_v38, %v1227_v7  ;;  %v2528_v7 = vld [vmem:[#allocation10_spill] sm:$0xff] }
 0x341   :  { %1605 = vst.sshfl [vmem:[%s2485_s5 + $0x10] sm:$0x5 pattern:$0x73625140] %v1428_v26  ;;  %v1591_v31 = vpack.c.bf16 %v1226_v35, %v1225_v25  ;;  %v1190_v43 = vpop.permute.xlu1 %1189  ;;  %v1183_v37 = vpop.permute.xlu0 %1182  ;;  %v2529_v25 = vld [vmem:[#allocation11_spill] sm:$0xff] }
 0x342   :  { %v1473_v29 = vrot.slane %v1592_v23, %v2382_v52  ;;  %v1231_v54 = vmul.f32 %v1190_v43, %v1903_v58  ;;  %v1232_v27 = vmul.f32 %v1190_v43, %v1933_v14  ;;  %v1229_v42 = vmul.f32 %v1183_v37, %v1874_v39 }
 0x343   :  { %v1458_v63 = vrot.slane %v1591_v31, %v2382_v52  ;;  %v1230_v28 = vmul.f32 %v1183_v37, %v1895_v53  ;;  %v2530_v37 = vld [vmem:[#allocation14_spill] sm:$0xff] }
 0x344   :  { %1608 = vst.sshfl [vmem:[%s2485_s5 + $0x16] sm:$0x5 pattern:$0x73625140] %v1473_v29  ;;  %v1594_v45 = vpack.c.bf16 %v1232_v27, %v1231_v54  ;;  %v2531_v54 = vld [vmem:[#allocation16_spill] sm:$0xff] }
 0x345   :  { %1607 = vst.sshfl [vmem:[%s2485_s5 + $0x14] sm:$0x5 pattern:$0x73625140] %v1458_v63  ;;  %v1593_v56 = vpack.c.bf16 %v1230_v28, %v1229_v42  ;;  %v1141_v30 = vpop.permute.xlu0 %1140  ;;  %v1099_v58 = vpop.permute.xlu1 %1098 }
 0x346   :  { %v1503_v14 = vrot.slane %v1594_v45, %v2382_v52  ;;  %v1217_v39 = vmul.f32 %v1141_v30, %v1953_v51  ;;  %v1218_v34 = vmul.f32 %v1141_v30, %v1975_v19  ;;  %v1205_v53 = vmul.f32 %v1099_v58, %v1762_v24  ;;  %v2532_v45 = vld [vmem:[#allocation13_spill] sm:$0xff]  ;;  %v2533_v30 = vld [vmem:[#allocation15_spill] sm:$0xff] }
 0x347   :  { %v1488_v2 = vrot.slane %v1593_v56, %v2382_v52  ;;  %v1206_v11 = vmul.f32 %v1099_v58, %v1789_v33 }
 0x348   :  { %1610 = vst.sshfl [vmem:[%s2485_s5 + $0x1a] sm:$0x5 pattern:$0x73625140] %v1503_v14  ;;  %v1587_v12 = vpack.c.bf16 %v1218_v34, %v1217_v39 }
 0x349   :  { %1609 = vst.sshfl [vmem:[%s2485_s5 + $0x18] sm:$0x5 pattern:$0x73625140] %v1488_v2  ;;  %v1581_v1 = vpack.c.bf16 %v1206_v11, %v1205_v53  ;;  %v1197_v9 = vpop.permute.xlu0 %1196  ;;  %v1106_v51 = vpop.permute.xlu1 %1105 }
 0x34a   :  { %v1398_v19 = vrot.slane %v1587_v12, %v2382_v52  ;;  %v1233_v24 = vmul.f32 %v1197_v9, %v1944_v41  ;;  %v1234_v15 = vmul.f32 %v1197_v9, %v2519_v36  ;;  %v1207_v33 = vmul.f32 %v1106_v51, %v2520_v46 }
 0x34b   :  { %v1308_v6 = vrot.slane %v1581_v1, %v2382_v52  ;;  %v1208_v49 = vmul.f32 %v1106_v51, %v2521_v17 }
 0x34c   :  { %1603 = vst.sshfl [vmem:[%s2485_s5 + $0xc] sm:$0x5 pattern:$0x73625140] %v1398_v19  ;;  %v1595_v3 = vpack.c.bf16 %v1234_v15, %v1233_v24 }
 0x34d   :  { %1597 = vst.sshfl [vmem:[%s2485_s5] sm:$0x5 pattern:$0x73625140] %v1308_v6  ;;  %v1582_v50 = vpack.c.bf16 %v1208_v49, %v1207_v33  ;;  %v1113_v61 = vpop.permute.xlu1 %1112 }
 0x34e   :  { %v1518_v41 = vrot.slane %v1595_v3, %v2382_v52  ;;  %v1209_v47 = vmul.f32 %v1113_v61, %v2522_v48  ;;  %v1210_v40 = vmul.f32 %v1113_v61, %v2523_v0 }
 0x34f   :  { %v1323_v16 = vrot.slane %v1582_v50, %v2382_v52 }
 0x350   :  { %1611 = vst.sshfl [vmem:[%s2485_s5 + $0x1c] sm:$0x5 pattern:$0x73625140] %v1518_v41  ;;  %v1583_v5 = vpack.c.bf16 %v1210_v40, %v1209_v47 }
 0x351   :  { %1598 = vst.sshfl [vmem:[%s2485_s5 + $0x2] sm:$0x5 pattern:$0x73625140] %v1323_v16  ;;  %v1120_v21 = vpop.permute.xlu1 %1119 }
 0x352   :  { %v1338_v22 = vrot.slane %v1583_v5, %v2382_v52  ;;  %v1211_v10 = vmul.f32 %v1120_v21, %v2524_v4  ;;  %v1212_v20 = vmul.f32 %v1120_v21, %v2525_v18 }
 0x354   :  { %1599 = vst.sshfl [vmem:[%s2485_s5 + $0x4] sm:$0x5 pattern:$0x73625140] %v1338_v22  ;;  %v1584_v62 = vpack.c.bf16 %v1212_v20, %v1211_v10 }
 0x355   :  { %v1127_v57 = vpop.permute.xlu1 %1126 }
 0x356   :  { %v1353_v55 = vrot.slane %v1584_v62, %v2382_v52  ;;  %v1213_v8 = vmul.f32 %v1127_v57, %v2526_v13  ;;  %v1214_v32 = vmul.f32 %v1127_v57, %v2527_v60 }
 0x358   :  { %1600 = vst.sshfl [vmem:[%s2485_s5 + $0x6] sm:$0x5 pattern:$0x73625140] %v1353_v55  ;;  %v1585_v59 = vpack.c.bf16 %v1214_v32, %v1213_v8 }
 0x359   :  { %v1134_v44 = vpop.permute.xlu1 %1133 }
 0x35a   :  { %v1368_v26 = vrot.slane %v1585_v59, %v2382_v52  ;;  %v1215_v38 = vmul.f32 %v1134_v44, %v2528_v7  ;;  %v1216_v35 = vmul.f32 %v1134_v44, %v2529_v25 }
 0x35c   :  { %1601 = vst.sshfl [vmem:[%s2485_s5 + $0x8] sm:$0x5 pattern:$0x73625140] %v1368_v26  ;;  %v1586_v23 = vpack.c.bf16 %v1216_v35, %v1215_v38 }
 0x35d   :  { %v1148_v31 = vpop.permute.xlu1 %1147 }
 0x35e   :  { %v1383_v43 = vrot.slane %v1586_v23, %v2382_v52  ;;  %v1219_v29 = vmul.f32 %v1148_v31, %v2530_v37  ;;  %v1220_v27 = vmul.f32 %v1148_v31, %v2531_v54 }
 0x360   :  { %1602 = vst.sshfl [vmem:[%s2485_s5 + $0xa] sm:$0x5 pattern:$0x73625140] %v1383_v43  ;;  %v1588_v42 = vpack.c.bf16 %v1220_v27, %v1219_v29 }
 0x361   :  { %v1204_v63 = vpop.permute.xlu1 %1203 }
 0x362   :  { %v1413_v28 = vrot.slane %v1588_v42, %v2382_v52  ;;  %v1235_v56 = vmul.f32 %v1204_v63, %v2532_v45  ;;  %v1236_v58 = vmul.f32 %v1204_v63, %v2533_v30 }
 0x364   :  { %1604 = vst.sshfl [vmem:[%s2485_s5 + $0xe] sm:$0x5 pattern:$0x73625140] %v1413_v28  ;;  %v1596_v14 = vpack.c.bf16 %v1236_v58, %v1235_v56 }
 0x366   :  { %v1533_v39 = vrot.slane %v1596_v14, %v2382_v52 }
 0x368   :  { %1612 = vst.sshfl [vmem:[%s2485_s5 + $0x1e] sm:$0x5 pattern:$0x73625140] %v1533_v39 }

// kernel: closed_call.218
= control target key start
LH: loop header
LB: loop body
LE: loop exit
PB: predicated region body
PF: predicated region fallthrough
CT: control target
= control target key end

     0   :  { %v467_v1 = vmov 0   ;;  %vm247_vm0 = vcmask 130048   ;;  %s619_s0 = inlined_call_operand.vmem [shape: bf16[144,512], index: 0, kind: input, shape index: {}]   ;;  %s620_s1 = inlined_call_operand.vmem [shape: bf16[8,144], index: 1, kind: input, shape index: {}]   ;;  %s621_s2 = inlined_call_operand.vmem [shape: f32[8,1], index: 2, kind: input, shape index: {}]   ;;  %s622_s3 = inlined_call_operand.vmem [shape: bf16[8,512], index: 3, kind: input, shape index: {}]   ;;  %s623_s4 = inlined_call_operand.vmem [shape: bf16[8,512], index: 4, kind: output, shape index: {}]  }
   0x1   :  { %v411_v0 = vld [vmem:[%s619_s0 + $0x4] ss:$16 sps:$4 sm:$0xff]   ;;  %410 = vset.pattern.permute.xlu0 %v467_v1  ;;  %v413_v2 = vld [vmem:[%s619_s0 + $0xc] ss:$16 sps:$4 sm:$0xff]   ;;  %v415_v3 = vld [vmem:[%s619_s0] ss:$16 sps:$4 sm:$0xff]  }
   0x2   :  { %251 = vmatprep.subr.bf16.mxu0 %v411_v0  ;;  %v416_v4 = vld [vmem:[%s619_s0 + $0x8] ss:$16 sps:$4 sm:$0xff]   ;;  %292 = vmatprep.subr.bf16.mxu1 %v413_v2  ;;  %v417_v5 = vld [vmem:[%s619_s0 + $0x24] ss:$16 sps:$4 sm:$0xff]   ;;  %v419_v6 = vld [vmem:[%s619_s0 + $0x2c] ss:$16 sps:$4 sm:$0xff]  }
   0x3   :  { %252 = vmatpush1.bf16.msra.mxu0 %v415_v3  ;;  %293 = vmatpush1.bf16.msra.mxu1 %v416_v4  ;;  %v421_v7 = vld [vmem:[%s619_s0 + $0x20] ss:$16 sps:$4 sm:$0xff]   ;;  %v422_v8 = vld [vmem:[%s619_s0 + $0x28] ss:$16 sps:$4 sm:$0xff]   ;;  %v423_v9 = vld [vmem:[%s619_s0 + $0x44] ss:$16 sps:$4 sm:$0xff]  }
   0x4   :  { %253 = vmatprep.subr.bf16.mxu0 %v417_v5  ;;  %294 = vmatprep.subr.bf16.mxu1 %v419_v6  ;;  %v425_v10 = vld [vmem:[%s619_s0 + $0x4c] ss:$16 sps:$4 sm:$0xff]   ;;  %v427_v11 = vld [vmem:[%s619_s0 + $0x40] ss:$16 sps:$4 sm:$0xff]   ;;  %v428_v12 = vld [vmem:[%s619_s0 + $0x48] ss:$16 sps:$4 sm:$0xff]  }
   0x5   :  { %v429_v13 = vld [vmem:[%s619_s0 + $0x64] ss:$16 sps:$4 sm:$0xff]   ;;  %v431_v14 = vld [vmem:[%s619_s0 + $0x6c] ss:$16 sps:$4 sm:$0xff]   ;;  %v433_v15 = vld [vmem:[%s619_s0 + $0x60] ss:$16 sps:$4 sm:$0xff]  }
   0x6   :  { %v434_v16 = vld [vmem:[%s619_s0 + $0x68] ss:$16 sps:$4 sm:$0xff]   ;;  %v435_v17 = vld [vmem:[%s619_s0 + $0x84] ss:$16 sps:$4 sm:$0xff]   ;;  %v437_v18 = vld [vmem:[%s619_s0 + $0x8c] ss:$16 sps:$4 sm:$0xff]  }
   0x7   :  { %254 = vmatpush1.bf16.msra.mxu0 %v421_v7  ;;  %295 = vmatpush1.bf16.msra.mxu1 %v422_v8  ;;  %v439_v19 = vld [vmem:[%s619_s0 + $0x80] ss:$16 sps:$4 sm:$0xff]   ;;  %v440_v20 = vld [vmem:[%s619_s0 + $0x88] ss:$16 sps:$4 sm:$0xff]   ;;  %v441_v21 = vld [vmem:[%s619_s0 + $0xa4] ss:$16 sps:$4 sm:$0xff]  }
   0x8   :  { %255 = vmatprep.subr.bf16.mxu0 %v423_v9  ;;  %296 = vmatprep.subr.bf16.mxu1 %v425_v10  ;;  %v443_v22 = vld [vmem:[%s619_s0 + $0xac] ss:$16 sps:$4 sm:$0xff]   ;;  %v445_v23 = vld [vmem:[%s619_s0 + $0xa0] ss:$16 sps:$4 sm:$0xff]   ;;  %v446_v24 = vld [vmem:[%s619_s0 + $0xa8] ss:$16 sps:$4 sm:$0xff]  }
   0x9   :  { %v447_v25 = vld [vmem:[%s619_s0 + $0xc4] ss:$16 sps:$4 sm:$0xff]   ;;  %v449_v26 = vld [vmem:[%s619_s0 + $0xcc] ss:$16 sps:$4 sm:$0xff]   ;;  %v451_v27 = vld [vmem:[%s619_s0 + $0xc0] ss:$16 sps:$4 sm:$0xff]  }
   0xa   :  { %v452_v28 = vld [vmem:[%s619_s0 + $0xc8] ss:$16 sps:$4 sm:$0xff]   ;;  %v18_v29 = vld [vmem:[%s620_s1] sm:$0xff]  ;;  %v455_v32 = vld [vmem:[%s619_s0 + $0xec] ss:$16 sps:$4 sm:$0xff]  }
   0xb   :  { %256 = vmatpush1.bf16.msra.mxu0 %v427_v11  ;;  %297 = vmatpush1.bf16.msra.mxu1 %v428_v12  ;;  %v55_v30 = vld [vmem:[%s621_s2] sm:$0xff]  ;;  %v366_v33 = vcombine.high %v18_v29, %v18_v29  ;;  %v458_v35 = vld [vmem:[%s619_s0 + $0xe8] ss:$16 sps:$4 sm:$0xff]   ;;  %v461_v37 = vld [vmem:[%s619_s0 + $0x10c] ss:$16 sps:$4 sm:$0xff]   ;;  %v365_v40 = vcombine.low %v18_v29, %v18_v29 }
   0xc   :  { %257 = vmatprep.subr.bf16.mxu0 %v429_v13  ;;  %298 = vmatprep.subr.bf16.mxu1 %v431_v14  ;;  %v453_v31 = vld [vmem:[%s619_s0 + $0xe4] ss:$16 sps:$4 sm:$0xff]   ;;  %v457_v34 = vld [vmem:[%s619_s0 + $0xe0] ss:$16 sps:$4 sm:$0xff]   ;;  %v464_v39 = vld [vmem:[%s619_s0 + $0x108] ss:$16 sps:$4 sm:$0xff]  }
   0xd   :  { %58 = vperm.xlu0 %410, %v55_v30   ;;  %403 = vmatprep.mubr.msk.bf16.mxu0 %vm247_vm0, %v366_v33  ;;  %v459_v36 = vld [vmem:[%s619_s0 + $0x104] ss:$16 sps:$4 sm:$0xff]   ;;  %v463_v38 = vld [vmem:[%s619_s0 + $0x100] ss:$16 sps:$4 sm:$0xff]   ;;  %v334_v42 = vld [vmem:[%s622_s3 + $0x8] sm:$0xff] }
   0xe   :  { %404 = vmatprep.mubr.msk.bf16.mxu1 %vm247_vm0, %v366_v33  ;;  %v333_v41 = vld [vmem:[%s622_s3] sm:$0xff]  ;;  %v337_v45 = vunpack.c.l.bf16 %v334_v42  ;;  %v338_v49 = vunpack.c.h.bf16 %v334_v42 }
   0xf   :  { %258 = vmatpush1.bf16.msra.mxu0 %v433_v15  ;;  %299 = vmatpush1.bf16.msra.mxu1 %v434_v16  ;;  %v335_v44 = vunpack.c.l.bf16 %v333_v41  ;;  %v336_v48 = vunpack.c.h.bf16 %v333_v41 }
  0x10   :  { %259 = vmatprep.subr.bf16.mxu0 %v435_v17  ;;  %300 = vmatprep.subr.bf16.mxu1 %v437_v18 }
  0x13   :  { %260 = vmatpush1.bf16.msra.mxu0 %v439_v19  ;;  %301 = vmatpush1.bf16.msra.mxu1 %v440_v20 }
  0x14   :  { %261 = vmatprep.subr.bf16.mxu0 %v441_v21  ;;  %302 = vmatprep.subr.bf16.mxu1 %v443_v22 }
  0x17   :  { %262 = vmatpush1.bf16.msra.mxu0 %v445_v23  ;;  %303 = vmatpush1.bf16.msra.mxu1 %v446_v24 }
  0x18   :  { %263 = vmatprep.subr.bf16.mxu0 %v447_v25  ;;  %304 = vmatprep.subr.bf16.mxu1 %v449_v26 }
  0x1b   :  { %264 = vmatpush1.bf16.msra.mxu0 %v451_v27  ;;  %305 = vmatpush1.bf16.msra.mxu1 %v452_v28 }
  0x1c   :  { %265 = vmatprep.subr.bf16.mxu0 %v453_v31  ;;  %306 = vmatprep.subr.bf16.mxu1 %v455_v32 }
  0x1f   :  { %266 = vmatpush1.bf16.msra.mxu0 %v457_v34  ;;  %307 = vmatpush1.bf16.msra.mxu1 %v458_v35 }
  0x20   :  { %267 = vmatprep.subr.bf16.mxu0 %v459_v36  ;;  %308 = vmatprep.subr.bf16.mxu1 %v461_v37 }
  0x23   :  { %268 = vmatpush1.bf16.msra.mxu0 %v463_v38  ;;  %309 = vmatpush1.bf16.msra.mxu1 %v464_v39 }
  0x26   :  { %284 = vmatmul.mubr.bf16.vlgmr.msra.gmra.mrb[0].mxu0 %v365_v40  ;;  %325 = vmatmul.mubr.bf16.vlgmr.msra.gmra.mrb[0].mxu1 %v365_v40 }
  0x8c   :  { %v59_v43 = vpop.permute.xlu0 %58 }
  0xf9   :  { %v285_v46 = vpop.f32.mrb[0].mxu0  ;;  %v326_v47 = vpop.f32.mrb[0].mxu1 }
  0xfa   :  { %v286_v50 = vadd.f32 %v285_v46, %v59_v43  ;;  %v327_v51 = vadd.f32 %v326_v47, %v59_v43  ;;  %v287_v52 = vpop.f32.mrb[1].mxu0  ;;  %v328_v53 = vpop.f32.mrb[1].mxu1 }
  0xfb   :  { %v288_v54 = vadd.f32 %v287_v52, %v59_v43  ;;  %v329_v55 = vadd.f32 %v328_v53, %v59_v43  ;;  %v289_v56 = vpop.f32.mrb[2].mxu0  ;;  %v330_v57 = vpop.f32.mrb[2].mxu1 }
  0xfc   :  { %v339_v58 = vadd.f32 %v335_v44, %v286_v50  ;;  %v341_v59 = vadd.f32 %v337_v45, %v327_v51  ;;  %v290_v60 = vpop.f32.mrb[3].mxu0  ;;  %v331_v61 = vpop.f32.mrb[3].mxu1 }
  0xfd   :  { %v340_v62 = vadd.f32 %v336_v48, %v288_v54  ;;  %v342_v63 = vadd.f32 %v338_v49, %v329_v55 }
  0xff   :  { %v407_v0 = vpack.c.bf16 %v340_v62, %v339_v58  ;;  %v408_v1 = vpack.c.bf16 %v342_v63, %v341_v59 }
 0x101   :  { %359 = vst [vmem:[%s623_s4] sm:$0xff] %v407_v0  ;;  %360 = vst [vmem:[%s623_s4 + $0x8] sm:$0xff] %v408_v1 }

// kernel: feature_process_fwd.5
= control target key start
LH: loop header
LB: loop body
LE: loop exit
PB: predicated region body
PF: predicated region fallthrough
CT: control target
= control target key end

     0   :  { %v223_v1 = vmov 0   ;;  %vm86_vm0 = vcmask 1043456   ;;  %vm82_vm1 = vcmask 326656   ;;  %s292_s0 = inlined_call_operand.vmem [shape: bf16[40,512], index: 0, kind: input, shape index: {}]   ;;  %s293_s2 = inlined_call_operand.vmem [shape: f32[8,1], index: 2, kind: input, shape index: {}]   ;;  %s294_s1 = inlined_call_operand.vmem [shape: bf16[8,40], index: 1, kind: input, shape index: {}]   ;;  %s295_s3 = inlined_call_operand.vmem [shape: f32[8,512], index: 3, kind: output, shape index: {}]  }
   0x1   :  { %v207_v0 = vld [vmem:[%s292_s0 + $0x4] ss:$16 sps:$4 sm:$0xff]   ;;  %131 = vmatprep.mubr.bf16.mxu0 %v223_v1  ;;  %172 = vmatprep.mubr.bf16.mxu1 %v223_v1  ;;  %v209_v2 = vld [vmem:[%s292_s0 + $0xc] ss:$16 sps:$4 sm:$0xff]   ;;  %v211_v3 = vld [vmem:[%s292_s0] ss:$16 sps:$4 sm:$0xff]  }
   0x2   :  { %206 = vset.pattern.permute.xlu0 %v223_v1  ;;  %99 = vmatprep.subr.bf16.mxu0 %v207_v0  ;;  %v212_v4 = vld [vmem:[%s292_s0 + $0x8] ss:$16 sps:$4 sm:$0xff]   ;;  %v213_v5 = vld [vmem:[%s292_s0 + $0x24] ss:$16 sps:$4 sm:$0xff]   ;;  %v215_v6 = vld [vmem:[%s292_s0 + $0x2c] ss:$16 sps:$4 sm:$0xff]  }
   0x3   :  { %140 = vmatprep.subr.bf16.mxu1 %v209_v2  ;;  %100 = vmatpush1.bf16.msra.mxu0 %v211_v3  ;;  %v217_v7 = vld [vmem:[%s292_s0 + $0x20] ss:$16 sps:$4 sm:$0xff]   ;;  %v218_v8 = vld [vmem:[%s292_s0 + $0x28] ss:$16 sps:$4 sm:$0xff]  }
   0x4   :  { %141 = vmatpush1.bf16.msra.mxu1 %v212_v4  ;;  %101 = vmatprep.subr.bf16.mxu0 %v213_v5  ;;  %v24_v9 = vld [vmem:[%s292_s0 + $0x40] sm:$0xff]  ;;  %v25_v10 = vld [vmem:[%s292_s0 + $0x48] sm:$0xff] }
   0x5   :  { %142 = vmatprep.subr.bf16.mxu1 %v215_v6  ;;  %v198_v11 = vcombine.high %v24_v9, %v24_v9  ;;  %v200_v12 = vcombine.high %v25_v10, %v25_v10  ;;  %v197_v13 = vcombine.low %v24_v9, %v24_v9  ;;  %v199_v14 = vcombine.low %v25_v10, %v25_v10  ;;  %v26_v15 = vld [vmem:[%s293_s2] sm:$0xff] }
   0x6   :  { %29 = vperm.xlu0 %206, %v26_v15   ;;  %v15_v18 = vld [vmem:[%s294_s1] sm:$0xf] }
   0x7   :  { %102 = vmatpush1.bf16.msra.mxu0 %v217_v7  ;;  %v88_v16 = vsel %vm86_vm0, %v197_v13, 0  ;;  %v94_v17 = vsel %vm86_vm0, %v199_v14, 0 }
   0x8   :  { %143 = vmatpush1.bf16.msra.mxu1 %v218_v8  ;;  %201 = vmatprep.subr.msk.bf16.mxu0 %vm86_vm0, %v198_v11 }
   0x9   :  { %203 = vmatprep.subr.msk.bf16.mxu1 %vm86_vm0, %v200_v12 }
   0xb   :  { %104 = vmatpush1.bf16.msra.mxu0 %v88_v16 }
   0xc   :  { %145 = vmatpush1.bf16.msra.mxu1 %v94_v17 }
   0xe   :  { %202 = vmatmul.mubr.msk.bf16.vlgmr.msra.gmra.mrb[0].mxu0 %vm82_vm1, %v15_v18 }
   0xf   :  { %204 = vmatmul.mubr.msk.bf16.vlgmr.msra.gmra.mrb[0].mxu1 %vm82_vm1, %v15_v18 }
  0x85   :  { %v30_v19 = vpop.permute.xlu0 %29 }
  0xe1   :  { %v133_v20 = vpop.f32.mrb[0].mxu0 }
  0xe2   :  { %v174_v21 = vpop.f32.mrb[0].mxu1  ;;  %v134_v22 = vadd.f32 %v133_v20, %v30_v19  ;;  %v135_v24 = vpop.f32.mrb[1].mxu0 }
  0xe3   :  { %v175_v23 = vadd.f32 %v174_v21, %v30_v19  ;;  %v176_v25 = vpop.f32.mrb[1].mxu1  ;;  %v136_v26 = vadd.f32 %v135_v24, %v30_v19  ;;  %v137_v28 = vpop.f32.mrb[2].mxu0 }
  0xe4   :  { %v177_v27 = vadd.f32 %v176_v25, %v30_v19  ;;  %v178_v29 = vpop.f32.mrb[2].mxu1  ;;  %181 = vst [vmem:[%s295_s3] sm:$0xff] %v134_v22  ;;  %v138_v30 = vpop.f32.mrb[3].mxu0 }
  0xe5   :  { %183 = vst [vmem:[%s295_s3 + $0x10] sm:$0xff] %v175_v23  ;;  %v179_v31 = vpop.f32.mrb[3].mxu1  ;;  %182 = vst [vmem:[%s295_s3 + $0x8] sm:$0xff] %v136_v26 }
  0xe6   :  { %184 = vst [vmem:[%s295_s3 + $0x18] sm:$0xff] %v177_v27 }

</bundles_post_ra>
